<compile_context>
chip_gen: v5e
topology: v5e:2x2
jax: 0.10.0
libtpu: 0.0.40
codegen_flags: <defaults>
</compile_context>

<pallas_src>
import jax
import jax.numpy as jnp
from jax.experimental import pallas as pl
from jax.experimental.pallas import tpu as pltpu

EPS = 1e-5          # torch.nn.BatchNorm2d default
K = 3               # kernel_size (EDSR default_conv -> "same" padding)
PAD = K // 2
RES_SCALE = 1.0


# --------------------------- kernel helpers ---------------------------------
def _zero_halo(pad_ref, h, w, c):
    """Zero only the 1-pixel halo border of the (h+2P, w+2P, c) VMEM scratch."""
    zr = jnp.zeros((PAD, w + 2 * PAD, c), jnp.float32)
    pad_ref[0:PAD, :, :] = zr
    pad_ref[h + PAD:h + 2 * PAD, :, :] = zr
    zc = jnp.zeros((h, PAD, c), jnp.float32)
    pad_ref[PAD:h + PAD, 0:PAD, :] = zc
    pad_ref[PAD:h + PAD, w + PAD:w + 2 * PAD, :] = zc


def _im2col_matmul(pad_ref, w_ref, h, w, cin, mxu_dtype):
    """3x3 'same' conv as ONE (h*w, 9*cin) x (9*cin, cout) MXU matmul (f32 acc)."""
    xp = pad_ref[...]                                       # (h+2P, w+2P, cin) f32
    taps = [xp[dh:dh + h, dw:dw + w, :] for dh in range(K) for dw in range(K)]
    patches = jnp.concatenate(taps, axis=-1).reshape(h * w, K * K * cin)
    return jnp.dot(patches.astype(mxu_dtype), w_ref[...],
                   preferred_element_type=jnp.float32)       # (h*w, cout) f32


def _pick_images_per_block(n, h, w, c, itemsize=4, target_bytes=2 << 20):
    """Largest divisor of n whose per-step activation slab stays <= target."""
    per_img = h * w * c * itemsize
    best = 1
    for d in range(1, n + 1):
        if n % d:
            continue
        if d != 1 and d * per_img > target_bytes:
            continue
        if d != n and ((d * h * w) % 8 or (d * h) % 8):
            continue
        best = d
    return best


# ------------------------------ wrapper ---------------------------------------
def preresblock(x_nchw, params, res_scale=RES_SCALE, store_dtype=jnp.bfloat16):
    """NCHW in / NCHW out.  All heavy compute inside gridded Pallas kernels."""
    w1, b1, g1, be1, w2, b2, g2, be2 = params
    del b1, b2      # conv biases cancel exactly under training-mode BatchNorm

    x = jnp.transpose(x_nchw, (0, 2, 3, 1)).astype(jnp.float32)   # NHWC
    N, H, W, Cin = x.shape
    Cout = w1.shape[-1]
    nhw = float(N * H * W)
    mxu_dtype = store_dtype           # bf16 MXU operands on the perf path

    nb = _pick_images_per_block(N, H, W, max(Cin, Cout))
    G = N // nb                        # grid steps
    HW = H * W

    # (kh, kw, Cin, Cout) -> (9*Cin, Cout); row order matches im2col tap order.
    w1m = w1.reshape(K * K * Cin, Cout).astype(mxu_dtype)
    w2m = w2.reshape(K * K * Cout, Cout).astype(mxu_dtype)

    # Zero-copy views of contiguous NHWC buffers.
    x_flat = x.reshape(N * HW, Cin)

    # "arbitrary" on the batch axis: passes 1/2 rely on a persistent scratch
    # (halo zeroed once) and a resident stats accumulator.  On v5e/v6e
    # (single TC) parallel-vs-arbitrary is a no-op; v7x megacore sharding of
    # this axis would need per-core stat partials (see fused-grid TODO above).
    cp_seq = pltpu.CompilerParams(
        dimension_semantics=("arbitrary",),
        vmem_limit_bytes=48 * 1024 * 1024)   # v7x-safe; raise toward ~100 MiB on v5e/v6e
    cp_par = pltpu.CompilerParams(
        dimension_semantics=("parallel",),
        vmem_limit_bytes=48 * 1024 * 1024)

    # ---- pass 1: conv1 + accumulated BN1 partial sums ------------------------
    def conv1_stats_kernel(x_ref, w1_ref, acc1_ref, st1_ref, xpad_ref):
        @pl.when(pl.program_id(0) == 0)
        def _():
            _zero_halo(xpad_ref, H, W, Cin)        # scratch persists across steps
            st1_ref[...] = jnp.zeros_like(st1_ref)
        s = jnp.zeros((1, Cout), jnp.float32)
        ss = jnp.zeros((1, Cout), jnp.float32)
        for b in range(nb):                         # static, small
            img = x_ref[pl.ds(b * HW, HW), :].reshape(H, W, Cin)
            xpad_ref[PAD:H + PAD, PAD:W + PAD, :] = img
            acc = _im2col_matmul(xpad_ref, w1_ref, H, W, Cin, mxu_dtype)
            s = s + jnp.sum(acc, axis=0, keepdims=True)
            ss = ss + jnp.sum(acc * acc, axis=0, keepdims=True)
            acc1_ref[pl.ds(b * HW, HW), :] = acc.astype(store_dtype)
        st1_ref[...] = st1_ref[...] + jnp.concatenate([s, ss], axis=0)

    acc1, st1 = pl.pallas_call(
        conv1_stats_kernel,
        out_shape=(jax.ShapeDtypeStruct((N * HW, Cout), store_dtype),
                   jax.ShapeDtypeStruct((2, Cout), jnp.float32)),
        grid=(G,),
        in_specs=[pl.BlockSpec((nb * HW, Cin), lambda n: (n, 0)),
                  pl.BlockSpec((K * K * Cin, Cout), lambda n: (0, 0))],
        out_specs=(pl.BlockSpec((nb * HW, Cout), lambda n: (n, 0)),
                   pl.BlockSpec((2, Cout), lambda n: (0, 0))),
        scratch_shapes=[pltpu.VMEM((H + 2 * PAD, W + 2 * PAD, Cin), jnp.float32)],
        compiler_params=cp_seq,
    )(x_flat, w1m)

    # Tiny per-channel glue: global BN1 stats -> folded scale/shift.
    mean1 = st1[0] / nhw
    var1 = st1[1] / nhw - mean1 * mean1
    inv1 = g1 * jax.lax.rsqrt(var1 + EPS)
    scale1 = inv1
    shift1 = be1 - mean1 * inv1
    ss1 = jnp.stack([scale1, shift1]).astype(jnp.float32)               # (2, Cout)
    ss1t = jnp.stack([jnp.tile(scale1, W),
                      jnp.tile(shift1, W)]).astype(jnp.float32)         # (2, W*Cout)

    # ---- pass 2: folded BN1 + ReLU -> conv2 + accumulated BN2 partial sums ----
    def bn1_relu_conv2_stats_kernel(acc1_ref, ss1_ref, w2_ref,
                                    acc2_ref, st2_ref, ypad_ref):
        @pl.when(pl.program_id(0) == 0)
        def _():
            _zero_halo(ypad_ref, H, W, Cout)
            st2_ref[...] = jnp.zeros_like(st2_ref)
        sc1 = ss1_ref[0:1, :]                       # (1, Cout), hoisted
        sh1 = ss1_ref[1:2, :]
        s = jnp.zeros((1, Cout), jnp.float32)
        ss = jnp.zeros((1, Cout), jnp.float32)
        for b in range(nb):
            a1 = acc1_ref[pl.ds(b * HW, HW), :].astype(jnp.float32)
            y1 = jnp.maximum(a1 * sc1 + sh1, 0.0)   # folded BN1 + ReLU (f32 VPU)
            ypad_ref[PAD:H + PAD, PAD:W + PAD, :] = y1.reshape(H, W, Cout)
            acc = _im2col_matmul(ypad_ref, w2_ref, H, W, Cout, mxu_dtype)
            s = s + jnp.sum(acc, axis=0, keepdims=True)
            ss = ss + jnp.sum(acc * acc, axis=0, keepdims=True)
            acc2_ref[pl.ds(b * HW, HW), :] = acc.astype(store_dtype)
        st2_ref[...] = st2_ref[...] + jnp.concatenate([s, ss], axis=0)

    acc2, st2 = pl.pallas_call(
        bn1_relu_conv2_stats_kernel,
        out_shape=(jax.ShapeDtypeStruct((N * HW, Cout), store_dtype),
                   jax.ShapeDtypeStruct((2, Cout), jnp.float32)),
        grid=(G,),
        in_specs=[pl.BlockSpec((nb * HW, Cout), lambda n: (n, 0)),
                  pl.BlockSpec((2, Cout), lambda n: (0, 0)),
                  pl.BlockSpec((K * K * Cout, Cout), lambda n: (0, 0))],
        out_specs=(pl.BlockSpec((nb * HW, Cout), lambda n: (n, 0)),
                   pl.BlockSpec((2, Cout), lambda n: (0, 0))),
        scratch_shapes=[pltpu.VMEM((H + 2 * PAD, W + 2 * PAD, Cout), jnp.float32)],
        compiler_params=cp_seq,
    )(acc1, ss1, w2m)

    # Global BN2 stats; fold res_scale into BN2's scale/shift; tile to lanes.
    mean2 = st2[0] / nhw
    var2 = st2[1] / nhw - mean2 * mean2
    inv2 = g2 * jax.lax.rsqrt(var2 + EPS)
    scale2 = res_scale * inv2
    shift2 = res_scale * (be2 - mean2 * inv2)
    ss2t = jnp.stack([jnp.tile(scale2, W),
                      jnp.tile(shift2, W)]).astype(jnp.float32)         # (2, W*Cout)

    # ---- pass 3: lane-dense affine + residual (y1 recomputed, no HBM y1) -----
    def affine_residual_kernel(a1_ref, a2_ref, p1_ref, p2_ref, out_ref):
        a1 = a1_ref[...].astype(jnp.float32)
        a2 = a2_ref[...].astype(jnp.float32)
        y1 = jnp.maximum(a1 * p1_ref[0:1, :] + p1_ref[1:2, :], 0.0)
        out_ref[...] = a2 * p2_ref[0:1, :] + p2_ref[1:2, :] + y1

    acc1_ld = acc1.reshape(N * H, W * Cout)     # zero-copy contiguous reshapes
    acc2_ld = acc2.reshape(N * H, W * Cout)
    RB = nb * H
    out2d = pl.pallas_call(
        affine_residual_kernel,
        out_shape=jax.ShapeDtypeStruct((N * H, W * Cout), jnp.float32),
        grid=(G,),
        in_specs=[pl.BlockSpec((RB, W * Cout), lambda n: (n, 0)),
                  pl.BlockSpec((RB, W * Cout), lambda n: (n, 0)),
                  pl.BlockSpec((2, W * Cout), lambda n: (0, 0)),
                  pl.BlockSpec((2, W * Cout), lambda n: (0, 0))],
        out_specs=pl.BlockSpec((RB, W * Cout), lambda n: (n, 0)),
        compiler_params=cp_par,
    )(acc1_ld, acc2_ld, ss1t, ss2t)

    out = out2d.reshape(N, H, W, Cout)
    return jnp.transpose(out, (0, 3, 1, 2))      # back to NCHW


# ---------------- pure-JAX reference (for correctness check) -----------------
def preresblock_ref(x_nchw, params, res_scale=RES_SCALE):
    w1, b1, g1, be1, w2, b2, g2, be2 = params

    def conv(x, w_hwio, b):
        w_oihw = jnp.transpose(w_hwio, (3, 2, 0, 1))
        y = jax.lax.conv_general_dilated(
            x, w_oihw, window_strides=(1, 1), padding="SAME",
            dimension_numbers=("NCHW", "OIHW", "NCHW"))
        return y + b[None, :, None, None]

    def bn(x, g, be):
        mean = jnp.mean(x, axis=(0, 2, 3), keepdims=True)
        var = jnp.mean((x - mean) ** 2, axis=(0, 2, 3), keepdims=True)
        return ((x - mean) * jax.lax.rsqrt(var + EPS)
                * g[None, :, None, None] + be[None, :, None, None])

    y1 = jax.nn.relu(bn(conv(x_nchw, w1, b1), g1, be1))
    y2 = bn(conv(y1, w2, b2), g2, be2)
    return y2 * res_scale + y1


if __name__ == "__main__":
    key = jax.random.PRNGKey(0)
    N, Cin, Cout, H, W = 2, 4, 8, 16, 16

    ks = jax.random.split(key, 9)
    x = jax.random.normal(ks[0], (N, Cin, H, W), jnp.float32)      # NCHW input
    w1 = jax.random.normal(ks[1], (K, K, Cin, Cout), jnp.float32) * 0.1
    b1 = jax.random.normal(ks[2], (Cout,), jnp.float32) * 0.1
    g1 = 1.0 + 0.1 * jax.random.normal(ks[3], (Cout,), jnp.float32)
    be1 = jax.random.normal(ks[4], (Cout,), jnp.float32) * 0.1
    w2 = jax.random.normal(ks[5], (K, K, Cout, Cout), jnp.float32) * 0.1
    b2 = jax.random.normal(ks[6], (Cout,), jnp.float32) * 0.1
    g2 = 1.0 + 0.1 * jax.random.normal(ks[7], (Cout,), jnp.float32)
    be2 = jax.random.normal(ks[8], (Cout,), jnp.float32) * 0.1
    params = (w1, b1, g1, be1, w2, b2, g2, be2)

    # f32 path + non-trivial res_scale: tight algorithmic-correctness check.
    out_f32 = jax.block_until_ready(
        preresblock(x, params, res_scale=0.5, store_dtype=jnp.float32))
    ref_f32 = jax.block_until_ready(preresblock_ref(x, params, res_scale=0.5))
    assert out_f32.shape == (N, Cout, H, W), out_f32.shape
    assert jnp.allclose(out_f32, ref_f32, atol=1e-3, rtol=1e-3), (
        float(jnp.max(jnp.abs(out_f32 - ref_f32))))

    # Perf path: bf16 intermediates / bf16 MXU operands (looser tolerance).
    out_bf16 = jax.block_until_ready(preresblock(x, params, res_scale=1.0))
    ref_bf16 = jax.block_until_ready(preresblock_ref(x, params, res_scale=1.0))
    assert out_bf16.shape == (N, Cout, H, W), out_bf16.shape
    assert jnp.allclose(out_bf16, ref_bf16, atol=5e-2, rtol=5e-2), (
        float(jnp.max(jnp.abs(out_bf16 - ref_bf16))))

    print("KERNEL_OK")
</pallas_src>

<mosaic_0001>
module attributes {stable_mosaic.version = 11 : i64} {
  func.func @conv1_stats_kernel(%arg0: i32, %arg1: memref<512x4xf32, #tpu.memory_space<vmem>>, %arg2: memref<36x8xf32, #tpu.memory_space<vmem>>, %arg3: memref<512x8xf32, #tpu.memory_space<vmem>>, %arg4: memref<2x8xf32, #tpu.memory_space<vmem>>, %arg5: memref<18x18x4xf32, #tpu.memory_space<vmem>>) attributes {dimension_semantics = [#tpu.dimension_semantics<arbitrary>], iteration_bounds = array<i64: 1>, scalar_prefetch = 0 : i64, scratch_operands = 1 : i64, tpu.core_type = #tpu.core_type<tc>, window_params = [{transform_indices = @transform_0, window_bounds = array<i64: 512, 4>}, {pipeline_mode = #tpu.pipeline_mode<synchronous>, transform_indices = @transform_1, window_bounds = array<i64: 36, 8>}, {transform_indices = @transform_2, window_bounds = array<i64: 512, 8>}, {pipeline_mode = #tpu.pipeline_mode<synchronous>, transform_indices = @transform_3, window_bounds = array<i64: 2, 8>}]} {
    %c0_i32 = arith.constant 0 : i32
    %0 = arith.cmpi eq, %arg0, %c0_i32 : i32
    %1 = arith.extui %0 : i1 to i32
    %c0_i32_0 = arith.constant 0 : i32
    %2 = arith.cmpi ne, %1, %c0_i32_0 : i32
    scf.if %2 {
      %cst_33 = arith.constant 0.000000e+00 : f32
      %59 = vector.broadcast %cst_33 : f32 to vector<1x18x4xf32>
      %c0_34 = arith.constant 0 : index
      %c0_35 = arith.constant 0 : index
      %c0_36 = arith.constant 0 : index
      %60 = vector.load %arg5[%c0_34, %c0_35, %c0_36] : memref<18x18x4xf32, #tpu.memory_space<vmem>>, vector<1x18x4xf32>
      tpu.vector_store %arg5[%c0_34, %c0_35, %c0_36], %59 {strides = array<i32>} : memref<18x18x4xf32, #tpu.memory_space<vmem>>, vector<1x18x4xf32>,
      %c17 = arith.constant 17 : index
      %c0_37 = arith.constant 0 : index
      %c0_38 = arith.constant 0 : index
      %61 = vector.load %arg5[%c17, %c0_37, %c0_38] : memref<18x18x4xf32, #tpu.memory_space<vmem>>, vector<1x18x4xf32>
      tpu.vector_store %arg5[%c17, %c0_37, %c0_38], %59 {strides = array<i32>} : memref<18x18x4xf32, #tpu.memory_space<vmem>>, vector<1x18x4xf32>,
      %cst_39 = arith.constant 0.000000e+00 : f32
      %62 = vector.broadcast %cst_39 : f32 to vector<16x1x4xf32>
      %c1_40 = arith.constant 1 : index
      %c0_41 = arith.constant 0 : index
      %c0_42 = arith.constant 0 : index
      %63 = vector.load %arg5[%c1_40, %c0_41, %c0_42] : memref<18x18x4xf32, #tpu.memory_space<vmem>>, vector<16x1x4xf32>
      tpu.vector_store %arg5[%c1_40, %c0_41, %c0_42], %62 {strides = array<i32>} : memref<18x18x4xf32, #tpu.memory_space<vmem>>, vector<16x1x4xf32>,
      %c1_43 = arith.constant 1 : index
      %c17_44 = arith.constant 17 : index
      %c0_45 = arith.constant 0 : index
      %64 = vector.load %arg5[%c1_43, %c17_44, %c0_45] : memref<18x18x4xf32, #tpu.memory_space<vmem>>, vector<16x1x4xf32>
      tpu.vector_store %arg5[%c1_43, %c17_44, %c0_45], %62 {strides = array<i32>} : memref<18x18x4xf32, #tpu.memory_space<vmem>>, vector<16x1x4xf32>,
      %cst_46 = arith.constant 0.000000e+00 : f32
      %65 = vector.broadcast %cst_46 : f32 to vector<2x8xf32>
      %c0_47 = arith.constant 0 : index
      %c0_48 = arith.constant 0 : index
      %66 = vector.load %arg4[%c0_47, %c0_48] : memref<2x8xf32, #tpu.memory_space<vmem>>, vector<2x8xf32>
      tpu.vector_store %arg4[%c0_47, %c0_48], %65 {strides = array<i32>} : memref<2x8xf32, #tpu.memory_space<vmem>>, vector<2x8xf32>,
    } else {
    }
    %cst = arith.constant 0.000000e+00 : f32
    %3 = vector.broadcast %cst : f32 to vector<1x8xf32>
    %cst_1 = arith.constant 0.000000e+00 : f32
    %4 = vector.broadcast %cst_1 : f32 to vector<1x8xf32>
    %c0 = arith.constant 0 : index
    %c0_2 = arith.constant 0 : index
    %5 = vector.load %arg1[%c0, %c0_2] : memref<512x4xf32, #tpu.memory_space<vmem>>, vector<256x4xf32>
    %6 = vector.shape_cast %5 : vector<256x4xf32> to vector<16x16x4xf32>
    %c1 = arith.constant 1 : index
    %c1_3 = arith.constant 1 : index
    %c0_4 = arith.constant 0 : index
    %7 = vector.load %arg5[%c1, %c1_3, %c0_4] : memref<18x18x4xf32, #tpu.memory_space<vmem>>, vector<16x16x4xf32>
    tpu.vector_store %arg5[%c1, %c1_3, %c0_4], %6 {strides = array<i32>} : memref<18x18x4xf32, #tpu.memory_space<vmem>>, vector<16x16x4xf32>,
    %c0_5 = arith.constant 0 : index
    %c0_6 = arith.constant 0 : index
    %c0_7 = arith.constant 0 : index
    %8 = vector.load %arg5[%c0_5, %c0_6, %c0_7] : memref<18x18x4xf32, #tpu.memory_space<vmem>>, vector<18x18x4xf32>
    %9 = vector.extract_strided_slice %8 {offsets = [0, 0, 0], sizes = [16, 16, 4], strides = [1, 1, 1]} : vector<18x18x4xf32> to vector<16x16x4xf32>
    %10 = vector.extract_strided_slice %8 {offsets = [0, 1, 0], sizes = [16, 16, 4], strides = [1, 1, 1]} : vector<18x18x4xf32> to vector<16x16x4xf32>
    %11 = vector.extract_strided_slice %8 {offsets = [0, 2, 0], sizes = [16, 16, 4], strides = [1, 1, 1]} : vector<18x18x4xf32> to vector<16x16x4xf32>
    %12 = vector.extract_strided_slice %8 {offsets = [1, 0, 0], sizes = [16, 16, 4], strides = [1, 1, 1]} : vector<18x18x4xf32> to vector<16x16x4xf32>
    %13 = vector.extract_strided_slice %8 {offsets = [1, 1, 0], sizes = [16, 16, 4], strides = [1, 1, 1]} : vector<18x18x4xf32> to vector<16x16x4xf32>
    %14 = vector.extract_strided_slice %8 {offsets = [1, 2, 0], sizes = [16, 16, 4], strides = [1, 1, 1]} : vector<18x18x4xf32> to vector<16x16x4xf32>
    %15 = vector.extract_strided_slice %8 {offsets = [2, 0, 0], sizes = [16, 16, 4], strides = [1, 1, 1]} : vector<18x18x4xf32> to vector<16x16x4xf32>
    %16 = vector.extract_strided_slice %8 {offsets = [2, 1, 0], sizes = [16, 16, 4], strides = [1, 1, 1]} : vector<18x18x4xf32> to vector<16x16x4xf32>
    %17 = vector.extract_strided_slice %8 {offsets = [2, 2, 0], sizes = [16, 16, 4], strides = [1, 1, 1]} : vector<18x18x4xf32> to vector<16x16x4xf32>
    %18 = tpu.concatenate %9, %10, %11, %12, %13, %14, %15, %16, %17 in 2 : vector<16x16x4xf32>, vector<16x16x4xf32>, vector<16x16x4xf32>, vector<16x16x4xf32>, vector<16x16x4xf32>, vector<16x16x4xf32>, vector<16x16x4xf32>, vector<16x16x4xf32>, vector<16x16x4xf32> -> vector<16x16x36xf32>
    %19 = vector.shape_cast %18 : vector<16x16x36xf32> to vector<256x36xf32>
    %c0_8 = arith.constant 0 : index
    %c0_9 = arith.constant 0 : index
    %20 = vector.load %arg2[%c0_8, %c0_9] : memref<36x8xf32, #tpu.memory_space<vmem>>, vector<36x8xf32>
    %cst_10 = arith.constant dense<0.000000e+00> : vector<256x8xf32>
    %21 = tpu.matmul %19, %20, %cst_10 {dimension_numbers = #tpu.dot_dimension_numbers<[1], [0], [0], [1], [0, 0, 1, 1], [], []>} : vector<256x36xf32>, vector<36x8xf32>, vector<256x8xf32> -> vector<256x8xf32>
    %cst_11 = arith.constant dense<0.000000e+00> : vector<8xf32>
    %22 = vector.multi_reduction <add>, %21, %cst_11 [0] : vector<256x8xf32> to vector<8xf32>
    %23 = vector.shape_cast %22 : vector<8xf32> to vector<1x8xf32>
    %24 = arith.addf %3, %23 : vector<1x8xf32>
    %25 = arith.mulf %21, %21 : vector<256x8xf32>
    %cst_12 = arith.constant dense<0.000000e+00> : vector<8xf32>
    %26 = vector.multi_reduction <add>, %25, %cst_12 [0] : vector<256x8xf32> to vector<8xf32>
    %27 = vector.shape_cast %26 : vector<8xf32> to vector<1x8xf32>
    %28 = arith.addf %4, %27 : vector<1x8xf32>
    %c0_13 = arith.constant 0 : index
    %c0_14 = arith.constant 0 : index
    %29 = vector.load %arg3[%c0_13, %c0_14] : memref<512x8xf32, #tpu.memory_space<vmem>>, vector<256x8xf32>
    tpu.vector_store %arg3[%c0_13, %c0_14], %21 {strides = array<i32>} : memref<512x8xf32, #tpu.memory_space<vmem>>, vector<256x8xf32>,
    %c256 = arith.constant 256 : index
    %c0_15 = arith.constant 0 : index
    %30 = vector.load %arg1[%c256, %c0_15] : memref<512x4xf32, #tpu.memory_space<vmem>>, vector<256x4xf32>
    %31 = vector.shape_cast %30 : vector<256x4xf32> to vector<16x16x4xf32>
    %c1_16 = arith.constant 1 : index
    %c1_17 = arith.constant 1 : index
    %c0_18 = arith.constant 0 : index
    %32 = vector.load %arg5[%c1_16, %c1_17, %c0_18] : memref<18x18x4xf32, #tpu.memory_space<vmem>>, vector<16x16x4xf32>
    tpu.vector_store %arg5[%c1_16, %c1_17, %c0_18], %31 {strides = array<i32>} : memref<18x18x4xf32, #tpu.memory_space<vmem>>, vector<16x16x4xf32>,
    %c0_19 = arith.constant 0 : index
    %c0_20 = arith.constant 0 : index
    %c0_21 = arith.constant 0 : index
    %33 = vector.load %arg5[%c0_19, %c0_20, %c0_21] : memref<18x18x4xf32, #tpu.memory_space<vmem>>, vector<18x18x4xf32>
    %34 = vector.extract_strided_slice %33 {offsets = [0, 0, 0], sizes = [16, 16, 4], strides = [1, 1, 1]} : vector<18x18x4xf32> to vector<16x16x4xf32>
    %35 = vector.extract_strided_slice %33 {offsets = [0, 1, 0], sizes = [16, 16, 4], strides = [1, 1, 1]} : vector<18x18x4xf32> to vector<16x16x4xf32>
    %36 = vector.extract_strided_slice %33 {offsets = [0, 2, 0], sizes = [16, 16, 4], strides = [1, 1, 1]} : vector<18x18x4xf32> to vector<16x16x4xf32>
    %37 = vector.extract_strided_slice %33 {offsets = [1, 0, 0], sizes = [16, 16, 4], strides = [1, 1, 1]} : vector<18x18x4xf32> to vector<16x16x4xf32>
    %38 = vector.extract_strided_slice %33 {offsets = [1, 1, 0], sizes = [16, 16, 4], strides = [1, 1, 1]} : vector<18x18x4xf32> to vector<16x16x4xf32>
    %39 = vector.extract_strided_slice %33 {offsets = [1, 2, 0], sizes = [16, 16, 4], strides = [1, 1, 1]} : vector<18x18x4xf32> to vector<16x16x4xf32>
    %40 = vector.extract_strided_slice %33 {offsets = [2, 0, 0], sizes = [16, 16, 4], strides = [1, 1, 1]} : vector<18x18x4xf32> to vector<16x16x4xf32>
    %41 = vector.extract_strided_slice %33 {offsets = [2, 1, 0], sizes = [16, 16, 4], strides = [1, 1, 1]} : vector<18x18x4xf32> to vector<16x16x4xf32>
    %42 = vector.extract_strided_slice %33 {offsets = [2, 2, 0], sizes = [16, 16, 4], strides = [1, 1, 1]} : vector<18x18x4xf32> to vector<16x16x4xf32>
    %43 = tpu.concatenate %34, %35, %36, %37, %38, %39, %40, %41, %42 in 2 : vector<16x16x4xf32>, vector<16x16x4xf32>, vector<16x16x4xf32>, vector<16x16x4xf32>, vector<16x16x4xf32>, vector<16x16x4xf32>, vector<16x16x4xf32>, vector<16x16x4xf32>, vector<16x16x4xf32> -> vector<16x16x36xf32>
    %44 = vector.shape_cast %43 : vector<16x16x36xf32> to vector<256x36xf32>
    %c0_22 = arith.constant 0 : index
    %c0_23 = arith.constant 0 : index
    %45 = vector.load %arg2[%c0_22, %c0_23] : memref<36x8xf32, #tpu.memory_space<vmem>>, vector<36x8xf32>
    %cst_24 = arith.constant dense<0.000000e+00> : vector<256x8xf32>
    %46 = tpu.matmul %44, %45, %cst_24 {dimension_numbers = #tpu.dot_dimension_numbers<[1], [0], [0], [1], [0, 0, 1, 1], [], []>} : vector<256x36xf32>, vector<36x8xf32>, vector<256x8xf32> -> vector<256x8xf32>
    %cst_25 = arith.constant dense<0.000000e+00> : vector<8xf32>
    %47 = vector.multi_reduction <add>, %46, %cst_25 [0] : vector<256x8xf32> to vector<8xf32>
    %48 = vector.shape_cast %47 : vector<8xf32> to vector<1x8xf32>
    %49 = arith.addf %24, %48 : vector<1x8xf32>
    %50 = arith.mulf %46, %46 : vector<256x8xf32>
    %cst_26 = arith.constant dense<0.000000e+00> : vector<8xf32>
    %51 = vector.multi_reduction <add>, %50, %cst_26 [0] : vector<256x8xf32> to vector<8xf32>
    %52 = vector.shape_cast %51 : vector<8xf32> to vector<1x8xf32>
    %53 = arith.addf %28, %52 : vector<1x8xf32>
    %c256_27 = arith.constant 256 : index
    %c0_28 = arith.constant 0 : index
    %54 = vector.load %arg3[%c256_27, %c0_28] : memref<512x8xf32, #tpu.memory_space<vmem>>, vector<256x8xf32>
    tpu.vector_store %arg3[%c256_27, %c0_28], %46 {strides = array<i32>} : memref<512x8xf32, #tpu.memory_space<vmem>>, vector<256x8xf32>,
    %c0_29 = arith.constant 0 : index
    %c0_30 = arith.constant 0 : index
    %55 = vector.load %arg4[%c0_29, %c0_30] : memref<2x8xf32, #tpu.memory_space<vmem>>, vector<2x8xf32>
    %56 = tpu.concatenate %49, %53 in 0 : vector<1x8xf32>, vector<1x8xf32> -> vector<2x8xf32>
    %57 = arith.addf %55, %56 : vector<2x8xf32>
    %c0_31 = arith.constant 0 : index
    %c0_32 = arith.constant 0 : index
    %58 = vector.load %arg4[%c0_31, %c0_32] : memref<2x8xf32, #tpu.memory_space<vmem>>, vector<2x8xf32>
    tpu.vector_store %arg4[%c0_31, %c0_32], %57 {strides = array<i32>} : memref<2x8xf32, #tpu.memory_space<vmem>>, vector<2x8xf32>,
    return
  }
  func.func @transform_0(%arg0: i32) -> (i32, i32) {
    %c0_i32 = arith.constant 0 : i32
    %c0_i32_0 = arith.constant 0 : i32
    return %arg0, %c0_i32 : i32, i32
  }
  func.func @transform_1(%arg0: i32) -> (i32, i32) {
    %c0_i32 = arith.constant 0 : i32
    %c0_i32_0 = arith.constant 0 : i32
    %c0_i32_1 = arith.constant 0 : i32
    return %c0_i32, %c0_i32_0 : i32, i32
  }
  func.func @transform_2(%arg0: i32) -> (i32, i32) {
    %c0_i32 = arith.constant 0 : i32
    %c0_i32_0 = arith.constant 0 : i32
    return %arg0, %c0_i32 : i32, i32
  }
  func.func @transform_3(%arg0: i32) -> (i32, i32) {
    %c0_i32 = arith.constant 0 : i32
    %c0_i32_0 = arith.constant 0 : i32
    %c0_i32_1 = arith.constant 0 : i32
    return %c0_i32, %c0_i32_0 : i32, i32
  }
}

</mosaic_0001>

<bundles_post_ra>
// kernel: tpu_custom_call.1
= control target key start
LH: loop header
LB: loop body
LE: loop exit
PB: predicated region body
PF: predicated region fallthrough
CT: control target
= control target key end

     0   :  { %vm18_vm0 = vcmask 31744   ;;  %vm28_vm1 = vcmask 24576   ;;  %v8551_v2 = vmov 0.0   ;;  %s8547_s0 = inlined_call_operand.vmem [shape: f32[512,4], index: 0, kind: input, shape index: {}]   ;;  %s8548_s1 = inlined_call_operand.vmem [shape: f32[36,8], index: 1, kind: input, shape index: {}]   ;;  %s8549_s2 = inlined_call_operand.vmem [shape: f32[512,8], index: 2, kind: output, shape index: {0}]   ;;  %s8550_s3 = inlined_call_operand.hbm [shape: f32[2,8], index: 3, kind: output, shape index: {1}]  }
   0x1   :  { %v65_v0 = vld [vmem:[%s8547_s0 + $0x10] sm:$0xff]  ;;  %v66_v1 = vld [vmem:[%s8547_s0 + $0x18] sm:$0xff]  ;;  %30 = vst.msk [vmem:[#allocation2 + $0x30] sm:$0x1] %vm28_vm1, %v8551_v2 }
   0x2   :  { %99 = vst.msk [vmem:[#allocation2 + $0x31] sm:$0xff] %vm18_vm0, %v65_v0 }
   0x3   :  { %9 = vsyncpa [#allocation4], 0  ;;  %100 = vst.msk [vmem:[#allocation2 + $0x39] sm:$0xff] %vm18_vm0, %v66_v1  ;;  %v1875_v3 = vld [vmem:[%s8547_s0 + $0x110] sm:$0xff]  ;;  %vm231_vm2 = vcmask 1046528   ;;  %s3874_s18 = smov 4  }
   0x4   :  { %19 = vst.msk [vmem:[#allocation2] sm:$0xff] %vm18_vm0, %v8551_v2  ;;  %v63_v17 = vld [vmem:[%s8547_s0] sm:$0xff]  ;;  %v64_v18 = vld [vmem:[%s8547_s0 + $0x8] sm:$0xff]  ;;  %v1876_v19 = vld [vmem:[%s8547_s0 + $0x118] sm:$0xff]  ;;  %vm21_vm3 = vcmask 25600   ;;  %vm408_vm4 = vcmask 1045504  }
   0x5   :  { %20 = vst.msk [vmem:[#allocation2 + $0x8] sm:$0xff] %vm18_vm0, %v8551_v2  ;;  %v69_v20 = vld [vmem:[%s8547_s0 + $0x30] sm:$0xff]  ;;  %v70_v21 = vld [vmem:[%s8547_s0 + $0x38] sm:$0xff]  ;;  %v67_v22 = vld [vmem:[%s8547_s0 + $0x20] sm:$0xff]  ;;  %s3875_s29 = smov 8   ;;  %s3876_s30 = smov 12  }
   0x6   :  { %24 = vst.msk [vmem:[#allocation2 + $0x198] sm:$0xff] %vm18_vm0, %v8551_v2  ;;  %v68_v23 = vld [vmem:[%s8547_s0 + $0x28] sm:$0xff]  ;;  %v1873_v24 = vld [vmem:[%s8547_s0 + $0x100] sm:$0xff]  ;;  %v1879_v37 = vld [vmem:[%s8547_s0 + $0x130] sm:$0xff]  ;;  %s3877_s10 = smov 16   ;;  %s3879_s13 = smov 24  }
   0x7   :  { %25 = vst.msk [vmem:[#allocation2 + $0x1a0] sm:$0xff] %vm18_vm0, %v8551_v2  ;;  %v1874_v26 = vld [vmem:[%s8547_s0 + $0x108] sm:$0xff]  ;;  %v71_v29 = vld [vmem:[%s8547_s0 + $0x40] sm:$0xff]  ;;  %v1880_v39 = vld [vmem:[%s8547_s0 + $0x138] sm:$0xff]  ;;  %s3880_s14 = smov 28   ;;  %s3881_s15 = smov 32  }
   0x8   :  { %29 = vst.msk [vmem:[#allocation2 + $0x18] sm:$0x1] %vm28_vm1, %v8551_v2  ;;  %v72_v32 = vld [vmem:[%s8547_s0 + $0x48] sm:$0xff]  ;;  %v75_v34 = vld [vmem:[%s8547_s0 + $0x60] sm:$0xff]  ;;  %v73_v55 = vld [vmem:[%s8547_s0 + $0x50] sm:$0xff]  ;;  %vm1552_vm5 = vcmask 1043456  }
   0x9   :  { %v3926_v4 = vld [vmem:[#allocation2 + $0x30] sm:$0xff]  ;;  %31 = vst.msk [vmem:[#allocation2 + $0x48] sm:$0x1] %vm28_vm1, %v8551_v2  ;;  %v1878_v44 = vld [vmem:[%s8547_s0 + $0x128] sm:$0xff]  ;;  %v1877_v47 = vld [vmem:[%s8547_s0 + $0x120] sm:$0xff]  ;;  %vm1219_vm6 = vcmask 64512  }
   0xa   :  { %v3930_v5 = vld [vmem:[#allocation2 + $0x38] sm:$0xff]  ;;  %v242_v6 = vrot.slane %v3926_v4, 1  ;;  %32 = vst.msk [vmem:[#allocation2 + $0x60] sm:$0x1] %vm28_vm1, %v8551_v2  ;;  %v76_v52 = vld [vmem:[%s8547_s0 + $0x68] sm:$0xff]  ;;  %v1881_v58 = vld [vmem:[%s8547_s0 + $0x140] sm:$0xff] }
   0xb   :  { %v243_v7 = vrot.slane %v3930_v5, 1  ;;  %1907 = vst.msk [vmem:[#allocation2 + $0x31] sm:$0xff] %vm18_vm0, %v1875_v3  ;;  %v3952_v9 = vld [vmem:[#allocation2] sm:$0xff]  ;;  %v1882_v57 = vld [vmem:[%s8547_s0 + $0x148] sm:$0xff]  ;;  %v74_v62 = vld [vmem:[%s8547_s0 + $0x58] sm:$0xff]  ;;  %vm1252_vm7 = vcmask 97280  }
   0xc   :  { %33 = vst.msk [vmem:[#allocation2 + $0x78] sm:$0x1] %vm28_vm1, %v8551_v2  ;;  %v3954_v10 = vld [vmem:[#allocation2 + $0x8] sm:$0xff]  ;;  %v232_v11 = vrot.slane %v3952_v9, 1  ;;  %v77_v3 = vld [vmem:[%s8547_s0 + $0x70] sm:$0xff]  ;;  %vm1318_vm8 = vcmask 162816  }
   0xd   :  { %v3940_v8 = vsel %vm231_vm2, %v242_v6, %v243_v7  ;;  %34 = vst.msk [vmem:[#allocation2 + $0x90] sm:$0x1] %vm28_vm1, %v8551_v2  ;;  %v233_v12 = vrot.slane %v3954_v10, 1  ;;  %vm1285_vm9 = vcmask 130048   ;;  %vm1351_vm10 = vcmask 195584   ;;  %s3685_s17 = sshll.u32 %s8550_s3, 4  ;;  %s3686_s17 = int_to_ptr.hbm [resolvable:$true] %s3685_s17 }
   0xe   :  { %320 = vrot.lane.b32.xlu2 %v3940_v8, %s3874_s18  ;;  %35 = vst.msk [vmem:[#allocation2 + $0xa8] sm:$0x1] %vm28_vm1, %v8551_v2  ;;  %vm1417_vm11 = vcmask 261120   ;;  %vm1384_vm12 = vcmask 228352   ;;  %vm1455_vm13 = vcmask 293888   ;;  %vm61_vm14 = vcmask 58368  }
   0xf   :  { %36 = vst.msk [vmem:[#allocation2 + $0xc0] sm:$0x1] %vm28_vm1, %v8551_v2  ;;  %v234_v13 = vsel %vm231_vm2, %v232_v11, %v233_v12  ;;  %vm3671_vm15 = vcmask 1040384  }
  0x10   :  { %37 = vst.msk [vmem:[#allocation2 + $0xd8] sm:$0x1] %vm28_vm1, %v8551_v2  ;;  %312 = vrot.lane.b32.xlu0 %v234_v13, %s3874_s18 }
  0x11   :  { %38 = vst.msk [vmem:[#allocation2 + $0xf0] sm:$0x1] %vm28_vm1, %v8551_v2 }
  0x12   :  { %39 = vst.msk [vmem:[#allocation2 + $0x108] sm:$0x1] %vm28_vm1, %v8551_v2 }
  0x13   :  { %40 = vst.msk [vmem:[#allocation2 + $0x120] sm:$0x1] %vm28_vm1, %v8551_v2 }
  0x14   :  { %41 = vst.msk [vmem:[#allocation2 + $0x138] sm:$0x1] %vm28_vm1, %v8551_v2 }
  0x15   :  { %42 = vst.msk [vmem:[#allocation2 + $0x150] sm:$0x1] %vm28_vm1, %v8551_v2 }
  0x16   :  { %43 = vst.msk [vmem:[#allocation2 + $0x168] sm:$0x1] %vm28_vm1, %v8551_v2 }
  0x17   :  { %44 = vst.msk [vmem:[#allocation2 + $0x180] sm:$0x1] %vm28_vm1, %v8551_v2 }
  0x18   :  { %45 = vst.msk [vmem:[#allocation2 + $0x29] sm:$0x1] %vm28_vm1, %v8551_v2 }
  0x19   :  { %46 = vst.msk [vmem:[#allocation2 + $0x41] sm:$0x1] %vm28_vm1, %v8551_v2 }
  0x1a   :  { %47 = vst.msk [vmem:[#allocation2 + $0x59] sm:$0x1] %vm28_vm1, %v8551_v2 }
  0x1b   :  { %48 = vst.msk [vmem:[#allocation2 + $0x71] sm:$0x1] %vm28_vm1, %v8551_v2 }
  0x1c   :  { %49 = vst.msk [vmem:[#allocation2 + $0x89] sm:$0x1] %vm28_vm1, %v8551_v2 }
  0x1d   :  { %50 = vst.msk [vmem:[#allocation2 + $0xa1] sm:$0x1] %vm28_vm1, %v8551_v2 }
  0x1e   :  { %51 = vst.msk [vmem:[#allocation2 + $0xb9] sm:$0x1] %vm28_vm1, %v8551_v2 }
  0x1f   :  { %52 = vst.msk [vmem:[#allocation2 + $0xd1] sm:$0x1] %vm28_vm1, %v8551_v2 }
  0x20   :  { %53 = vst.msk [vmem:[#allocation2 + $0xe9] sm:$0x1] %vm28_vm1, %v8551_v2  ;;  %v3994_v14 = vld [vmem:[#allocation2 + $0x40] sm:$0x3] }
  0x21   :  { %54 = vst.msk [vmem:[#allocation2 + $0x101] sm:$0x1] %vm28_vm1, %v8551_v2  ;;  %v245_v15 = vrot.slane %v3994_v14, 1 }
  0x22   :  { %55 = vst.msk [vmem:[#allocation2 + $0x119] sm:$0x1] %vm28_vm1, %v8551_v2 }
  0x23   :  { %56 = vst.msk [vmem:[#allocation2 + $0x131] sm:$0x1] %vm28_vm1, %v8551_v2  ;;  %v4004_v16 = vsel %vm231_vm2, %v243_v7, %v245_v15  ;;  %v78_v7 = vld [vmem:[%s8547_s0 + $0x78] sm:$0xff] }
  0x24   :  { %8779 = vst [vmem:[#allocation6_spill] sm:$0xff] %v4004_v16  ;;  %322 = vrot.lane.b32.xlu2 %v4004_v16, %s3874_s18 }
  0x25   :  { %57 = vst.msk [vmem:[#allocation2 + $0x149] sm:$0x1] %vm28_vm1, %v8551_v2 }
  0x26   :  { %58 = vst.msk [vmem:[#allocation2 + $0x161] sm:$0x1] %vm28_vm1, %v8551_v2 }
  0x27   :  { %59 = vst.msk [vmem:[#allocation2 + $0x179] sm:$0x1] %vm28_vm1, %v8551_v2 }
  0x28   :  { %60 = vst.msk [vmem:[#allocation2 + $0x191] sm:$0x1] %vm28_vm1, %v8551_v2 }
  0x29   :  { %97 = vst.msk [vmem:[#allocation2 + $0x19] sm:$0xff] %vm18_vm0, %v63_v17  ;;  %v1885_v17 = vld [vmem:[%s8547_s0 + $0x160] sm:$0xff] }
  0x2a   :  { %98 = vst.msk [vmem:[#allocation2 + $0x21] sm:$0xff] %vm18_vm0, %v64_v18  ;;  %v1886_v18 = vld [vmem:[%s8547_s0 + $0x168] sm:$0xff] }
  0x2b   :  { %1908 = vst.msk [vmem:[#allocation2 + $0x39] sm:$0xff] %vm18_vm0, %v1876_v19 }
  0x2c   :  { %22 = vst.msk [vmem:[#allocation2 + $0x10] sm:$0x3] %vm21_vm3, %v8551_v2 }
  0x2d   :  { %26 = vst.msk [vmem:[#allocation2 + $0x1a8] sm:$0x3] %vm21_vm3, %v8551_v2 }
  0x2e   :  { %103 = vst.msk [vmem:[#allocation2 + $0x61] sm:$0xff] %vm18_vm0, %v69_v20 }
  0x2f   :  { %104 = vst.msk [vmem:[#allocation2 + $0x69] sm:$0xff] %vm18_vm0, %v70_v21  ;;  %v82_v21 = vld [vmem:[%s8547_s0 + $0x98] sm:$0xff] }
  0x30   :  { %v4047_v25 = vld [vmem:[#allocation2 + $0x18] sm:$0xff]  ;;  %101 = vst.msk [vmem:[#allocation2 + $0x49] sm:$0xff] %vm18_vm0, %v67_v22 }
  0x31   :  { %8780 = vst [vmem:[#allocation7_spill] sm:$0xff] %v4047_v25  ;;  %v4053_v27 = vld [vmem:[#allocation2 + $0x20] sm:$0xff]  ;;  %v237_v28 = vrot.slane %v4047_v25, 1  ;;  %v4062_v31 = vld [vmem:[#allocation2 + $0x28] sm:$0x3] }
  0x32   :  { %8781 = vst [vmem:[#allocation8_spill] sm:$0xff] %v4053_v27  ;;  %v238_v30 = vrot.slane %v4053_v27, 1  ;;  %v240_v40 = vrot.slane %v4062_v31, 1 }
  0x33   :  { %102 = vst.msk [vmem:[#allocation2 + $0x51] sm:$0xff] %vm18_vm0, %v68_v23  ;;  %v4068_v33 = vld [vmem:[#allocation2 + $0x10] sm:$0x3] }
  0x34   :  { %1905 = vst.msk [vmem:[#allocation2 + $0x19] sm:$0xff] %vm18_vm0, %v1873_v24  ;;  %v4074_v35 = vsel %vm231_vm2, %v237_v28, %v238_v30  ;;  %v235_v36 = vrot.slane %v4068_v33, 1  ;;  %v4128_v56 = vsel %vm231_vm2, %v238_v30, %v240_v40 }
  0x35   :  { %1906 = vst.msk [vmem:[#allocation2 + $0x21] sm:$0xff] %vm18_vm0, %v1874_v26  ;;  %316 = vrot.lane.b32.xlu1 %v4074_v35, %s3874_s18  ;;  %v4083_v38 = vld [vmem:[#allocation2 + $0x60] sm:$0xff] }
  0x36   :  { %105 = vst.msk [vmem:[#allocation2 + $0x79] sm:$0xff] %vm18_vm0, %v71_v29  ;;  %v236_v41 = vsel %vm231_vm2, %v233_v12, %v235_v36  ;;  %v4093_v42 = vld [vmem:[#allocation2 + $0x68] sm:$0xff]  ;;  %v252_v43 = vrot.slane %v4083_v38, 1  ;;  %v4108_v48 = vld [vmem:[#allocation2 + $0x70] sm:$0x3]  ;;  %v79_v26 = vld [vmem:[%s8547_s0 + $0x80] sm:$0xff] }
  0x37   :  { %8782 = vst [vmem:[#allocation9_spill] sm:$0xff] %v4083_v38  ;;  %314 = vrot.lane.b32.xlu0 %v236_v41, %s3874_s18  ;;  %v253_v45 = vrot.slane %v4093_v42, 1  ;;  %v4103_v46 = vld [vmem:[#allocation2 + $0x48] sm:$0xff]  ;;  %v81_v12 = vld [vmem:[%s8547_s0 + $0x90] sm:$0xff]  ;;  %v255_v13 = vrot.slane %v4108_v48, 1  ;;  %v1884_v29 = vld [vmem:[%s8547_s0 + $0x158] sm:$0xff] }
  0x38   :  { %106 = vst.msk [vmem:[#allocation2 + $0x81] sm:$0xff] %vm18_vm0, %v72_v32  ;;  %v247_v51 = vrot.slane %v4103_v46, 1  ;;  %v1883_v32 = vld [vmem:[%s8547_s0 + $0x150] sm:$0xff] }
  0x39   :  { %8783 = vst [vmem:[#allocation10_spill] sm:$0xff] %v4093_v42  ;;  %v4120_v53 = vsel %vm231_vm2, %v252_v43, %v253_v45  ;;  %v4206_v28 = vsel %vm231_vm2, %v253_v45, %v255_v13  ;;  %v1887_v41 = vld [vmem:[%s8547_s0 + $0x170] sm:$0xff]  ;;  %v80_v43 = vld [vmem:[%s8547_s0 + $0x88] sm:$0xff] }
  0x3a   :  { %109 = vst.msk [vmem:[#allocation2 + $0xa9] sm:$0xff] %vm18_vm0, %v75_v34  ;;  %v4110_v49 = vld [vmem:[#allocation2 + $0x50] sm:$0xff]  ;;  %v4112_v50 = vld [vmem:[#allocation2 + $0x58] sm:$0x3]  ;;  %328 = vrot.lane.b32.xlu2 %v4120_v53, %s3874_s18 }
  0x3b   :  { %1911 = vst.msk [vmem:[#allocation2 + $0x61] sm:$0xff] %vm18_vm0, %v1879_v37  ;;  %v248_v54 = vrot.slane %v4110_v49, 1  ;;  %v250_v6 = vrot.slane %v4112_v50, 1 }
  0x3c   :  { %1912 = vst.msk [vmem:[#allocation2 + $0x69] sm:$0xff] %vm18_vm0, %v1880_v39  ;;  %v1888_v39 = vld [vmem:[%s8547_s0 + $0x178] sm:$0xff] }
  0x3d   :  { %8784 = vst [vmem:[#allocation11_spill] sm:$0xff] %v4120_v53  ;;  %v4141_v59 = vsel %vm231_vm2, %v247_v51, %v248_v54  ;;  %318 = vrot.lane.b32.xlu1 %v4128_v56, %s3874_s18  ;;  %v4156_v1 = vld [vmem:[#allocation2 + $0x78] sm:$0xff]  ;;  %v4187_v19 = vsel %vm231_vm2, %v248_v54, %v250_v6  ;;  %v83_v54 = vld [vmem:[%s8547_s0 + $0xa0] sm:$0xff] }
  0x3e   :  { %1910 = vst.msk [vmem:[#allocation2 + $0x51] sm:$0xff] %vm18_vm0, %v1878_v44  ;;  %v257_v34 = vrot.slane %v4156_v1, 1 }
  0x3f   :  { %1909 = vst.msk [vmem:[#allocation2 + $0x49] sm:$0xff] %vm18_vm0, %v1877_v47  ;;  %v4143_v60 = vld [vmem:[#allocation2 + $0x80] sm:$0xff]  ;;  %v4145_v61 = vld [vmem:[#allocation2 + $0x88] sm:$0x3]  ;;  %324 = vrot.lane.b32.xlu0 %v4141_v59, %s3874_s18 }
  0x40   :  { %110 = vst.msk [vmem:[#allocation2 + $0xb1] sm:$0xff] %vm18_vm0, %v76_v52  ;;  %v258_v63 = vrot.slane %v4143_v60, 1  ;;  %v260_v0 = vrot.slane %v4145_v61, 1 }
  0x41   :  { %8785 = vst [vmem:[#allocation12_spill] sm:$0xff] %v4141_v59  ;;  %v4176_v15 = vld [vmem:[#allocation2 + $0xa8] sm:$0xff] }
  0x42   :  { %8786 = vst [vmem:[#allocation13_spill] sm:$0xff] %v4143_v60  ;;  %v4169_v11 = vsel %vm231_vm2, %v258_v63, %v260_v0  ;;  %v267_v22 = vrot.slane %v4176_v15, 1 }
  0x43   :  { %107 = vst.msk [vmem:[#allocation2 + $0x91] sm:$0xff] %vm18_vm0, %v73_v55  ;;  %334 = vrot.lane.b32.xlu2 %v4169_v11, %s3874_s18  ;;  %v4257_v55 = vsel %vm231_vm2, %v257_v34, %v258_v63  ;;  %v84_v63 = vld [vmem:[%s8547_s0 + $0xa8] sm:$0xff] }
  0x44   :  { %1914 = vst.msk [vmem:[#allocation2 + $0x81] sm:$0xff] %vm18_vm0, %v1882_v57  ;;  %v1891_v57 = vld [vmem:[%s8547_s0 + $0x190] sm:$0xff] }
  0x45   :  { %8787 = vst [vmem:[#allocation14_spill] sm:$0xff] %v4156_v1  ;;  %326 = vrot.lane.b32.xlu1 %v4187_v19, %s3874_s18 }
  0x46   :  { %1913 = vst.msk [vmem:[#allocation2 + $0x79] sm:$0xff] %vm18_vm0, %v1881_v58 }
  0x47   :  { %8788 = vst [vmem:[#allocation15_spill] sm:$0xff] %v4169_v11  ;;  %v4191_v20 = vld [vmem:[#allocation2 + $0xb0] sm:$0xff]  ;;  %v4200_v24 = vld [vmem:[#allocation2 + $0xb8] sm:$0x3]  ;;  %330 = vrot.lane.b32.xlu0 %v4206_v28, %s3874_s18 }
  0x48   :  { %108 = vst.msk [vmem:[#allocation2 + $0x99] sm:$0xff] %vm18_vm0, %v74_v62  ;;  %v268_v23 = vrot.slane %v4191_v20, 1 }
  0x49   :  { %8789 = vst [vmem:[#allocation16_spill] sm:$0xff] %v4176_v15 }
  0x4a   :  { %111 = vst.msk [vmem:[#allocation2 + $0xc1] sm:$0xff] %vm18_vm0, %v77_v3  ;;  %v4214_v30 = vld [vmem:[#allocation2 + $0x90] sm:$0xff]  ;;  %v4234_v40 = vsel %vm231_vm2, %v267_v22, %v268_v23 }
  0x4b   :  { %112 = vst.msk [vmem:[#allocation2 + $0xc9] sm:$0xff] %vm18_vm0, %v78_v7  ;;  %v262_v45 = vrot.slane %v4214_v30, 1  ;;  %340 = vrot.lane.b32.xlu2 %v4234_v40, %s3874_s18  ;;  %v1892_v7 = vld [vmem:[%s8547_s0 + $0x198] sm:$0xff]  ;;  %v85_v22 = vld [vmem:[%s8547_s0 + $0xb0] sm:$0xff] }
  0x4c   :  { %8790 = vst [vmem:[#allocation17_spill] sm:$0xff] %v4187_v19 }
  0x4d   :  { %8791 = vst [vmem:[#allocation18_spill] sm:$0xff] %v4191_v20  ;;  %332 = vrot.lane.b32.xlu1 %v4257_v55, %s3874_s18 }
  0x4e   :  { %115 = vst.msk [vmem:[#allocation2 + $0xf1] sm:$0xff] %vm18_vm0, %v81_v12  ;;  %v87_v12 = vld [vmem:[%s8547_s0 + $0xc0] sm:$0xff] }
  0x4f   :  { %1917 = vst.msk [vmem:[#allocation2 + $0xa9] sm:$0xff] %vm18_vm0, %v1885_v17  ;;  %v4221_v36 = vld [vmem:[#allocation2 + $0x98] sm:$0xff]  ;;  %v4223_v37 = vld [vmem:[#allocation2 + $0xa0] sm:$0x3] }
  0x50   :  { %8792 = vst [vmem:[#allocation19_spill] sm:$0xff] %v4206_v28  ;;  %v263_v44 = vrot.slane %v4221_v36, 1  ;;  %v265_v13 = vrot.slane %v4223_v37, 1 }
  0x51   :  { %1918 = vst.msk [vmem:[#allocation2 + $0xb1] sm:$0xff] %vm18_vm0, %v1886_v18  ;;  %v4251_v52 = vld [vmem:[#allocation2 + $0xc0] sm:$0xff]  ;;  %v88_v18 = vld [vmem:[%s8547_s0 + $0xc8] sm:$0xff] }
  0x52   :  { %8793 = vst [vmem:[#allocation20_spill] sm:$0xff] %v4214_v30  ;;  %v4246_v47 = vld [vmem:[#allocation2 + $0xc8] sm:$0xff]  ;;  %v4248_v51 = vld [vmem:[#allocation2 + $0xd0] sm:$0x3]  ;;  %v4272_v0 = vsel %vm231_vm2, %v262_v45, %v263_v44  ;;  %v4314_v34 = vsel %vm231_vm2, %v263_v44, %v265_v13  ;;  %v272_v13 = vrot.slane %v4251_v52, 1 }
  0x53   :  { %116 = vst.msk [vmem:[#allocation2 + $0xf9] sm:$0xff] %vm18_vm0, %v82_v21  ;;  %v273_v58 = vrot.slane %v4246_v47, 1  ;;  %v275_v62 = vrot.slane %v4248_v51, 1  ;;  %336 = vrot.lane.b32.xlu0 %v4272_v0, %s3874_s18 }
  0x54   :  { %8794 = vst [vmem:[#allocation21_spill] sm:$0xff] %v4221_v36 }
  0x55   :  { %113 = vst.msk [vmem:[#allocation2 + $0xd9] sm:$0xff] %vm18_vm0, %v79_v26  ;;  %v4274_v3 = vld [vmem:[#allocation2 + $0xf0] sm:$0xff]  ;;  %v4298_v21 = vsel %vm231_vm2, %v273_v58, %v275_v62  ;;  %v270_v26 = vrot.slane %v4200_v24, 1  ;;  %338 = vrot.lane.b32.xlu1 %v4314_v34, %s3874_s18 }
  0x56   :  { %8795 = vst [vmem:[#allocation22_spill] sm:$0xff] %v4234_v40  ;;  %346 = vrot.lane.b32.xlu2 %v4298_v21, %s3874_s18  ;;  %v282_v45 = vrot.slane %v4274_v3, 1 }
  0x57   :  { %1916 = vst.msk [vmem:[#allocation2 + $0x99] sm:$0xff] %vm18_vm0, %v1884_v29  ;;  %v1890_v29 = vld [vmem:[%s8547_s0 + $0x188] sm:$0xff]  ;;  %v4337_v62 = vsel %vm231_vm2, %v268_v23, %v270_v26  ;;  %v89_v23 = vld [vmem:[%s8547_s0 + $0xd0] sm:$0xff] }
  0x58   :  { %1915 = vst.msk [vmem:[#allocation2 + $0x91] sm:$0xff] %vm18_vm0, %v1883_v32  ;;  %v1889_v32 = vld [vmem:[%s8547_s0 + $0x180] sm:$0xff] }
  0x59   :  { %1920 = vst.msk [vmem:[#allocation2 + $0xc9] sm:$0xff] %vm18_vm0, %v1888_v39 }
  0x5a   :  { %8796 = vst [vmem:[#allocation23_spill] sm:$0xff] %v4257_v55  ;;  %v4276_v6 = vld [vmem:[#allocation2 + $0xf8] sm:$0xff]  ;;  %v4290_v17 = vld [vmem:[#allocation2 + $0x100] sm:$0x3] }
  0x5b   :  { %1919 = vst.msk [vmem:[#allocation2 + $0xc1] sm:$0xff] %vm18_vm0, %v1887_v41  ;;  %342 = vrot.lane.b32.xlu0 %v4337_v62, %s3874_s18 }
  0x5c   :  { %114 = vst.msk [vmem:[#allocation2 + $0xe1] sm:$0xff] %vm18_vm0, %v80_v43  ;;  %v86_v43 = vld [vmem:[%s8547_s0 + $0xb8] sm:$0xff] }
  0x5d   :  { %8797 = vst [vmem:[#allocation24_spill] sm:$0xff] %v4272_v0  ;;  %v4329_v44 = vld [vmem:[#allocation2 + $0xd8] sm:$0xff]  ;;  %v285_v0 = vrot.slane %v4290_v17, 1 }
  0x5e   :  { %8798 = vst [vmem:[#allocation25_spill] sm:$0xff] %v4274_v3 }
  0x5f   :  { %8799 = vst [vmem:[#allocation26_spill] sm:$0xff] %v4276_v6 }
  0x60   :  { %117 = vst.msk [vmem:[#allocation2 + $0x109] sm:$0xff] %vm18_vm0, %v83_v54  ;;  %v8552_v54 = vrot.slane %v4276_v6, 1 }
  0x61   :  { %1923 = vst.msk [vmem:[#allocation2 + $0xf1] sm:$0xff] %vm18_vm0, %v1891_v57  ;;  %v1894_v57 = vld [vmem:[%s8547_s0 + $0x1a8] sm:$0xff] }
  0x62   :  { %118 = vst.msk [vmem:[#allocation2 + $0x111] sm:$0xff] %vm18_vm0, %v84_v63  ;;  %v1893_v63 = vld [vmem:[%s8547_s0 + $0x1a0] sm:$0xff]  ;;  %v4365_v26 = vsel %vm231_vm2, %v282_v45, %v8552_v54  ;;  %v1896_v54 = vld [vmem:[%s8547_s0 + $0x1b8] sm:$0xff] }
  0x63   :  { %8800 = vst [vmem:[#allocation27_spill] sm:$0xff] %v4298_v21  ;;  %v4318_v39 = vld [vmem:[#allocation2 + $0xe0] sm:$0xff]  ;;  %v4320_v41 = vld [vmem:[#allocation2 + $0xe8] sm:$0x3]  ;;  %352 = vrot.lane.b32.xlu2 %v4365_v26, %s3874_s18 }
  0x64   :  { %1924 = vst.msk [vmem:[#allocation2 + $0xf9] sm:$0xff] %vm18_vm0, %v1892_v7  ;;  %v91_v45 = vld [vmem:[%s8547_s0 + $0xe0] sm:$0xff] }
  0x65   :  { %121 = vst.msk [vmem:[#allocation2 + $0x139] sm:$0xff] %vm18_vm0, %v87_v12 }
  0x66   :  { %122 = vst.msk [vmem:[#allocation2 + $0x141] sm:$0xff] %vm18_vm0, %v88_v18 }
  0x67   :  { %8801 = vst [vmem:[#allocation28_spill] sm:$0xff] %v4314_v34  ;;  %v4355_v18 = vld [vmem:[#allocation2 + $0x108] sm:$0xff] }
  0x68   :  { %8802 = vst [vmem:[#allocation29_spill] sm:$0xff] %v4318_v39 }
  0x69   :  { %119 = vst.msk [vmem:[#allocation2 + $0x121] sm:$0xff] %vm18_vm0, %v85_v22  ;;  %v4345_v7 = vld [vmem:[#allocation2 + $0x110] sm:$0xff]  ;;  %v4347_v12 = vld [vmem:[#allocation2 + $0x118] sm:$0x3]  ;;  %v1897_v22 = vld [vmem:[%s8547_s0 + $0x1c0] sm:$0xff] }
  0x6a   :  { %1922 = vst.msk [vmem:[#allocation2 + $0xe1] sm:$0xff] %vm18_vm0, %v1890_v29  ;;  %v90_v29 = vld [vmem:[%s8547_s0 + $0xd8] sm:$0xff]  ;;  %v290_v21 = vrot.slane %v4347_v12, 1 }
  0x6b   :  { %8803 = vst [vmem:[#allocation30_spill] sm:$0xff] %v4337_v62 }
  0x6c   :  { %1921 = vst.msk [vmem:[#allocation2 + $0xd9] sm:$0xff] %vm18_vm0, %v1889_v32  ;;  %v278_v32 = vrot.slane %v4318_v39, 1 }
  0x6d   :  { %8804 = vst [vmem:[#allocation31_spill] sm:$0xff] %v4345_v7  ;;  %v4375_v2 = vld [vmem:[#allocation2 + $0x140] sm:$0xff]  ;;  %v4418_v40 = vld [vmem:[#allocation2 + $0x148] sm:$0x3] }
  0x6e   :  { %120 = vst.msk [vmem:[#allocation2 + $0x129] sm:$0xff] %vm18_vm0, %v86_v43  ;;  %v277_v43 = vrot.slane %v4329_v44, 1  ;;  %v298_v34 = vrot.slane %v4375_v2, 1 }
  0x6f   :  { %1926 = vst.msk [vmem:[#allocation2 + $0x111] sm:$0xff] %vm18_vm0, %v1894_v57  ;;  %v4373_v57 = vld [vmem:[#allocation2 + $0x138] sm:$0xff] }
  0x70   :  { %8805 = vst [vmem:[#allocation32_spill] sm:$0xff] %v4355_v18  ;;  %v4411_v62 = vld [vmem:[#allocation2 + $0x120] sm:$0xff]  ;;  %v297_v28 = vrot.slane %v4373_v57, 1 }
  0x71   :  { %8806 = vst [vmem:[#allocation33_spill] sm:$0xff] %v4365_v26 }
  0x72   :  { %1925 = vst.msk [vmem:[#allocation2 + $0x109] sm:$0xff] %vm18_vm0, %v1893_v63  ;;  %v4383_v63 = vsel %vm231_vm2, %v272_v13, %v273_v58  ;;  %v1895_v58 = vld [vmem:[%s8547_s0 + $0x1b0] sm:$0xff]  ;;  %v4401_v13 = vsel %vm231_vm2, %v277_v43, %v278_v32  ;;  %v280_v43 = vrot.slane %v4320_v41, 1 }
  0x73   :  { %8807 = vst [vmem:[#allocation34_spill] sm:$0xff] %v4373_v57  ;;  %344 = vrot.lane.b32.xlu1 %v4383_v63, %s3874_s18  ;;  %348 = vrot.lane.b32.xlu0 %v4401_v13, %s3874_s18 }
  0x74   :  { %8808 = vst [vmem:[#allocation35_spill] sm:$0xff] %v4375_v2 }
  0x75   :  { %123 = vst.msk [vmem:[#allocation2 + $0x151] sm:$0xff] %vm18_vm0, %v89_v23  ;;  %v92_v23 = vld [vmem:[%s8547_s0 + $0xe8] sm:$0xff] }
  0x76   :  { %1929 = vst.msk [vmem:[#allocation2 + $0x139] sm:$0xff] %vm18_vm0, %v1897_v22  ;;  %v288_v22 = vrot.slane %v4345_v7, 1  ;;  %v4403_v26 = vld [vmem:[#allocation2 + $0x128] sm:$0xff] }
  0x77   :  { %8809 = vst [vmem:[#allocation36_spill] sm:$0xff] %v4383_v63 }
  0x78   :  { %124 = vst.msk [vmem:[#allocation2 + $0x159] sm:$0xff] %vm18_vm0, %v90_v29  ;;  %v4405_v29 = vld [vmem:[#allocation2 + $0x130] sm:$0x3] }
  0x79   :  { %125 = vst.msk [vmem:[#allocation2 + $0x169] sm:$0xff] %vm18_vm0, %v91_v45  ;;  %v1898_v45 = vld [vmem:[%s8547_s0 + $0x1c8] sm:$0xff] }
  0x7a   :  { %8810 = vst [vmem:[#allocation37_spill] sm:$0xff] %v4401_v13  ;;  %v4441_v13 = vsel %vm231_vm2, %v278_v32, %v280_v43  ;;  %v8818_v32 = vrot.slane %v4276_v6, 1 }
  0x7b   :  { %8811 = vst [vmem:[#allocation38_spill] sm:$0xff] %v4403_v26  ;;  %350 = vrot.lane.b32.xlu1 %v4441_v13, %s3874_s18 }
  0x7c   :  { %126 = vst.msk [vmem:[#allocation2 + $0x171] sm:$0xff] %vm18_vm0, %v92_v23  ;;  %v4423_v23 = vsel %vm231_vm2, %v288_v22, %v290_v21  ;;  %v1902_v21 = vld [vmem:[%s8547_s0 + $0x1e8] sm:$0xff]  ;;  %v4458_v43 = vsel %vm231_vm2, %v8818_v32, %v285_v0  ;;  %v4473_v0 = vsel %vm231_vm2, %v297_v28, %v298_v34  ;;  %v292_v32 = vrot.slane %v4411_v62, 1 }
  0x7d   :  { %1928 = vst.msk [vmem:[#allocation2 + $0x129] sm:$0xff] %vm18_vm0, %v1896_v54  ;;  %v1900_v54 = vld [vmem:[%s8547_s0 + $0x1d8] sm:$0xff]  ;;  %358 = vrot.lane.b32.xlu2 %v4423_v23, %s3874_s18  ;;  %354 = vrot.lane.b32.xlu0 %v4458_v43, %s3874_s18  ;;  %v295_v28 = vrot.slane %v4405_v29, 1 }
  0x7e   :  { %8812 = vst [vmem:[#allocation39_spill] sm:$0xff] %v4411_v62 }
  0x7f   :  { %1927 = vst.msk [vmem:[#allocation2 + $0x121] sm:$0xff] %vm18_vm0, %v1895_v58  ;;  %v1899_v58 = vld [vmem:[%s8547_s0 + $0x1d0] sm:$0xff]  ;;  %v4433_v63 = vld [vmem:[#allocation2 + $0x158] sm:$0xff]  ;;  %v4435_v11 = vld [vmem:[#allocation2 + $0x160] sm:$0x3] }
  0x80   :  { %8813 = vst [vmem:[#allocation40_spill] sm:$0xff] %v4423_v23  ;;  %v287_v23 = vrot.slane %v4355_v18, 1  ;;  %v303_v55 = vrot.slane %v4433_v63, 1 }
  0x81   :  { %1930 = vst.msk [vmem:[#allocation2 + $0x141] sm:$0xff] %vm18_vm0, %v1898_v45  ;;  %v4446_v45 = vld [vmem:[#allocation2 + $0x150] sm:$0xff] }
  0x82   :  { %8814 = vst [vmem:[#allocation41_spill] sm:$0xff] %v4433_v63 }
  0x83   :  { %8815 = vst [vmem:[#allocation42_spill] sm:$0xff] %v4441_v13  ;;  %v4451_v53 = vld [vmem:[#allocation2 + $0x170] sm:$0xff]  ;;  %v4453_v59 = vld [vmem:[#allocation2 + $0x178] sm:$0x3]  ;;  %v4478_v13 = vsel %vm231_vm2, %v287_v23, %v288_v22  ;;  %v300_v23 = vrot.slane %v4418_v40, 1 }
  0x84   :  { %1932 = vst.msk [vmem:[#allocation2 + $0x159] sm:$0xff] %vm18_vm0, %v1900_v54  ;;  %v4463_v54 = vld [vmem:[#allocation2 + $0x168] sm:$0xff]  ;;  %356 = vrot.lane.b32.xlu1 %v4478_v13, %s3874_s18 }
  0x85   :  { %8816 = vst [vmem:[#allocation43_spill] sm:$0xff] %v4446_v45  ;;  %364 = vrot.lane.b32.xlu2 %v4473_v0, %s3874_s18 }
  0x86   :  { %1931 = vst.msk [vmem:[#allocation2 + $0x151] sm:$0xff] %vm18_vm0, %v1899_v58  ;;  %v1901_v58 = vld [vmem:[%s8547_s0 + $0x1e0] sm:$0xff] }
  0x87   :  { %8817 = vst [vmem:[#allocation44_spill] sm:$0xff] %v4451_v53 }
  0x88   :  { %8819 = vst [vmem:[#allocation45_spill] sm:$0xff] %v4458_v43  ;;  %v410_v43 = vrot.slane %v3954_v10, 2 }
  0x89   :  { %1934 = vst.msk [vmem:[#allocation2 + $0x171] sm:$0xff] %vm18_vm0, %v1902_v21  ;;  %v293_v21 = vrot.slane %v4403_v26, 1 }
  0x8a   :  { %8820 = vst [vmem:[#allocation46_spill] sm:$0xff] %v4463_v54 }
  0x8b   :  { %1933 = vst.msk [vmem:[#allocation2 + $0x169] sm:$0xff] %vm18_vm0, %v1901_v58  ;;  %v305_v58 = vrot.slane %v4435_v11, 1  ;;  %v4485_v16 = vsel %vm231_vm2, %v292_v32, %v293_v21  ;;  %v409_v32 = vrot.slane %v3952_v9, 2  ;;  %v307_v9 = vrot.slane %v4463_v54, 1 }
  0x8c   :  { %8821 = vst [vmem:[#allocation47_spill] sm:$0xff] %v4473_v0  ;;  %360 = vrot.lane.b32.xlu0 %v4485_v16, %s3874_s18  ;;  %v4497_v0 = vsel %vm231_vm2, %v293_v21, %v295_v28  ;;  %v308_v28 = vrot.slane %v4451_v53, 1 }
  0x8d   :  { %8822 = vst [vmem:[#allocation48_spill] sm:$0xff] %v4478_v13  ;;  %v4493_v22 = vsel %vm231_vm2, %v303_v55, %v305_v58  ;;  %v4504_v13 = vsel %vm231_vm2, %v298_v34, %v300_v23  ;;  %362 = vrot.lane.b32.xlu1 %v4497_v0, %s3874_s18  ;;  %v302_v58 = vrot.slane %v4446_v45, 1  ;;  %v411_v21 = vsel %vm408_vm4, %v409_v32, %v410_v43 }
  0x8e   :  { %8823 = vst [vmem:[#allocation49_spill] sm:$0xff] %v4485_v16  ;;  %370 = vrot.lane.b32.xlu2 %v4493_v22, %s3874_s18  ;;  %v415_v34 = vrot.slane %v4053_v27, 2  ;;  %v417_v23 = vrot.slane %v4062_v31, 2  ;;  %v310_v32 = vrot.slane %v4453_v59, 1 }
  0x8f   :  { %8824 = vst [vmem:[#allocation50_spill] sm:$0xff] %v4493_v22  ;;  %v4515_v10 = vsel %vm231_vm2, %v302_v58, %v303_v55  ;;  %v4521_v22 = vsel %vm231_vm2, %v307_v9, %v308_v28  ;;  %v412_v58 = vrot.slane %v4068_v33, 2  ;;  %v424_v9 = vrot.slane %v4103_v46, 2 }
  0x90   :  { %8825 = vst [vmem:[#allocation51_spill] sm:$0xff] %v4497_v0  ;;  %v4529_v55 = vsel %vm408_vm4, %v415_v34, %v417_v23  ;;  %v4535_v31 = vsel %vm231_vm2, %v308_v28, %v310_v32  ;;  %v414_v23 = vrot.slane %v4047_v25, 2  ;;  %v420_v28 = vrot.slane %v3930_v5, 2 }
  0x91   :  { %8826 = vst [vmem:[#allocation52_spill] sm:$0xff] %v4504_v13  ;;  %v413_v16 = vsel %vm408_vm4, %v410_v43, %v412_v58  ;;  %v419_v32 = vrot.slane %v3926_v4, 2  ;;  %v430_v58 = vrot.slane %v4093_v42, 2 }
  0x92   :  { %8827 = vst [vmem:[#allocation53_spill] sm:$0xff] %v4515_v10 }
  0x93   :  { %8828 = vst [vmem:[#allocation54_spill] sm:$0xff] %v4529_v55 }
  0x94   :  { %366 = vrot.lane.b32.xlu0 %v4504_v13, %s3874_s18  ;;  %8830 = vst [vmem:[#allocation56_spill] sm:$0xff] %v4535_v31  ;;  %v425_v13 = vrot.slane %v4110_v49, 2 }
  0x95   :  { %368 = vrot.lane.b32.xlu1 %v4515_v10, %s3874_s18 }
  0x96   :  { %489 = vrot.lane.b32.xlu2 %v411_v21, %s3875_s29  ;;  %v4532_v21 = vpop.permute.xlu2 %320  ;;  %v4547_v33 = vsel %vm408_vm4, %v424_v9, %v425_v13  ;;  %v422_v9 = vrot.slane %v3994_v14, 2 }
  0x97   :  { %8829 = vst [vmem:[#allocation55_spill] sm:$0xff] %v4532_v21  ;;  %v4552_v21 = vsel %vm408_vm4, %v414_v23, %v415_v34  ;;  %v427_v23 = vrot.slane %v4112_v50, 2  ;;  %v429_v50 = vrot.slane %v4083_v38, 2 }
  0x98   :  { %8831 = vst [vmem:[#allocation57_spill] sm:$0xff] %v4547_v33 }
  0x99   :  { %v4580_v14 = vsel %vm408_vm4, %v425_v13, %v427_v23  ;;  %v4595_v13 = vsel %vm408_vm4, %v429_v50, %v430_v58  ;;  %v445_v23 = vrot.slane %v4191_v20, 2 }
  0x9a   :  { %8834 = vst [vmem:[#allocation60_spill] sm:$0xff] %v4580_v14 }
  0x9b   :  { %8837 = vst [vmem:[#allocation63_spill] sm:$0xff] %v4595_v13 }
  0x9c   :  { %372 = vrot.lane.b32.xlu0 %v4521_v22, %s3874_s18 }
  0x9d   :  { %374 = vrot.lane.b32.xlu1 %v4535_v31, %s3874_s18 }
  0x9e   :  { %495 = vrot.lane.b32.xlu2 %v4529_v55, %s3875_s29  ;;  %v4556_v43 = vpop.permute.xlu2 %322  ;;  %v432_v55 = vrot.slane %v4108_v48, 2  ;;  %v439_v48 = vrot.slane %v4214_v30, 2 }
  0x9f   :  { %8832 = vst [vmem:[#allocation58_spill] sm:$0xff] %v4556_v43  ;;  %v4573_v43 = vsel %vm408_vm4, %v420_v28, %v422_v9  ;;  %v434_v9 = vrot.slane %v4156_v1, 2 }
  0xa0   :  { %v4569_v34 = vsel %vm408_vm4, %v430_v58, %v432_v55  ;;  %v4611_v58 = vpop.permute.xlu0 %312 }
  0xa1   :  { %8833 = vst [vmem:[#allocation59_spill] sm:$0xff] %v4569_v34 }
  0xa2   :  { %8840 = vst [vmem:[#allocation66_spill] sm:$0xff] %v4611_v58  ;;  %v462_v58 = vrot.slane %v4290_v17, 2  ;;  %v457_v17 = vrot.slane %v4320_v41, 2  ;;  %v459_v41 = vrot.slane %v4274_v3, 2 }
  0xa4   :  { %491 = vrot.lane.b32.xlu0 %v413_v16, %s3875_s29  ;;  %v4561_v16 = vsel %vm408_vm4, %v419_v32, %v420_v28  ;;  %v440_v32 = vrot.slane %v4221_v36, 2  ;;  %v435_v28 = vrot.slane %v4143_v60, 2 }
  0xa5   :  { %493 = vrot.lane.b32.xlu1 %v4552_v21, %s3875_s29 }
  0xa6   :  { %501 = vrot.lane.b32.xlu2 %v4547_v33, %s3875_s29  ;;  %v4582_v33 = vpop.permute.xlu2 %328  ;;  %v4590_v55 = vsel %vm408_vm4, %v439_v48, %v440_v32  ;;  %v437_v48 = vrot.slane %v4145_v61, 2  ;;  %v455_v61 = vrot.slane %v4318_v39, 2 }
  0xa7   :  { %8835 = vst [vmem:[#allocation61_spill] sm:$0xff] %v4582_v33  ;;  %v447_v33 = vrot.slane %v4200_v24, 2  ;;  %v442_v24 = vrot.slane %v4223_v37, 2  ;;  %v444_v37 = vrot.slane %v4176_v15, 2 }
  0xa8   :  { %8836 = vst [vmem:[#allocation62_spill] sm:$0xff] %v4590_v55 }
  0xa9   :  { %v4614_v50 = vsel %vm408_vm4, %v445_v23, %v447_v33  ;;  %v4632_v33 = vpop.permute.xlu1 %316 }
  0xaa   :  { %8841 = vst [vmem:[#allocation67_spill] sm:$0xff] %v4614_v50 }
  0xab   :  { %8845 = vst [vmem:[#allocation71_spill] sm:$0xff] %v4632_v33  ;;  %v460_v33 = vrot.slane %v4276_v6, 2 }
  0xac   :  { %497 = vrot.lane.b32.xlu0 %v4561_v16, %s3875_s29 }
  0xad   :  { %499 = vrot.lane.b32.xlu1 %v4573_v43, %s3875_s29 }
  0xae   :  { %507 = vrot.lane.b32.xlu2 %v4569_v34, %s3875_s29  ;;  %v4602_v34 = vsel %vm408_vm4, %v434_v9, %v435_v28  ;;  %v4618_v9 = vsel %vm408_vm4, %v435_v28, %v437_v48  ;;  %v450_v48 = vrot.slane %v4246_v47, 2 }
  0xaf   :  { %8838 = vst [vmem:[#allocation64_spill] sm:$0xff] %v4602_v34 }
  0xb0   :  { %8842 = vst [vmem:[#allocation68_spill] sm:$0xff] %v4618_v9 }
  0xb4   :  { %503 = vrot.lane.b32.xlu0 %v4580_v14, %s3875_s29  ;;  %v4604_v14 = vpop.permute.xlu2 %334 }
  0xb5   :  { %8839 = vst [vmem:[#allocation65_spill] sm:$0xff] %v4604_v14  ;;  %505 = vrot.lane.b32.xlu1 %v4595_v13, %s3875_s29  ;;  %v454_v14 = vrot.slane %v4329_v44, 2 }
  0xb6   :  { %513 = vrot.lane.b32.xlu2 %v4590_v55, %s3875_s29  ;;  %v4625_v55 = vsel %vm408_vm4, %v440_v32, %v442_v24  ;;  %v449_v32 = vrot.slane %v4251_v52, 2  ;;  %v4641_v24 = vpop.permute.xlu0 %314 }
  0xb7   :  { %8843 = vst [vmem:[#allocation69_spill] sm:$0xff] %v4625_v55  ;;  %v4637_v28 = vsel %vm408_vm4, %v454_v14, %v455_v61 }
  0xb8   :  { %8846 = vst [vmem:[#allocation72_spill] sm:$0xff] %v4637_v28 }
  0xb9   :  { %8847 = vst [vmem:[#allocation73_spill] sm:$0xff] %v4641_v24  ;;  %v452_v24 = vrot.slane %v4248_v51, 2  ;;  %v469_v51 = vrot.slane %v4411_v62, 2 }
  0xbc   :  { %509 = vrot.lane.b32.xlu0 %v4602_v34, %s3875_s29  ;;  %v4627_v34 = vpop.permute.xlu2 %340 }
  0xbd   :  { %8844 = vst [vmem:[#allocation70_spill] sm:$0xff] %v4627_v34  ;;  %511 = vrot.lane.b32.xlu1 %v4618_v9, %s3875_s29  ;;  %v4644_v34 = vsel %vm408_vm4, %v444_v37, %v445_v23  ;;  %v4663_v23 = vsel %vm408_vm4, %v460_v33, %v462_v58 }
  0xbe   :  { %519 = vrot.lane.b32.xlu2 %v4614_v50, %s3875_s29  ;;  %8848 = vst [vmem:[#allocation74_spill] sm:$0xff] %v4644_v34  ;;  %v4651_v50 = vsel %vm408_vm4, %v449_v32, %v450_v48  ;;  %v4666_v37 = vpop.permute.xlu0 %324  ;;  %v4669_v32 = vsel %vm408_vm4, %v450_v48, %v452_v24  ;;  %v465_v24 = vrot.slane %v4345_v7, 2 }
  0xbf   :  { %8851 = vst [vmem:[#allocation77_spill] sm:$0xff] %v4663_v23 }
  0xc0   :  { %8852 = vst [vmem:[#allocation78_spill] sm:$0xff] %v4666_v37  ;;  %v477_v37 = vrot.slane %v4418_v40, 2  ;;  %v472_v40 = vrot.slane %v4405_v29, 2  ;;  %v474_v29 = vrot.slane %v4373_v57, 2 }
  0xc1   :  { %8853 = vst [vmem:[#allocation79_spill] sm:$0xff] %v4669_v32 }
  0xc4   :  { %515 = vrot.lane.b32.xlu0 %v4625_v55, %s3875_s29  ;;  %v4653_v14 = vpop.permute.xlu2 %346  ;;  %v4658_v55 = vpop.permute.xlu1 %318 }
  0xc5   :  { %8849 = vst [vmem:[#allocation75_spill] sm:$0xff] %v4653_v14  ;;  %517 = vrot.lane.b32.xlu1 %v4644_v34, %s3875_s29  ;;  %v470_v14 = vrot.slane %v4403_v26, 2 }
  0xc6   :  { %525 = vrot.lane.b32.xlu2 %v4637_v28, %s3875_s29  ;;  %8850 = vst [vmem:[#allocation76_spill] sm:$0xff] %v4658_v55  ;;  %v4676_v55 = vsel %vm408_vm4, %v455_v61, %v457_v17  ;;  %v464_v61 = vrot.slane %v4355_v18, 2  ;;  %v4692_v17 = vpop.permute.xlu0 %330 }
  0xc7   :  { %8854 = vst [vmem:[#allocation80_spill] sm:$0xff] %v4676_v55  ;;  %v4688_v48 = vsel %vm408_vm4, %v469_v51, %v470_v14 }
  0xc8   :  { %8857 = vst [vmem:[#allocation83_spill] sm:$0xff] %v4688_v48 }
  0xc9   :  { %8858 = vst [vmem:[#allocation84_spill] sm:$0xff] %v4692_v17  ;;  %v467_v17 = vrot.slane %v4347_v12, 2  ;;  %v484_v12 = vrot.slane %v4463_v54, 2 }
  0xcc   :  { %521 = vrot.lane.b32.xlu0 %v4651_v50, %s3875_s29  ;;  %v4678_v28 = vpop.permute.xlu2 %352  ;;  %v4683_v58 = vpop.permute.xlu1 %326 }
  0xcd   :  { %8855 = vst [vmem:[#allocation81_spill] sm:$0xff] %v4678_v28  ;;  %523 = vrot.lane.b32.xlu1 %v4669_v32, %s3875_s29  ;;  %v4695_v28 = vsel %vm408_vm4, %v459_v41, %v460_v33 }
  0xce   :  { %531 = vrot.lane.b32.xlu2 %v4663_v23, %s3875_s29  ;;  %8856 = vst [vmem:[#allocation82_spill] sm:$0xff] %v4683_v58  ;;  %v475_v58 = vrot.slane %v4375_v2, 2  ;;  %v4702_v23 = vsel %vm408_vm4, %v464_v61, %v465_v24  ;;  %v4717_v41 = vpop.permute.xlu0 %336  ;;  %v4720_v61 = vsel %vm408_vm4, %v465_v24, %v467_v17  ;;  %v480_v17 = vrot.slane %v4433_v63, 2 }
  0xcf   :  { %8859 = vst [vmem:[#allocation85_spill] sm:$0xff] %v4695_v28 }
  0xd0   :  { %v4714_v33 = vsel %vm408_vm4, %v475_v58, %v477_v37  ;;  %8863 = vst [vmem:[#allocation89_spill] sm:$0xff] %v4717_v41 }
  0xd1   :  { %8862 = vst [vmem:[#allocation88_spill] sm:$0xff] %v4714_v33 }
  0xd2   :  { %8864 = vst [vmem:[#allocation90_spill] sm:$0xff] %v4720_v61 }
  0xd4   :  { %527 = vrot.lane.b32.xlu0 %v4676_v55, %s3875_s29  ;;  %v4709_v55 = vpop.permute.xlu1 %332 }
  0xd5   :  { %529 = vrot.lane.b32.xlu1 %v4695_v28, %s3875_s29  ;;  %8861 = vst [vmem:[#allocation87_spill] sm:$0xff] %v4709_v55  ;;  %v4727_v55 = vsel %vm408_vm4, %v470_v14, %v472_v40  ;;  %v479_v14 = vrot.slane %v4446_v45, 2 }
  0xd6   :  { %537 = vrot.lane.b32.xlu2 %v4688_v48, %s3875_s29  ;;  %v4743_v40 = vpop.permute.xlu0 %342 }
  0xd7   :  { %v4704_v51 = vpop.permute.xlu2 %358  ;;  %8867 = vst [vmem:[#allocation93_spill] sm:$0xff] %v4743_v40 }
  0xd8   :  { %8860 = vst [vmem:[#allocation86_spill] sm:$0xff] %v4704_v51  ;;  %v485_v51 = vrot.slane %v4451_v53, 2 }
  0xda   :  { %v4739_v24 = vsel %vm408_vm4, %v484_v12, %v485_v51  ;;  %v482_v12 = vrot.slane %v4435_v11, 2 }
  0xdc   :  { %533 = vrot.lane.b32.xlu0 %v4702_v23, %s3875_s29  ;;  %v4734_v37 = vpop.permute.xlu1 %338  ;;  %v4766_v40 = vsel %vm408_vm4, %v480_v17, %v482_v12 }
  0xdd   :  { %535 = vrot.lane.b32.xlu1 %v4720_v61, %s3875_s29  ;;  %8866 = vst [vmem:[#allocation92_spill] sm:$0xff] %v4734_v37  ;;  %v4751_v37 = vsel %vm408_vm4, %v479_v14, %v480_v17 }
  0xde   :  { %543 = vrot.lane.b32.xlu2 %v4714_v33, %s3875_s29  ;;  %8872 = vst [vmem:[#allocation98_spill] sm:$0xff] %v4766_v40 }
  0xdf   :  { %v4729_v48 = vpop.permute.xlu2 %364 }
  0xe0   :  { %8865 = vst [vmem:[#allocation91_spill] sm:$0xff] %v4729_v48  ;;  %v4746_v48 = vsel %vm408_vm4, %v474_v29, %v475_v58  ;;  %v487_v58 = vrot.slane %v4453_v59, 2 }
  0xe1   :  { %8868 = vst [vmem:[#allocation94_spill] sm:$0xff] %v4746_v48 }
  0xe2   :  { %v4771_v14 = vsel %vm408_vm4, %v485_v51, %v487_v58 }
  0xe4   :  { %539 = vrot.lane.b32.xlu0 %v4727_v55, %s3875_s29 }
  0xe5   :  { %541 = vrot.lane.b32.xlu1 %v4746_v48, %s3875_s29  ;;  %v4758_v33 = vpop.permute.xlu1 %344  ;;  %v4763_v29 = vpop.permute.xlu0 %348 }
  0xe6   :  { %549 = vrot.lane.b32.xlu2 %v4739_v24, %s3875_s29  ;;  %8870 = vst [vmem:[#allocation96_spill] sm:$0xff] %v4758_v33 }
  0xe7   :  { %8871 = vst [vmem:[#allocation97_spill] sm:$0xff] %v4763_v29 }
  0xe8   :  { %v4753_v41 = vpop.permute.xlu2 %370 }
  0xe9   :  { %8869 = vst [vmem:[#allocation95_spill] sm:$0xff] %v4753_v41 }
  0xec   :  { %545 = vrot.lane.b32.xlu0 %v4751_v37, %s3875_s29 }
  0xed   :  { %547 = vrot.lane.b32.xlu1 %v4766_v40, %s3875_s29  ;;  %v4777_v41 = vpop.permute.xlu1 %350 }
  0xee   :  { %589 = vrot.lane.b32.xlu2 %v4053_v27, %s3876_s30  ;;  %8874 = vst [vmem:[#allocation100_spill] sm:$0xff] %v4777_v41 }
  0xef   :  { %v4781_v59 = vpop.permute.xlu0 %354 }
  0xf0   :  { %v4773_v11 = vpop.permute.xlu2 %489  ;;  %8875 = vst [vmem:[#allocation101_spill] sm:$0xff] %v4781_v59 }
  0xf1   :  { %8873 = vst [vmem:[#allocation99_spill] sm:$0xff] %v4773_v11 }
  0xf4   :  { %551 = vrot.lane.b32.xlu0 %v4771_v14, %s3875_s29 }
  0xf5   :  { %587 = vrot.lane.b32.xlu1 %v4047_v25, %s3876_s30 }
  0xf6   :  { %595 = vrot.lane.b32.xlu2 %v4103_v46, %s3876_s30  ;;  %v4789_v51 = vpop.permute.xlu1 %356 }
  0xf7   :  { %8877 = vst [vmem:[#allocation103_spill] sm:$0xff] %v4789_v51 }
  0xf8   :  { %v4785_v17 = vpop.permute.xlu2 %495 }
  0xf9   :  { %8876 = vst [vmem:[#allocation102_spill] sm:$0xff] %v4785_v17 }
  0xfc   :  { %591 = vrot.lane.b32.xlu0 %v3926_v4, %s3876_s30 }
  0xfd   :  { %593 = vrot.lane.b32.xlu1 %v3930_v5, %s3876_s30 }
  0xfe   :  { %v4793_v12 = vpop.permute.xlu0 %360  ;;  %601 = vrot.lane.b32.xlu2 %v4093_v42, %s3876_s30 }
  0xff   :  { %8878 = vst [vmem:[#allocation104_spill] sm:$0xff] %v4793_v12  ;;  %v4801_v59 = vpop.permute.xlu1 %362 }
 0x100   :  { %v4797_v58 = vpop.permute.xlu2 %501  ;;  %8880 = vst [vmem:[#allocation106_spill] sm:$0xff] %v4801_v59 }
 0x101   :  { %8879 = vst [vmem:[#allocation105_spill] sm:$0xff] %v4797_v58  ;;  %v93_v58 = vld [vmem:[%s8547_s0 + $0xf0] sm:$0xff] }
 0x102   :  { %127 = vst.msk [vmem:[#allocation2 + $0x181] sm:$0xff] %vm18_vm0, %v93_v58 }
 0x104   :  { %597 = vrot.lane.b32.xlu0 %v4110_v49, %s3876_s30 }
 0x105   :  { %599 = vrot.lane.b32.xlu1 %v4083_v38, %s3876_s30 }
 0x106   :  { %v4805_v41 = vpop.permute.xlu0 %366  ;;  %607 = vrot.lane.b32.xlu2 %v4214_v30, %s3876_s30 }
 0x107   :  { %8881 = vst [vmem:[#allocation107_spill] sm:$0xff] %v4805_v41  ;;  %v4813_v12 = vpop.permute.xlu1 %368 }
 0x108   :  { %v4809_v51 = vpop.permute.xlu2 %507  ;;  %8883 = vst [vmem:[#allocation109_spill] sm:$0xff] %v4813_v12 }
 0x109   :  { %8882 = vst [vmem:[#allocation108_spill] sm:$0xff] %v4809_v51  ;;  %v4869_v17 = vld [vmem:[#allocation2 + $0x180] sm:$0xff] }
 0x10c   :  { %603 = vrot.lane.b32.xlu0 %v4156_v1, %s3876_s30 }
 0x10d   :  { %605 = vrot.lane.b32.xlu1 %v4143_v60, %s3876_s30 }
 0x10e   :  { %v4817_v29 = vpop.permute.xlu0 %372  ;;  %613 = vrot.lane.b32.xlu2 %v4191_v20, %s3876_s30 }
 0x10f   :  { %8884 = vst [vmem:[#allocation110_spill] sm:$0xff] %v4817_v29  ;;  %v4825_v41 = vpop.permute.xlu1 %374 }
 0x110   :  { %v4821_v59 = vpop.permute.xlu2 %513  ;;  %8886 = vst [vmem:[#allocation112_spill] sm:$0xff] %v4825_v41 }
 0x111   :  { %8885 = vst [vmem:[#allocation111_spill] sm:$0xff] %v4821_v59 }
 0x114   :  { %609 = vrot.lane.b32.xlu0 %v4221_v36, %s3876_s30 }
 0x115   :  { %611 = vrot.lane.b32.xlu1 %v4176_v15, %s3876_s30 }
 0x116   :  { %v4829_v51 = vpop.permute.xlu0 %491  ;;  %619 = vrot.lane.b32.xlu2 %v4329_v44, %s3876_s30 }
 0x117   :  { %8887 = vst [vmem:[#allocation113_spill] sm:$0xff] %v4829_v51  ;;  %v4837_v29 = vpop.permute.xlu1 %493 }
 0x118   :  { %v4833_v12 = vpop.permute.xlu2 %519  ;;  %8889 = vst [vmem:[#allocation115_spill] sm:$0xff] %v4837_v29  ;;  %v8911_v29 = vld [vmem:[#allocation6_spill] sm:$0xff] }
 0x119   :  { %8888 = vst [vmem:[#allocation114_spill] sm:$0xff] %v4833_v12  ;;  %v94_v12 = vld [vmem:[%s8547_s0 + $0xf8] sm:$0xff] }
 0x11a   :  { %128 = vst.msk [vmem:[#allocation2 + $0x189] sm:$0xff] %vm18_vm0, %v94_v12  ;;  %v1903_v12 = vld [vmem:[%s8547_s0 + $0x1f0] sm:$0xff] }
 0x11c   :  { %615 = vrot.lane.b32.xlu0 %v4251_v52, %s3876_s30 }
 0x11d   :  { %617 = vrot.lane.b32.xlu1 %v4246_v47, %s3876_s30 }
 0x11e   :  { %v4841_v59 = vpop.permute.xlu0 %497  ;;  %625 = vrot.lane.b32.xlu2 %v4276_v6, %s3876_s30 }
 0x11f   :  { %8890 = vst [vmem:[#allocation116_spill] sm:$0xff] %v4841_v59  ;;  %v4857_v33 = vpop.permute.xlu1 %499 }
 0x120   :  { %v4845_v41 = vpop.permute.xlu2 %525  ;;  %8892 = vst [vmem:[#allocation118_spill] sm:$0xff] %v4857_v33 }
 0x121   :  { %8891 = vst [vmem:[#allocation117_spill] sm:$0xff] %v4845_v41  ;;  %v4871_v58 = vld [vmem:[#allocation2 + $0x188] sm:$0xff] }
 0x122   :  { %1935 = vst.msk [vmem:[#allocation2 + $0x181] sm:$0xff] %vm18_vm0, %v1903_v12 }
 0x124   :  { %621 = vrot.lane.b32.xlu0 %v4318_v39, %s3876_s30 }
 0x125   :  { %623 = vrot.lane.b32.xlu1 %v4274_v3, %s3876_s30 }
 0x126   :  { %v4861_v41 = vpop.permute.xlu0 %503  ;;  %631 = vrot.lane.b32.xlu2 %v4411_v62, %s3876_s30 }
 0x127   :  { %8893 = vst [vmem:[#allocation119_spill] sm:$0xff] %v4861_v41  ;;  %v4877_v33 = vpop.permute.xlu1 %505 }
 0x128   :  { %v4865_v59 = vpop.permute.xlu2 %531  ;;  %8895 = vst [vmem:[#allocation121_spill] sm:$0xff] %v4877_v33 }
 0x129   :  { %8894 = vst [vmem:[#allocation120_spill] sm:$0xff] %v4865_v59 }
 0x12c   :  { %627 = vrot.lane.b32.xlu0 %v4355_v18, %s3876_s30 }
 0x12d   :  { %629 = vrot.lane.b32.xlu1 %v4345_v7, %s3876_s30 }
 0x12e   :  { %v4881_v41 = vpop.permute.xlu0 %509  ;;  %637 = vrot.lane.b32.xlu2 %v4375_v2, %s3876_s30 }
 0x12f   :  { %8896 = vst [vmem:[#allocation122_spill] sm:$0xff] %v4881_v41  ;;  %v4889_v27 = vpop.permute.xlu1 %511 }
 0x130   :  { %v4885_v59 = vpop.permute.xlu2 %537  ;;  %8898 = vst [vmem:[#allocation124_spill] sm:$0xff] %v4889_v27 }
 0x131   :  { %8897 = vst [vmem:[#allocation123_spill] sm:$0xff] %v4885_v59 }
 0x134   :  { %633 = vrot.lane.b32.xlu0 %v4403_v26, %s3876_s30 }
 0x135   :  { %635 = vrot.lane.b32.xlu1 %v4373_v57, %s3876_s30 }
 0x136   :  { %v4893_v12 = vpop.permute.xlu0 %515  ;;  %643 = vrot.lane.b32.xlu2 %v4463_v54, %s3876_s30 }
 0x137   :  { %8899 = vst [vmem:[#allocation125_spill] sm:$0xff] %v4893_v12  ;;  %v4901_v41 = vpop.permute.xlu1 %517 }
 0x138   :  { %v4897_v33 = vpop.permute.xlu2 %543  ;;  %8901 = vst [vmem:[#allocation127_spill] sm:$0xff] %v4901_v41 }
 0x139   :  { %8900 = vst [vmem:[#allocation126_spill] sm:$0xff] %v4897_v33 }
 0x13c   :  { %639 = vrot.lane.b32.xlu0 %v4446_v45, %s3876_s30 }
 0x13d   :  { %641 = vrot.lane.b32.xlu1 %v4433_v63, %s3876_s30 }
 0x13e   :  { %v4905_v59 = vpop.permute.xlu0 %521  ;;  %649 = vrot.lane.b32.xlu2 %v4871_v58, %s3876_s30 }
 0x13f   :  { %8902 = vst [vmem:[#allocation128_spill] sm:$0xff] %v4905_v59  ;;  %v4913_v12 = vpop.permute.xlu1 %523 }
 0x140   :  { %v4909_v27 = vpop.permute.xlu2 %549  ;;  %8904 = vst [vmem:[#allocation130_spill] sm:$0xff] %v4913_v12 }
 0x141   :  { %8903 = vst [vmem:[#allocation129_spill] sm:$0xff] %v4909_v27 }
 0x144   :  { %645 = vrot.lane.b32.xlu0 %v4451_v53, %s3876_s30 }
 0x145   :  { %647 = vrot.lane.b32.xlu1 %v4869_v17, %s3876_s30 }
 0x146   :  { %v4917_v33 = vpop.permute.xlu0 %527  ;;  %693 = vrot.lane.b32.xlu2 %v3940_v8, %s3877_s10 }
 0x147   :  { %8905 = vst [vmem:[#allocation131_spill] sm:$0xff] %v4917_v33  ;;  %v4925_v27 = vpop.permute.xlu1 %529 }
 0x148   :  { %v4921_v41 = vpop.permute.xlu2 %589  ;;  %8907 = vst [vmem:[#allocation133_spill] sm:$0xff] %v4925_v27  ;;  %v8913_v27 = vld [vmem:[#allocation23_spill] sm:$0xff] }
 0x149   :  { %8906 = vst [vmem:[#allocation132_spill] sm:$0xff] %v4921_v41 }
 0x14c   :  { %689 = vrot.lane.b32.xlu0 %v4074_v35, %s3877_s10 }
 0x14d   :  { %691 = vrot.lane.b32.xlu1 %v4128_v56, %s3877_s10 }
 0x14e   :  { %v4929_v12 = vpop.permute.xlu0 %533  ;;  %699 = vrot.lane.b32.xlu2 %v4187_v19, %s3877_s10 }
 0x14f   :  { %8908 = vst [vmem:[#allocation134_spill] sm:$0xff] %v4929_v12  ;;  %v4937_v59 = vpop.permute.xlu1 %535  ;;  %v8915_v12 = vld [vmem:[#allocation12_spill] sm:$0xff] }
 0x150   :  { %v4933_v33 = vpop.permute.xlu2 %595  ;;  %8910 = vst [vmem:[#allocation136_spill] sm:$0xff] %v4937_v59  ;;  %v8919_v59 = vld [vmem:[#allocation28_spill] sm:$0xff] }
 0x151   :  { %8909 = vst [vmem:[#allocation135_spill] sm:$0xff] %v4933_v33  ;;  %v8917_v33 = vld [vmem:[#allocation11_spill] sm:$0xff] }
 0x154   :  { %695 = vrot.lane.b32.xlu0 %v8911_v29, %s3877_s10 }
 0x155   :  { %697 = vrot.lane.b32.xlu1 %v8915_v12, %s3877_s10 }
 0x156   :  { %v4941_v25 = vpop.permute.xlu0 %539  ;;  %705 = vrot.lane.b32.xlu2 %v8913_v27, %s3877_s10 }
 0x157   :  { %8912 = vst [vmem:[#allocation6_spill] sm:$0xff] %v4941_v25  ;;  %v4949_v41 = vpop.permute.xlu1 %541  ;;  %v8921_v25 = vld [vmem:[#allocation19_spill] sm:$0xff] }
 0x158   :  { %v4945_v35 = vpop.permute.xlu2 %601  ;;  %8916 = vst [vmem:[#allocation12_spill] sm:$0xff] %v4949_v41  ;;  %v8925_v41 = vld [vmem:[#allocation36_spill] sm:$0xff] }
 0x159   :  { %8914 = vst [vmem:[#allocation137_spill] sm:$0xff] %v4945_v35  ;;  %v8923_v35 = vld [vmem:[#allocation15_spill] sm:$0xff] }
 0x15c   :  { %701 = vrot.lane.b32.xlu0 %v8917_v33, %s3877_s10 }
 0x15d   :  { %703 = vrot.lane.b32.xlu1 %v8921_v25, %s3877_s10 }
 0x15e   :  { %v4953_v56 = vpop.permute.xlu0 %545  ;;  %711 = vrot.lane.b32.xlu2 %v8919_v59, %s3877_s10 }
 0x15f   :  { %8918 = vst [vmem:[#allocation138_spill] sm:$0xff] %v4953_v56  ;;  %v4961_v11 = vpop.permute.xlu1 %547  ;;  %v8927_v56 = vld [vmem:[#allocation24_spill] sm:$0xff] }
 0x160   :  { %v4957_v51 = vpop.permute.xlu2 %607  ;;  %8922 = vst [vmem:[#allocation19_spill] sm:$0xff] %v4961_v11  ;;  %v8931_v11 = vld [vmem:[#allocation42_spill] sm:$0xff] }
 0x161   :  { %8920 = vst [vmem:[#allocation139_spill] sm:$0xff] %v4957_v51  ;;  %v8929_v51 = vld [vmem:[#allocation22_spill] sm:$0xff] }
 0x164   :  { %707 = vrot.lane.b32.xlu0 %v8923_v35, %s3877_s10 }
 0x165   :  { %709 = vrot.lane.b32.xlu1 %v8927_v56, %s3877_s10 }
 0x166   :  { %v4965_v27 = vpop.permute.xlu0 %551  ;;  %717 = vrot.lane.b32.xlu2 %v8925_v41, %s3877_s10 }
 0x167   :  { %8924 = vst [vmem:[#allocation140_spill] sm:$0xff] %v4965_v27  ;;  %v4973_v59 = vpop.permute.xlu1 %587  ;;  %v8933_v27 = vld [vmem:[#allocation30_spill] sm:$0xff] }
 0x168   :  { %v4969_v33 = vpop.permute.xlu2 %613  ;;  %8928 = vst [vmem:[#allocation142_spill] sm:$0xff] %v4973_v59  ;;  %v8937_v59 = vld [vmem:[#allocation48_spill] sm:$0xff] }
 0x169   :  { %8926 = vst [vmem:[#allocation141_spill] sm:$0xff] %v4969_v33  ;;  %v8935_v33 = vld [vmem:[#allocation27_spill] sm:$0xff] }
 0x16c   :  { %713 = vrot.lane.b32.xlu0 %v8929_v51, %s3877_s10 }
 0x16d   :  { %715 = vrot.lane.b32.xlu1 %v8933_v27, %s3877_s10  ;;  %v5001_v27 = vld [vmem:[#allocation2 + $0x190] sm:$0x3] }
 0x16e   :  { %v4977_v19 = vpop.permute.xlu0 %591  ;;  %723 = vrot.lane.b32.xlu2 %v8931_v11, %s3877_s10 }
 0x16f   :  { %8930 = vst [vmem:[#allocation143_spill] sm:$0xff] %v4977_v19  ;;  %v4985_v41 = vpop.permute.xlu1 %593  ;;  %v8939_v19 = vld [vmem:[#allocation37_spill] sm:$0xff] }
 0x170   :  { %v4981_v35 = vpop.permute.xlu2 %619  ;;  %8934 = vst [vmem:[#allocation145_spill] sm:$0xff] %v4985_v41  ;;  %v1904_v41 = vld [vmem:[%s8547_s0 + $0x1f8] sm:$0xff]  ;;  %s3878_s0 = smov 20  }
 0x171   :  { %8932 = vst [vmem:[#allocation144_spill] sm:$0xff] %v4981_v35  ;;  %v8941_v35 = vld [vmem:[#allocation33_spill] sm:$0xff] }
 0x172   :  { %1936 = vst.msk [vmem:[#allocation2 + $0x189] sm:$0xff] %vm18_vm0, %v1904_v41  ;;  %v8949_v41 = vld [vmem:[#allocation49_spill] sm:$0xff] }
 0x174   :  { %719 = vrot.lane.b32.xlu0 %v8935_v33, %s3877_s10 }
 0x175   :  { %721 = vrot.lane.b32.xlu1 %v8939_v19, %s3877_s10 }
 0x176   :  { %v4989_v56 = vpop.permute.xlu0 %597  ;;  %729 = vrot.lane.b32.xlu2 %v8937_v59, %s3877_s10 }
 0x177   :  { %8936 = vst [vmem:[#allocation146_spill] sm:$0xff] %v4989_v56  ;;  %v4997_v11 = vpop.permute.xlu1 %599 }
 0x178   :  { %v4993_v51 = vpop.permute.xlu2 %625  ;;  %8940 = vst [vmem:[#allocation37_spill] sm:$0xff] %v4997_v11  ;;  %v8944_v11 = vld [vmem:[#allocation45_spill] sm:$0xff] }
 0x179   :  { %8938 = vst [vmem:[#allocation147_spill] sm:$0xff] %v4993_v51 }
 0x17c   :  { %725 = vrot.lane.b32.xlu0 %v8941_v35, %s3877_s10  ;;  %v8946_v35 = vld [vmem:[#allocation40_spill] sm:$0xff] }
 0x17d   :  { %727 = vrot.lane.b32.xlu1 %v8944_v11, %s3877_s10 }
 0x17e   :  { %v5006_v56 = vpop.permute.xlu0 %603  ;;  %735 = vrot.lane.b32.xlu2 %v4497_v0, %s3877_s10 }
 0x17f   :  { %8942 = vst [vmem:[#allocation148_spill] sm:$0xff] %v5006_v56  ;;  %v5015_v59 = vpop.permute.xlu1 %605 }
 0x180   :  { %v5011_v51 = vpop.permute.xlu2 %631  ;;  %8945 = vst [vmem:[#allocation150_spill] sm:$0xff] %v5015_v59 }
 0x181   :  { %8943 = vst [vmem:[#allocation149_spill] sm:$0xff] %v5011_v51  ;;  %v8951_v51 = vld [vmem:[#allocation47_spill] sm:$0xff] }
 0x184   :  { %731 = vrot.lane.b32.xlu0 %v8946_v35, %s3877_s10  ;;  %v684_v35 = vrot.slane %v4869_v17, 1 }
 0x185   :  { %733 = vrot.lane.b32.xlu1 %v8949_v41, %s3877_s10 }
 0x186   :  { %v5019_v33 = vpop.permute.xlu0 %609  ;;  %741 = vrot.lane.b32.xlu2 %v4515_v10, %s3877_s10 }
 0x187   :  { %8947 = vst [vmem:[#allocation151_spill] sm:$0xff] %v5019_v33  ;;  %v5027_v0 = vpop.permute.xlu1 %611  ;;  %v8954_v33 = vld [vmem:[#allocation52_spill] sm:$0xff] }
 0x188   :  { %v5023_v56 = vpop.permute.xlu2 %637  ;;  %8950 = vst [vmem:[#allocation49_spill] sm:$0xff] %v5027_v0  ;;  %v685_v0 = vrot.slane %v4871_v58, 1 }
 0x189   :  { %8948 = vst [vmem:[#allocation152_spill] sm:$0xff] %v5023_v56  ;;  %v8956_v56 = vld [vmem:[#allocation50_spill] sm:$0xff] }
 0x18c   :  { %737 = vrot.lane.b32.xlu0 %v8951_v51, %s3877_s10 }
 0x18d   :  { %739 = vrot.lane.b32.xlu1 %v8954_v33, %s3877_s10 }
 0x18e   :  { %v5031_v11 = vpop.permute.xlu0 %615  ;;  %747 = vrot.lane.b32.xlu2 %v4535_v31, %s3877_s10 }
 0x18f   :  { %8952 = vst [vmem:[#allocation153_spill] sm:$0xff] %v5031_v11  ;;  %v5039_v10 = vpop.permute.xlu1 %617 }
 0x190   :  { %v5035_v59 = vpop.permute.xlu2 %643  ;;  %8955 = vst [vmem:[#allocation52_spill] sm:$0xff] %v5039_v10  ;;  %v687_v10 = vrot.slane %v5001_v27, 1 }
 0x191   :  { %8953 = vst [vmem:[#allocation154_spill] sm:$0xff] %v5035_v59  ;;  %v5050_v59 = vsel %vm231_vm2, %v684_v35, %v685_v0 }
 0x194   :  { %743 = vrot.lane.b32.xlu0 %v8956_v56, %s3877_s10  ;;  %v5064_v56 = vsel %vm231_vm2, %v685_v0, %v687_v10 }
 0x195   :  { %745 = vrot.lane.b32.xlu1 %v4521_v22, %s3877_s10 }
 0x196   :  { %v5045_v51 = vpop.permute.xlu0 %621  ;;  %790 = vrot.lane.b32.xlu2 %v4552_v21, %s3878_s0 }
 0x197   :  { %8957 = vst [vmem:[#allocation155_spill] sm:$0xff] %v5045_v51  ;;  %v5057_v31 = vpop.permute.xlu1 %623 }
 0x198   :  { %v5052_v11 = vpop.permute.xlu2 %649  ;;  %8959 = vst [vmem:[#allocation157_spill] sm:$0xff] %v5057_v31 }
 0x199   :  { %8958 = vst [vmem:[#allocation156_spill] sm:$0xff] %v5052_v11  ;;  %v8963_v11 = vld [vmem:[#allocation54_spill] sm:$0xff] }
 0x19c   :  { %749 = vrot.lane.b32.xlu0 %v5050_v59, %s3877_s10 }
 0x19d   :  { %751 = vrot.lane.b32.xlu1 %v5064_v56, %s3877_s10 }
 0x19e   :  { %v5061_v51 = vpop.permute.xlu0 %627  ;;  %796 = vrot.lane.b32.xlu2 %v4573_v43, %s3878_s0 }
 0x19f   :  { %8960 = vst [vmem:[#allocation158_spill] sm:$0xff] %v5061_v51  ;;  %v5072_v35 = vpop.permute.xlu1 %629  ;;  %v8967_v51 = vld [vmem:[#allocation57_spill] sm:$0xff] }
 0x1a0   :  { %v5068_v21 = vpop.permute.xlu2 %693  ;;  %8962 = vst [vmem:[#allocation160_spill] sm:$0xff] %v5072_v35 }
 0x1a1   :  { %8961 = vst [vmem:[#allocation159_spill] sm:$0xff] %v5068_v21 }
 0x1a4   :  { %792 = vrot.lane.b32.xlu0 %v8963_v11, %s3878_s0 }
 0x1a5   :  { %794 = vrot.lane.b32.xlu1 %v4561_v16, %s3878_s0 }
 0x1a6   :  { %v5076_v31 = vpop.permute.xlu0 %633  ;;  %802 = vrot.lane.b32.xlu2 %v4595_v13, %s3878_s0 }
 0x1a7   :  { %8964 = vst [vmem:[#allocation54_spill] sm:$0xff] %v5076_v31  ;;  %v5084_v10 = vpop.permute.xlu1 %635  ;;  %v8970_v31 = vld [vmem:[#allocation60_spill] sm:$0xff] }
 0x1a8   :  { %v5080_v0 = vpop.permute.xlu2 %699  ;;  %8966 = vst [vmem:[#allocation162_spill] sm:$0xff] %v5084_v10 }
 0x1a9   :  { %8965 = vst [vmem:[#allocation161_spill] sm:$0xff] %v5080_v0  ;;  %v8972_v0 = vld [vmem:[#allocation59_spill] sm:$0xff] }
 0x1ac   :  { %798 = vrot.lane.b32.xlu0 %v8967_v51, %s3878_s0 }
 0x1ad   :  { %800 = vrot.lane.b32.xlu1 %v8970_v31, %s3878_s0 }
 0x1ae   :  { %v5088_v21 = vpop.permute.xlu0 %639  ;;  %808 = vrot.lane.b32.xlu2 %v4618_v9, %s3878_s0 }
 0x1af   :  { %8968 = vst [vmem:[#allocation163_spill] sm:$0xff] %v5088_v21  ;;  %v5096_v35 = vpop.permute.xlu1 %641  ;;  %v8975_v21 = vld [vmem:[#allocation64_spill] sm:$0xff] }
 0x1b0   :  { %v5092_v11 = vpop.permute.xlu2 %705  ;;  %8971 = vst [vmem:[#allocation60_spill] sm:$0xff] %v5096_v35 }
 0x1b1   :  { %8969 = vst [vmem:[#allocation164_spill] sm:$0xff] %v5092_v11  ;;  %v8977_v11 = vld [vmem:[#allocation62_spill] sm:$0xff] }
 0x1b4   :  { %804 = vrot.lane.b32.xlu0 %v8972_v0, %s3878_s0 }
 0x1b5   :  { %806 = vrot.lane.b32.xlu1 %v8975_v21, %s3878_s0 }
 0x1b6   :  { %v5100_v13 = vpop.permute.xlu0 %645  ;;  %814 = vrot.lane.b32.xlu2 %v4644_v34, %s3878_s0 }
 0x1b7   :  { %8973 = vst [vmem:[#allocation165_spill] sm:$0xff] %v5100_v13  ;;  %v5108_v9 = vpop.permute.xlu1 %647  ;;  %v8980_v13 = vld [vmem:[#allocation69_spill] sm:$0xff] }
 0x1b8   :  { %v5104_v10 = vpop.permute.xlu2 %711  ;;  %8976 = vst [vmem:[#allocation64_spill] sm:$0xff] %v5108_v9 }
 0x1b9   :  { %8974 = vst [vmem:[#allocation166_spill] sm:$0xff] %v5104_v10  ;;  %v8982_v10 = vld [vmem:[#allocation67_spill] sm:$0xff] }
 0x1bc   :  { %810 = vrot.lane.b32.xlu0 %v8977_v11, %s3878_s0 }
 0x1bd   :  { %812 = vrot.lane.b32.xlu1 %v8980_v13, %s3878_s0 }
 0x1be   :  { %v5112_v51 = vpop.permute.xlu0 %689  ;;  %820 = vrot.lane.b32.xlu2 %v4669_v32, %s3878_s0 }
 0x1bf   :  { %8978 = vst [vmem:[#allocation62_spill] sm:$0xff] %v5112_v51  ;;  %v5120_v34 = vpop.permute.xlu1 %691 }
 0x1c0   :  { %v5116_v35 = vpop.permute.xlu2 %717  ;;  %8981 = vst [vmem:[#allocation69_spill] sm:$0xff] %v5120_v34 }
 0x1c1   :  { %8979 = vst [vmem:[#allocation167_spill] sm:$0xff] %v5116_v35  ;;  %v8986_v35 = vld [vmem:[#allocation72_spill] sm:$0xff] }
 0x1c4   :  { %816 = vrot.lane.b32.xlu0 %v8982_v10, %s3878_s0 }
 0x1c5   :  { %818 = vrot.lane.b32.xlu1 %v4651_v50, %s3878_s0 }
 0x1c6   :  { %v5124_v0 = vpop.permute.xlu0 %695  ;;  %826 = vrot.lane.b32.xlu2 %v4695_v28, %s3878_s0 }
 0x1c7   :  { %8983 = vst [vmem:[#allocation168_spill] sm:$0xff] %v5124_v0  ;;  %v5132_v51 = vpop.permute.xlu1 %697  ;;  %v8989_v0 = vld [vmem:[#allocation80_spill] sm:$0xff] }
 0x1c8   :  { %v5128_v9 = vpop.permute.xlu2 %723  ;;  %8985 = vst [vmem:[#allocation170_spill] sm:$0xff] %v5132_v51 }
 0x1c9   :  { %8984 = vst [vmem:[#allocation169_spill] sm:$0xff] %v5128_v9  ;;  %v8991_v9 = vld [vmem:[#allocation77_spill] sm:$0xff] }
 0x1cc   :  { %822 = vrot.lane.b32.xlu0 %v8986_v35, %s3878_s0 }
 0x1cd   :  { %824 = vrot.lane.b32.xlu1 %v8989_v0, %s3878_s0 }
 0x1ce   :  { %v5136_v32 = vpop.permute.xlu0 %701  ;;  %832 = vrot.lane.b32.xlu2 %v4720_v61, %s3878_s0 }
 0x1cf   :  { %8987 = vst [vmem:[#allocation72_spill] sm:$0xff] %v5136_v32  ;;  %v5144_v28 = vpop.permute.xlu1 %703 }
 0x1d0   :  { %v5140_v34 = vpop.permute.xlu2 %729  ;;  %8990 = vst [vmem:[#allocation80_spill] sm:$0xff] %v5144_v28  ;;  %v786_v28 = vrot.slane %v4871_v58, 2 }
 0x1d1   :  { %8988 = vst [vmem:[#allocation171_spill] sm:$0xff] %v5140_v34  ;;  %v8995_v34 = vld [vmem:[#allocation83_spill] sm:$0xff] }
 0x1d4   :  { %828 = vrot.lane.b32.xlu0 %v8991_v9, %s3878_s0 }
 0x1d5   :  { %830 = vrot.lane.b32.xlu1 %v4702_v23, %s3878_s0 }
 0x1d6   :  { %v5148_v10 = vpop.permute.xlu0 %707  ;;  %838 = vrot.lane.b32.xlu2 %v4746_v48, %s3878_s0 }
 0x1d7   :  { %8992 = vst [vmem:[#allocation77_spill] sm:$0xff] %v5148_v10  ;;  %v5156_v32 = vpop.permute.xlu1 %709  ;;  %v785_v10 = vrot.slane %v4869_v17, 2 }
 0x1d8   :  { %v5152_v51 = vpop.permute.xlu2 %735  ;;  %8994 = vst [vmem:[#allocation173_spill] sm:$0xff] %v5156_v32  ;;  %v8999_v32 = vld [vmem:[#allocation88_spill] sm:$0xff] }
 0x1d9   :  { %8993 = vst [vmem:[#allocation172_spill] sm:$0xff] %v5152_v51 }
 0x1dc   :  { %834 = vrot.lane.b32.xlu0 %v8995_v34, %s3878_s0  ;;  %v5175_v34 = vsel %vm408_vm4, %v785_v10, %v786_v28 }
 0x1dd   :  { %836 = vrot.lane.b32.xlu1 %v4727_v55, %s3878_s0 }
 0x1de   :  { %v5160_v61 = vpop.permute.xlu0 %713  ;;  %844 = vrot.lane.b32.xlu2 %v4766_v40, %s3878_s0 }
 0x1df   :  { %8996 = vst [vmem:[#allocation174_spill] sm:$0xff] %v5160_v61  ;;  %v5170_v51 = vpop.permute.xlu1 %715 }
 0x1e0   :  { %v5166_v48 = vpop.permute.xlu2 %741  ;;  %8998 = vst [vmem:[#allocation176_spill] sm:$0xff] %v5170_v51  ;;  %v788_v51 = vrot.slane %v5001_v27, 2 }
 0x1e1   :  { %8997 = vst [vmem:[#allocation175_spill] sm:$0xff] %v5166_v48 }
 0x1e2   :  { %v5195_v10 = vsel %vm408_vm4, %v786_v28, %v788_v51 }
 0x1e4   :  { %840 = vrot.lane.b32.xlu0 %v8999_v32, %s3878_s0 }
 0x1e5   :  { %842 = vrot.lane.b32.xlu1 %v4751_v37, %s3878_s0 }
 0x1e6   :  { %v5177_v61 = vpop.permute.xlu0 %719  ;;  %850 = vrot.lane.b32.xlu2 %v5175_v34, %s3878_s0 }
 0x1e7   :  { %9000 = vst [vmem:[#allocation177_spill] sm:$0xff] %v5177_v61  ;;  %v5185_v48 = vpop.permute.xlu1 %721 }
 0x1e8   :  { %v5181_v40 = vpop.permute.xlu2 %747 }
 0x1e9   :  { %9001 = vst [vmem:[#allocation178_spill] sm:$0xff] %v5181_v40 }
 0x1ec   :  { %846 = vrot.lane.b32.xlu0 %v4739_v24, %s3878_s0 }
 0x1ed   :  { %848 = vrot.lane.b32.xlu1 %v4771_v14, %s3878_s0 }
 0x1ee   :  { %v5190_v32 = vpop.permute.xlu0 %725  ;;  %890 = vrot.lane.b32.xlu2 %v3930_v5, %s3879_s13 }
 0x1ef   :  { %9002 = vst [vmem:[#allocation179_spill] sm:$0xff] %v5190_v32  ;;  %v5201_v61 = vpop.permute.xlu1 %727 }
 0x1f0   :  { %v5197_v40 = vpop.permute.xlu2 %790  ;;  %9003 = vst [vmem:[#allocation180_spill] sm:$0xff] %v5201_v61 }
 0x1f4   :  { %852 = vrot.lane.b32.xlu0 %v5195_v10, %s3878_s0 }
 0x1f5   :  { %888 = vrot.lane.b32.xlu1 %v3926_v4, %s3879_s13 }
 0x1f6   :  { %v5205_v27 = vpop.permute.xlu0 %731  ;;  %896 = vrot.lane.b32.xlu2 %v4083_v38, %s3879_s13 }
 0x1f7   :  { %9004 = vst [vmem:[#allocation181_spill] sm:$0xff] %v5205_v27  ;;  %v5213_v28 = vpop.permute.xlu1 %733 }
 0x1f8   :  { %v5209_v32 = vpop.permute.xlu2 %796  ;;  %9005 = vst [vmem:[#allocation182_spill] sm:$0xff] %v5213_v28 }
 0x1fc   :  { %892 = vrot.lane.b32.xlu0 %v4103_v46, %s3879_s13 }
 0x1fd   :  { %894 = vrot.lane.b32.xlu1 %v4110_v49, %s3879_s13 }
 0x1fe   :  { %v5217_v51 = vpop.permute.xlu0 %737  ;;  %902 = vrot.lane.b32.xlu2 %v4143_v60, %s3879_s13 }
 0x1ff   :  { %9006 = vst [vmem:[#allocation183_spill] sm:$0xff] %v5217_v51  ;;  %v5225_v27 = vpop.permute.xlu1 %739 }
 0x200   :  { %v5221_v61 = vpop.permute.xlu2 %802  ;;  %9007 = vst [vmem:[#allocation184_spill] sm:$0xff] %v5225_v27 }
 0x204   :  { %898 = vrot.lane.b32.xlu0 %v4093_v42, %s3879_s13 }
 0x205   :  { %900 = vrot.lane.b32.xlu1 %v4156_v1, %s3879_s13 }
 0x206   :  { %v5229_v38 = vpop.permute.xlu0 %743  ;;  %908 = vrot.lane.b32.xlu2 %v4176_v15, %s3879_s13 }
 0x207   :  { %9008 = vst [vmem:[#allocation185_spill] sm:$0xff] %v5229_v38  ;;  %v5237_v51 = vpop.permute.xlu1 %745 }
 0x208   :  { %v5233_v28 = vpop.permute.xlu2 %808  ;;  %9010 = vst [vmem:[#allocation187_spill] sm:$0xff] %v5237_v51 }
 0x209   :  { %9009 = vst [vmem:[#allocation186_spill] sm:$0xff] %v5233_v28 }
 0x20c   :  { %904 = vrot.lane.b32.xlu0 %v4214_v30, %s3879_s13 }
 0x20d   :  { %906 = vrot.lane.b32.xlu1 %v4221_v36, %s3879_s13 }
 0x20e   :  { %v5241_v60 = vpop.permute.xlu0 %749  ;;  %914 = vrot.lane.b32.xlu2 %v4246_v47, %s3879_s13 }
 0x20f   :  { %9011 = vst [vmem:[#allocation188_spill] sm:$0xff] %v5241_v60  ;;  %v5249_v38 = vpop.permute.xlu1 %751 }
 0x210   :  { %v5245_v27 = vpop.permute.xlu2 %814  ;;  %9013 = vst [vmem:[#allocation190_spill] sm:$0xff] %v5249_v38 }
 0x211   :  { %9012 = vst [vmem:[#allocation189_spill] sm:$0xff] %v5245_v27 }
 0x214   :  { %910 = vrot.lane.b32.xlu0 %v4191_v20, %s3879_s13 }
 0x215   :  { %912 = vrot.lane.b32.xlu1 %v4251_v52, %s3879_s13 }
 0x216   :  { %v5253_v15 = vpop.permute.xlu0 %792  ;;  %920 = vrot.lane.b32.xlu2 %v4274_v3, %s3879_s13 }
 0x217   :  { %v5261_v60 = vpop.permute.xlu1 %794 }
 0x218   :  { %v5257_v51 = vpop.permute.xlu2 %820 }
 0x219   :  { %9014 = vst [vmem:[#allocation191_spill] sm:$0xff] %v5257_v51 }
 0x21c   :  { %916 = vrot.lane.b32.xlu0 %v4329_v44, %s3879_s13 }
 0x21d   :  { %918 = vrot.lane.b32.xlu1 %v4318_v39, %s3879_s13  ;;  %v5679_v39 = vld [vmem:[#allocation2 + $0x40] sm:$0x3] }
 0x21e   :  { %v5265_v36 = vpop.permute.xlu0 %798  ;;  %926 = vrot.lane.b32.xlu2 %v4345_v7, %s3879_s13 }
 0x21f   :  { %v5273_v20 = vpop.permute.xlu1 %800 }
 0x220   :  { %v5269_v38 = vpop.permute.xlu2 %826 }
 0x224   :  { %922 = vrot.lane.b32.xlu0 %v4276_v6, %s3879_s13 }
 0x225   :  { %924 = vrot.lane.b32.xlu1 %v4355_v18, %s3879_s13 }
 0x226   :  { %v5277_v51 = vpop.permute.xlu0 %804  ;;  %932 = vrot.lane.b32.xlu2 %v4373_v57, %s3879_s13 }
 0x227   :  { %v5285_v7 = vpop.permute.xlu1 %806 }
 0x228   :  { %v5281_v27 = vpop.permute.xlu2 %832 }
 0x229   :  { %9015 = vst [vmem:[#allocation192_spill] sm:$0xff] %v5281_v27  ;;  %v9029_v27 = vld [vmem:[#allocation24_spill] sm:$0xff] }
 0x22c   :  { %928 = vrot.lane.b32.xlu0 %v4411_v62, %s3879_s13 }
 0x22d   :  { %930 = vrot.lane.b32.xlu1 %v4403_v26, %s3879_s13  ;;  %v5313_v26 = vld [vmem:[#allocation2 + $0x1a0] sm:$0xff] }
 0x22e   :  { %v5289_v30 = vpop.permute.xlu0 %810  ;;  %938 = vrot.lane.b32.xlu2 %v4433_v63, %s3879_s13  ;;  %v986_v1 = vrot.slane %v5313_v26, 1 }
 0x22f   :  { %9016 = vst [vmem:[#allocation193_spill] sm:$0xff] %v5289_v30  ;;  %v5297_v57 = vpop.permute.xlu1 %812  ;;  %v9048_v30 = vld [vmem:[#allocation48_spill] sm:$0xff] }
 0x230   :  { %v5293_v6 = vpop.permute.xlu2 %838  ;;  %9018 = vst [vmem:[#allocation195_spill] sm:$0xff] %v5297_v57  ;;  %v9032_v57 = vld [vmem:[#allocation23_spill] sm:$0xff] }
 0x231   :  { %9017 = vst [vmem:[#allocation194_spill] sm:$0xff] %v5293_v6 }
 0x234   :  { %934 = vrot.lane.b32.xlu0 %v4375_v2, %s3879_s13 }
 0x235   :  { %936 = vrot.lane.b32.xlu1 %v4446_v45, %s3879_s13 }
 0x236   :  { %v5301_v18 = vpop.permute.xlu0 %816  ;;  %944 = vrot.lane.b32.xlu2 %v4869_v17, %s3879_s13 }
 0x237   :  { %9019 = vst [vmem:[#allocation196_spill] sm:$0xff] %v5301_v18  ;;  %v5309_v63 = vpop.permute.xlu1 %818 }
 0x238   :  { %v5305_v62 = vpop.permute.xlu2 %844  ;;  %9021 = vst [vmem:[#allocation198_spill] sm:$0xff] %v5309_v63  ;;  %v9027_v63 = vld [vmem:[#allocation17_spill] sm:$0xff] }
 0x239   :  { %9020 = vst [vmem:[#allocation197_spill] sm:$0xff] %v5305_v62 }
 0x23c   :  { %940 = vrot.lane.b32.xlu0 %v4463_v54, %s3879_s13  ;;  %v5329_v54 = vld [vmem:[#allocation2 + $0x198] sm:$0xff] }
 0x23d   :  { %942 = vrot.lane.b32.xlu1 %v4451_v53, %s3879_s13 }
 0x23e   :  { %v5315_v6 = vpop.permute.xlu0 %822  ;;  %950 = vrot.lane.b32.xlu2 %v5313_v26, %s3879_s13 }
 0x23f   :  { %v5323_v17 = vpop.permute.xlu1 %824 }
 0x240   :  { %v5319_v2 = vpop.permute.xlu2 %850 }
 0x241   :  { %9022 = vst [vmem:[#allocation199_spill] sm:$0xff] %v5319_v2 }
 0x244   :  { %946 = vrot.lane.b32.xlu0 %v4871_v58, %s3879_s13 }
 0x245   :  { %948 = vrot.lane.b32.xlu1 %v5329_v54, %s3879_s13 }
 0x246   :  { %v5327_v45 = vpop.permute.xlu0 %828  ;;  %994 = vrot.lane.b32.xlu2 %v8915_v12, %s3880_s14 }
 0x247   :  { %9023 = vst [vmem:[#allocation200_spill] sm:$0xff] %v5327_v45  ;;  %v5337_v2 = vpop.permute.xlu1 %830 }
 0x248   :  { %v5333_v62 = vpop.permute.xlu2 %890  ;;  %9024 = vst [vmem:[#allocation201_spill] sm:$0xff] %v5337_v2  ;;  %v9038_v2 = vld [vmem:[#allocation28_spill] sm:$0xff] }
 0x24c   :  { %990 = vrot.lane.b32.xlu0 %v3940_v8, %s3880_s14 }
 0x24d   :  { %992 = vrot.lane.b32.xlu1 %v8911_v29, %s3880_s14 }
 0x24e   :  { %v5341_v53 = vpop.permute.xlu0 %834  ;;  %1000 = vrot.lane.b32.xlu2 %v8921_v25, %s3880_s14 }
 0x24f   :  { %9025 = vst [vmem:[#allocation202_spill] sm:$0xff] %v5341_v53  ;;  %v5349_v12 = vpop.permute.xlu1 %836  ;;  %v9030_v53 = vld [vmem:[#allocation11_spill] sm:$0xff] }
 0x250   :  { %v5345_v58 = vpop.permute.xlu2 %896  ;;  %9026 = vst [vmem:[#allocation203_spill] sm:$0xff] %v5349_v12  ;;  %v9034_v12 = vld [vmem:[#allocation30_spill] sm:$0xff] }
 0x254   :  { %996 = vrot.lane.b32.xlu0 %v9027_v63, %s3880_s14 }
 0x255   :  { %998 = vrot.lane.b32.xlu1 %v9030_v53, %s3880_s14 }
 0x256   :  { %v5353_v18 = vpop.permute.xlu0 %840  ;;  %1006 = vrot.lane.b32.xlu2 %v9029_v27, %s3880_s14 }
 0x257   :  { %9028 = vst [vmem:[#allocation17_spill] sm:$0xff] %v5353_v18  ;;  %v5361_v25 = vpop.permute.xlu1 %842  ;;  %v9036_v18 = vld [vmem:[#allocation15_spill] sm:$0xff] }
 0x258   :  { %v5357_v8 = vpop.permute.xlu2 %902  ;;  %9031 = vst [vmem:[#allocation24_spill] sm:$0xff] %v5361_v25  ;;  %v9042_v25 = vld [vmem:[#allocation36_spill] sm:$0xff] }
 0x25c   :  { %1002 = vrot.lane.b32.xlu0 %v9032_v57, %s3880_s14 }
 0x25d   :  { %1004 = vrot.lane.b32.xlu1 %v9036_v18, %s3880_s14 }
 0x25e   :  { %v5365_v29 = vpop.permute.xlu0 %846  ;;  %1012 = vrot.lane.b32.xlu2 %v9034_v12, %s3880_s14 }
 0x25f   :  { %9033 = vst [vmem:[#allocation11_spill] sm:$0xff] %v5365_v29  ;;  %v5373_v27 = vpop.permute.xlu1 %848  ;;  %v9041_v29 = vld [vmem:[#allocation22_spill] sm:$0xff] }
 0x260   :  { %v5369_v63 = vpop.permute.xlu2 %908  ;;  %9037 = vst [vmem:[#allocation30_spill] sm:$0xff] %v5373_v27  ;;  %v9043_v27 = vld [vmem:[#allocation45_spill] sm:$0xff] }
 0x261   :  { %9035 = vst [vmem:[#allocation23_spill] sm:$0xff] %v5369_v63  ;;  %v9047_v63 = vld [vmem:[#allocation33_spill] sm:$0xff] }
 0x264   :  { %1008 = vrot.lane.b32.xlu0 %v9038_v2, %s3880_s14 }
 0x265   :  { %1010 = vrot.lane.b32.xlu1 %v9041_v29, %s3880_s14 }
 0x266   :  { %v5377_v53 = vpop.permute.xlu0 %852  ;;  %1018 = vrot.lane.b32.xlu2 %v8939_v19, %s3880_s14 }
 0x267   :  { %9039 = vst [vmem:[#allocation15_spill] sm:$0xff] %v5377_v53  ;;  %v5385_v12 = vpop.permute.xlu1 %888  ;;  %v9044_v53 = vld [vmem:[#allocation27_spill] sm:$0xff] }
 0x268   :  { %v5381_v57 = vpop.permute.xlu2 %914 }
 0x269   :  { %9040 = vst [vmem:[#allocation28_spill] sm:$0xff] %v5381_v57  ;;  %v9045_v57 = vld [vmem:[#allocation42_spill] sm:$0xff] }
 0x26c   :  { %1014 = vrot.lane.b32.xlu0 %v9042_v25, %s3880_s14 }
 0x26d   :  { %1016 = vrot.lane.b32.xlu1 %v9044_v53, %s3880_s14  ;;  %v985_v53 = vrot.slane %v5329_v54, 1 }
 0x26e   :  { %v5389_v18 = vpop.permute.xlu0 %892  ;;  %1024 = vrot.lane.b32.xlu2 %v9043_v27, %s3880_s14 }
 0x26f   :  { %v5397_v19 = vpop.permute.xlu1 %894  ;;  %v987_v3 = vsel %vm231_vm2, %v985_v53, %v986_v1  ;;  %v9058_v53 = vld [vmem:[#allocation53_spill] sm:$0xff] }
 0x270   :  { %v5393_v2 = vpop.permute.xlu2 %920 }
 0x274   :  { %1020 = vrot.lane.b32.xlu0 %v9045_v57, %s3880_s14 }
 0x275   :  { %1022 = vrot.lane.b32.xlu1 %v9047_v63, %s3880_s14  ;;  %v9051_v63 = vld [vmem:[#allocation40_spill] sm:$0xff] }
 0x276   :  { %v5401_v29 = vpop.permute.xlu0 %898  ;;  %1030 = vrot.lane.b32.xlu2 %v8949_v41, %s3880_s14 }
 0x277   :  { %v5409_v27 = vpop.permute.xlu1 %900 }
 0x278   :  { %v5405_v25 = vpop.permute.xlu2 %926 }
 0x279   :  { %9046 = vst [vmem:[#allocation22_spill] sm:$0xff] %v5405_v25 }
 0x27c   :  { %1026 = vrot.lane.b32.xlu0 %v9048_v30, %s3880_s14  ;;  %v9053_v30 = vld [vmem:[#allocation51_spill] sm:$0xff] }
 0x27d   :  { %1028 = vrot.lane.b32.xlu1 %v9051_v63, %s3880_s14 }
 0x27e   :  { %v5415_v57 = vpop.permute.xlu0 %904  ;;  %1036 = vrot.lane.b32.xlu2 %v8954_v33, %s3880_s14  ;;  %v9056_v33 = vld [vmem:[#allocation47_spill] sm:$0xff] }
 0x27f   :  { %9049 = vst [vmem:[#allocation36_spill] sm:$0xff] %v5415_v57  ;;  %v5424_v25 = vpop.permute.xlu1 %906 }
 0x280   :  { %v5419_v41 = vpop.permute.xlu2 %932  ;;  %9052 = vst [vmem:[#allocation27_spill] sm:$0xff] %v5424_v25 }
 0x281   :  { %9050 = vst [vmem:[#allocation45_spill] sm:$0xff] %v5419_v41 }
 0x284   :  { %1032 = vrot.lane.b32.xlu0 %v9053_v30, %s3880_s14 }
 0x285   :  { %1034 = vrot.lane.b32.xlu1 %v9056_v33, %s3880_s14 }
 0x286   :  { %v5428_v45 = vpop.permute.xlu0 %910  ;;  %1042 = vrot.lane.b32.xlu2 %v4521_v22, %s3880_s14 }
 0x287   :  { %9054 = vst [vmem:[#allocation42_spill] sm:$0xff] %v5428_v45  ;;  %v5436_v41 = vpop.permute.xlu1 %912  ;;  %v9061_v45 = vld [vmem:[#allocation50_spill] sm:$0xff] }
 0x288   :  { %v5432_v28 = vpop.permute.xlu2 %938  ;;  %9057 = vst [vmem:[#allocation48_spill] sm:$0xff] %v5436_v41 }
 0x289   :  { %9055 = vst [vmem:[#allocation33_spill] sm:$0xff] %v5432_v28  ;;  %v9063_v28 = vld [vmem:[#allocation56_spill] sm:$0xff] }
 0x28c   :  { %1038 = vrot.lane.b32.xlu0 %v9058_v53, %s3880_s14  ;;  %v5456_v53 = vld [vmem:[#allocation2 + $0x1a8] sm:$0x3] }
 0x28d   :  { %1040 = vrot.lane.b32.xlu1 %v9061_v45, %s3880_s14  ;;  %v988_v45 = vrot.slane %v5456_v53, 1 }
 0x28e   :  { %v5440_v63 = vpop.permute.xlu0 %916  ;;  %1048 = vrot.lane.b32.xlu2 %v5064_v56, %s3880_s14 }
 0x28f   :  { %9059 = vst [vmem:[#allocation40_spill] sm:$0xff] %v5440_v63  ;;  %v5448_v22 = vpop.permute.xlu1 %918 }
 0x290   :  { %v5444_v30 = vpop.permute.xlu2 %944  ;;  %9062 = vst [vmem:[#allocation47_spill] sm:$0xff] %v5448_v22  ;;  %v9074_v22 = vld [vmem:[#allocation59_spill] sm:$0xff] }
 0x291   :  { %9060 = vst [vmem:[#allocation51_spill] sm:$0xff] %v5444_v30  ;;  %v989_v30 = vsel %vm231_vm2, %v986_v1, %v988_v45  ;;  %v9069_v1 = vld [vmem:[#allocation57_spill] sm:$0xff]  ;;  %v9071_v45 = vld [vmem:[#allocation63_spill] sm:$0xff] }
 0x294   :  { %1044 = vrot.lane.b32.xlu0 %v9063_v28, %s3880_s14 }
 0x295   :  { %1046 = vrot.lane.b32.xlu1 %v5050_v59, %s3880_s14 }
 0x296   :  { %v5452_v33 = vpop.permute.xlu0 %922  ;;  %1091 = vrot.lane.b32.xlu2 %v4561_v16, %s3881_s15 }
 0x297   :  { %v5463_v56 = vpop.permute.xlu1 %924 }
 0x298   :  { %v5458_v63 = vpop.permute.xlu2 %950  ;;  %9065 = vst [vmem:[#allocation50_spill] sm:$0xff] %v5463_v56  ;;  %v9141_v56 = vld [vmem:[#allocation113_spill] sm:$0xff] }
 0x299   :  { %9064 = vst [vmem:[#allocation53_spill] sm:$0xff] %v5458_v63 }
 0x29c   :  { %1050 = vrot.lane.b32.xlu0 %v987_v3, %s3880_s14 }
 0x29d   :  { %1052 = vrot.lane.b32.xlu1 %v989_v30, %s3880_s14 }
 0x29e   :  { %v5466_v28 = vpop.permute.xlu0 %928  ;;  %1097 = vrot.lane.b32.xlu2 %v8970_v31, %s3881_s15 }
 0x29f   :  { %9066 = vst [vmem:[#allocation56_spill] sm:$0xff] %v5466_v28  ;;  %v5474_v63 = vpop.permute.xlu1 %930 }
 0x2a0   :  { %v5471_v16 = vpop.permute.xlu2 %994  ;;  %9067 = vst [vmem:[#allocation204_spill] sm:$0xff] %v5474_v63  ;;  %v5596_v63 = vld [vmem:[#allocation2 + $0x8] sm:$0xff] }
 0x2a4   :  { %1093 = vrot.lane.b32.xlu0 %v4573_v43, %s3881_s15 }
 0x2a5   :  { %1095 = vrot.lane.b32.xlu1 %v9069_v1, %s3881_s15 }
 0x2a6   :  { %v5478_v59 = vpop.permute.xlu0 %934  ;;  %1103 = vrot.lane.b32.xlu2 %v8975_v21, %s3881_s15 }
 0x2a7   :  { %9068 = vst [vmem:[#allocation205_spill] sm:$0xff] %v5478_v59  ;;  %v5486_v31 = vpop.permute.xlu1 %936  ;;  %v9076_v59 = vld [vmem:[#allocation68_spill] sm:$0xff] }
 0x2a8   :  { %v5482_v3 = vpop.permute.xlu2 %1000  ;;  %9070 = vst [vmem:[#allocation57_spill] sm:$0xff] %v5486_v31 }
 0x2ac   :  { %1099 = vrot.lane.b32.xlu0 %v9071_v45, %s3881_s15 }
 0x2ad   :  { %1101 = vrot.lane.b32.xlu1 %v9074_v22, %s3881_s15 }
 0x2ae   :  { %v5490_v30 = vpop.permute.xlu0 %940  ;;  %1109 = vrot.lane.b32.xlu2 %v8980_v13, %s3881_s15 }
 0x2af   :  { %9072 = vst [vmem:[#allocation63_spill] sm:$0xff] %v5490_v30  ;;  %v5498_v21 = vpop.permute.xlu1 %942  ;;  %v9080_v30 = vld [vmem:[#allocation74_spill] sm:$0xff] }
 0x2b0   :  { %v5494_v43 = vpop.permute.xlu2 %1006  ;;  %9075 = vst [vmem:[#allocation59_spill] sm:$0xff] %v5498_v21  ;;  %v9083_v21 = vld [vmem:[#allocation79_spill] sm:$0xff] }
 0x2b1   :  { %9073 = vst [vmem:[#allocation206_spill] sm:$0xff] %v5494_v43 }
 0x2b4   :  { %1105 = vrot.lane.b32.xlu0 %v9076_v59, %s3881_s15 }
 0x2b5   :  { %1107 = vrot.lane.b32.xlu1 %v8977_v11, %s3881_s15 }
 0x2b6   :  { %v5502_v1 = vpop.permute.xlu0 %946  ;;  %1115 = vrot.lane.b32.xlu2 %v4651_v50, %s3881_s15 }
 0x2b7   :  { %9077 = vst [vmem:[#allocation68_spill] sm:$0xff] %v5502_v1  ;;  %v5510_v13 = vpop.permute.xlu1 %948  ;;  %v9082_v1 = vld [vmem:[#allocation67_spill] sm:$0xff] }
 0x2b8   :  { %v5506_v45 = vpop.permute.xlu2 %1012  ;;  %9079 = vst [vmem:[#allocation208_spill] sm:$0xff] %v5510_v13  ;;  %v9084_v13 = vld [vmem:[#allocation85_spill] sm:$0xff] }
 0x2b9   :  { %9078 = vst [vmem:[#allocation207_spill] sm:$0xff] %v5506_v45  ;;  %v9091_v45 = vld [vmem:[#allocation94_spill] sm:$0xff] }
 0x2bc   :  { %1111 = vrot.lane.b32.xlu0 %v9080_v30, %s3881_s15 }
 0x2bd   :  { %1113 = vrot.lane.b32.xlu1 %v9082_v1, %s3881_s15  ;;  %v1086_v1 = vrot.slane %v5329_v54, 2  ;;  %v9086_v54 = vld [vmem:[#allocation90_spill] sm:$0xff] }
 0x2be   :  { %v5514_v22 = vpop.permute.xlu0 %990  ;;  %1121 = vrot.lane.b32.xlu2 %v8989_v0, %s3881_s15 }
 0x2bf   :  { %v5522_v50 = vpop.permute.xlu1 %992 }
 0x2c0   :  { %v5518_v59 = vpop.permute.xlu2 %1018 }
 0x2c1   :  { %9081 = vst [vmem:[#allocation74_spill] sm:$0xff] %v5518_v59  ;;  %v8655_v59 = vrot.slane %v5313_v26, 2 }
 0x2c4   :  { %1117 = vrot.lane.b32.xlu0 %v9083_v21, %s3881_s15 }
 0x2c5   :  { %1119 = vrot.lane.b32.xlu1 %v8986_v35, %s3881_s15  ;;  %v1088_v35 = vsel %vm408_vm4, %v1086_v1, %v8655_v59  ;;  %v9089_v59 = vld [vmem:[#allocation83_spill] sm:$0xff] }
 0x2c6   :  { %v5526_v11 = vpop.permute.xlu0 %996  ;;  %1127 = vrot.lane.b32.xlu2 %v4702_v23, %s3881_s15 }
 0x2c7   :  { %v5534_v0 = vpop.permute.xlu1 %998 }
 0x2c8   :  { %v5530_v30 = vpop.permute.xlu2 %1024 }
 0x2cc   :  { %1123 = vrot.lane.b32.xlu0 %v9084_v13, %s3881_s15  ;;  %v1454_v13 = vld [vmem:[%s8548_s1 + $0x20] sm:$0xf] }
 0x2cd   :  { %1125 = vrot.lane.b32.xlu1 %v8991_v9, %s3881_s15  ;;  %3696 = vmatpush.msk.msra.mxu0 %vm1552_vm5, %v1454_v13  ;;  %v1452_v9 = vld [vmem:[%s8548_s1 + $0x10] sm:$0xff] }
 0x2ce   :  { %v5540_v21 = vpop.permute.xlu0 %1002  ;;  %1133 = vrot.lane.b32.xlu2 %v4727_v55, %s3881_s15  ;;  %v1453_v55 = vld [vmem:[%s8548_s1 + $0x18] sm:$0xff]  ;;  %3762 = vmatpush.msk.msra.mxu2 %vm1552_vm5, %v1454_v13  ;;  %v1451_v13 = vld [vmem:[%s8548_s1 + $0x8] sm:$0xff] }
 0x2cf   :  { %v5551_v31 = vpop.permute.xlu1 %1004  ;;  %1568 = vmatpush.msra.mxu0 %v1453_v55 }
 0x2d0   :  { %v5544_v23 = vpop.permute.xlu2 %1030  ;;  %3763 = vmatpush.msra.mxu2 %v1453_v55 }
 0x2d1   :  { %9085 = vst [vmem:[#allocation67_spill] sm:$0xff] %v5544_v23  ;;  %1569 = vmatpush.msra.mxu0 %v1452_v9 }
 0x2d2   :  { %3764 = vmatpush.msra.mxu2 %v1452_v9  ;;  %v9094_v9 = vld [vmem:[#allocation88_spill] sm:$0xff] }
 0x2d3   :  { %1570 = vmatpush.msra.mxu0 %v1451_v13 }
 0x2d4   :  { %1129 = vrot.lane.b32.xlu0 %v9086_v54, %s3881_s15  ;;  %3765 = vmatpush.msra.mxu2 %v1451_v13  ;;  %v5598_v13 = vld [vmem:[#allocation2 + $0x10] sm:$0x3] }
 0x2d5   :  { %1131 = vrot.lane.b32.xlu1 %v9089_v59, %s3881_s15 }
 0x2d6   :  { %v5563_v1 = vpop.permute.xlu0 %1008  ;;  %1139 = vrot.lane.b32.xlu2 %v4751_v37, %s3881_s15  ;;  %v1450_v37 = vld [vmem:[%s8548_s1] sm:$0xff] }
 0x2d7   :  { %9087 = vst [vmem:[#allocation79_spill] sm:$0xff] %v5563_v1  ;;  %v5577_v41 = vpop.permute.xlu1 %1010  ;;  %1571 = vmatpush.msra.mxu0 %v1450_v37  ;;  %3766 = vmatpush.msra.mxu2 %v1450_v37  ;;  %v2042_v37 = vrot.slane %v5598_v13, 1  ;;  %v5623_v1 = vld [vmem:[#allocation2 + $0x30] sm:$0xff] }
 0x2d8   :  { %v5570_v54 = vpop.permute.xlu2 %1036  ;;  %9090 = vst [vmem:[#allocation90_spill] sm:$0xff] %v5577_v41 }
 0x2d9   :  { %9088 = vst [vmem:[#allocation85_spill] sm:$0xff] %v5570_v54 }
 0x2dc   :  { %1135 = vrot.lane.b32.xlu0 %v9091_v45, %s3881_s15  ;;  %v9096_v45 = vld [vmem:[#allocation98_spill] sm:$0xff] }
 0x2dd   :  { %1137 = vrot.lane.b32.xlu1 %v9094_v9, %s3881_s15  ;;  %v3782_v9 = vld [vmem:[#allocation2] sm:$0xff] }
 0x2de   :  { %v5584_v55 = vpop.permute.xlu0 %1014  ;;  %1145 = vrot.lane.b32.xlu2 %v4771_v14, %s3881_s15  ;;  %v2040_v14 = vrot.slane %v5596_v63, 1 }
 0x2df   :  { %9092 = vst [vmem:[#allocation83_spill] sm:$0xff] %v5584_v55  ;;  %v5592_v54 = vpop.permute.xlu1 %1016 }
 0x2e0   :  { %v5588_v59 = vpop.permute.xlu2 %1042  ;;  %9095 = vst [vmem:[#allocation88_spill] sm:$0xff] %v5592_v54  ;;  %v9099_v54 = vld [vmem:[#allocation66_spill] sm:$0xff] }
 0x2e1   :  { %9093 = vst [vmem:[#allocation94_spill] sm:$0xff] %v5588_v59  ;;  %v1187_v55 = vsel %vm18_vm0, %v3782_v9, %v9099_v54  ;;  %v9102_v54 = vld [vmem:[#allocation62_spill] sm:$0xff] }
 0x2e2   :  { %9103 = vst [vmem:[#allocation66_spill] sm:$0xff] %v5623_v1 }
 0x2e4   :  { %1141 = vrot.lane.b32.xlu0 %v9096_v45, %s3881_s15  ;;  %v9100_v45 = vld [vmem:[#allocation99_spill] sm:$0xff] }
 0x2e5   :  { %1143 = vrot.lane.b32.xlu1 %v4739_v24, %s3881_s15  ;;  %v1220_v41 = vsel %vm1219_vm6, %v1187_v55, %v9100_v45  ;;  %v1089_v24 = vrot.slane %v5456_v53, 2  ;;  %v5625_v55 = vld [vmem:[#allocation2 + $0x38] sm:$0xff]  ;;  %v2049_v53 = vrot.slane %v5623_v1, 1 }
 0x2e6   :  { %v5600_v23 = vpop.permute.xlu0 %1020  ;;  %1151 = vrot.lane.b32.xlu2 %v1088_v35, %s3881_s15  ;;  %v9101_v35 = vld [vmem:[#allocation142_spill] sm:$0xff] }
 0x2e7   :  { %9097 = vst [vmem:[#allocation98_spill] sm:$0xff] %v5600_v23  ;;  %v1253_v23 = vsel %vm1252_vm7, %v1220_v41, %v9101_v35  ;;  %v5615_v28 = vpop.permute.xlu1 %1022  ;;  %v9105_v35 = vrot.slane %v5313_v26, 2 }
 0x2e8   :  { %v5605_v59 = vpop.permute.xlu2 %1048  ;;  %v1286_v9 = vsel %vm1285_vm9, %v1253_v23, %v9102_v54  ;;  %v5634_v23 = vld [vmem:[#allocation2] sm:$0xff] }
 0x2e9   :  { %9098 = vst [vmem:[#allocation209_spill] sm:$0xff] %v5605_v59  ;;  %v2043_v59 = vsel %vm231_vm2, %v2040_v14, %v2042_v37  ;;  %v1319_v41 = vsel %vm1318_vm8, %v1286_v9, %v5197_v40  ;;  %v2050_v37 = vrot.slane %v5625_v55, 1  ;;  %v1090_v54 = vsel %vm408_vm4, %v9105_v35, %v1089_v24  ;;  %v5660_v24 = vld [vmem:[#allocation2 + $0x50] sm:$0xff] }
 0x2ea   :  { %v2039_v25 = vrot.slane %v5634_v23, 1  ;;  %9108 = vst [vmem:[#allocation210_spill] sm:$0xff] %v5660_v24 }
 0x2eb   :  { %v5656_v26 = vsel %vm231_vm2, %v2049_v53, %v2050_v37  ;;  %v2055_v53 = vrot.slane %v5660_v24, 1 }
 0x2ec   :  { %1147 = vrot.lane.b32.xlu0 %v5175_v34, %s3881_s15  ;;  %v1352_v34 = vsel %vm1351_vm10, %v1319_v41, %v5385_v12  ;;  %v5648_v41 = vld [vmem:[#allocation2 + $0x18] sm:$0xff]  ;;  %9107 = vst [vmem:[#allocation62_spill] sm:$0xff] %v5656_v26  ;;  %v2041_v35 = vsel %vm231_vm2, %v2039_v25, %v2040_v14 }
 0x2ed   :  { %v1385_v40 = vsel %vm1384_vm12, %v1352_v34, %v5514_v22  ;;  %1149 = vrot.lane.b32.xlu1 %v5195_v10, %s3881_s15  ;;  %v2044_v10 = vrot.slane %v5648_v41, 1  ;;  %v5662_v34 = vld [vmem:[#allocation2 + $0x58] sm:$0x3] }
 0x2ee   :  { %v5629_v45 = vpop.permute.xlu0 %1026  ;;  %2121 = vrot.lane.b32.xlu2 %v2043_v59, %s3874_s18  ;;  %v5646_v59 = vld [vmem:[#allocation2 + $0x20] sm:$0xff]  ;;  %9109 = vst [vmem:[#allocation211_spill] sm:$0xff] %v5662_v34 }
 0x2ef   :  { %9104 = vst [vmem:[#allocation99_spill] sm:$0xff] %v5629_v45  ;;  %v5652_v1 = vpop.permute.xlu1 %1028  ;;  %v2045_v22 = vrot.slane %v5646_v59, 1 }
 0x2f0   :  { %v1092_v9 = vpop.permute.xlu2 %1091  ;;  %9106 = vst [vmem:[#allocation142_spill] sm:$0xff] %v5652_v1 }
 0x2f1   :  { %v1418_v12 = vsel %vm1417_vm11, %v1385_v40, %v1092_v9  ;;  %v5669_v9 = vld [vmem:[#allocation2 + $0x28] sm:$0x3] }
 0x2f2   :  { %3697 = vmatmul.msk.f32.vlgmr.msra.gmra.mxu0 %vm1455_vm13, %v1418_v12  ;;  %9111 = vst [vmem:[#allocation213_spill] sm:$0xff] %v5669_v9  ;;  %v5674_v12 = vsel %vm231_vm2, %v2044_v10, %v2045_v22  ;;  %v2047_v25 = vrot.slane %v5669_v9, 1  ;;  %v5690_v10 = vld [vmem:[#allocation2 + $0x78] sm:$0xff] }
 0x2f3   :  { %9112 = vst [vmem:[#allocation214_spill] sm:$0xff] %v5674_v12 }
 0x2f4   :  { %1153 = vrot.lane.b32.xlu0 %v1090_v54, %s3881_s15  ;;  %v2057_v54 = vrot.slane %v5662_v34, 1  ;;  %9115 = vst [vmem:[#allocation217_spill] sm:$0xff] %v5690_v10  ;;  %v5692_v34 = vld [vmem:[#allocation2 + $0x80] sm:$0xff] }
 0x2f5   :  { %2119 = vrot.lane.b32.xlu1 %v2041_v35, %s3874_s18  ;;  %9116 = vst [vmem:[#allocation218_spill] sm:$0xff] %v5692_v34  ;;  %v5697_v35 = vsel %vm231_vm2, %v2045_v22, %v2047_v25  ;;  %v5714_v22 = vld [vmem:[#allocation2 + $0x60] sm:$0xff] }
 0x2f6   :  { %v5664_v40 = vpop.permute.xlu0 %1032  ;;  %2127 = vrot.lane.b32.xlu2 %v5656_v26, %s3874_s18  ;;  %v5687_v26 = vsel %vm231_vm2, %v2055_v53, %v2057_v54  ;;  %9118 = vst [vmem:[#allocation220_spill] sm:$0xff] %v5697_v35  ;;  %v2065_v54 = vrot.slane %v5692_v34, 1  ;;  %v5726_v34 = vld [vmem:[#allocation2 + $0x98] sm:$0xff] }
 0x2f7   :  { %9110 = vst [vmem:[#allocation212_spill] sm:$0xff] %v5664_v40  ;;  %v5682_v14 = vpop.permute.xlu1 %1034  ;;  %v2052_v40 = vrot.slane %v5679_v39, 1 }
 0x2f8   :  { %v5676_v1 = vpop.permute.xlu2 %1097  ;;  %9113 = vst [vmem:[#allocation215_spill] sm:$0xff] %v5682_v14  ;;  %v5701_v14 = vld [vmem:[#allocation2 + $0x48] sm:$0xff] }
 0x2f9   :  { %9114 = vst [vmem:[#allocation216_spill] sm:$0xff] %v5687_v26  ;;  %v5706_v42 = vsel %vm231_vm2, %v2050_v37, %v2052_v40  ;;  %v2054_v25 = vrot.slane %v5701_v14, 1  ;;  %v2059_v40 = vrot.slane %v5714_v22, 1 }
 0x2fa   :  { %9119 = vst [vmem:[#allocation221_spill] sm:$0xff] %v5701_v14 }
 0x2fb   :  { %9120 = vst [vmem:[#allocation222_spill] sm:$0xff] %v5706_v42  ;;  %v5733_v14 = vsel %vm231_vm2, %v2054_v25, %v2055_v53 }
 0x2fc   :  { %2123 = vrot.lane.b32.xlu0 %v5674_v12, %s3874_s18  ;;  %v2064_v12 = vrot.slane %v5690_v10, 1  ;;  %9122 = vst [vmem:[#allocation224_spill] sm:$0xff] %v5714_v22 }
 0x2fd   :  { %2125 = vrot.lane.b32.xlu1 %v5697_v35, %s3874_s18  ;;  %9125 = vst [vmem:[#allocation227_spill] sm:$0xff] %v5726_v34  ;;  %v5728_v35 = vld [vmem:[#allocation2 + $0xa0] sm:$0x3] }
 0x2fe   :  { %v5694_v24 = vpop.permute.xlu0 %1038  ;;  %2133 = vrot.lane.b32.xlu2 %v5687_v26, %s3874_s18  ;;  %v5722_v10 = vsel %vm231_vm2, %v2064_v12, %v2065_v54  ;;  %9126 = vst [vmem:[#allocation228_spill] sm:$0xff] %v5728_v35  ;;  %v2070_v12 = vrot.slane %v5726_v34, 1  ;;  %v5761_v34 = vld [vmem:[#allocation2 + $0xc8] sm:$0xff] }
 0x2ff   :  { %9117 = vst [vmem:[#allocation219_spill] sm:$0xff] %v5694_v24  ;;  %v5712_v24 = vld [vmem:[#allocation2 + $0x68] sm:$0xff]  ;;  %v5717_v26 = vpop.permute.xlu1 %1040  ;;  %v2080_v9 = vrot.slane %v5761_v34, 1 }
 0x300   :  { %v5708_v45 = vpop.permute.xlu2 %1103  ;;  %9121 = vst [vmem:[#allocation223_spill] sm:$0xff] %v5712_v24  ;;  %v2060_v37 = vrot.slane %v5712_v24, 1 }
 0x301   :  { %9123 = vst [vmem:[#allocation225_spill] sm:$0xff] %v5717_v26  ;;  %v2072_v26 = vrot.slane %v5728_v35, 1  ;;  %v5759_v35 = vld [vmem:[#allocation2 + $0xc0] sm:$0xff] }
 0x302   :  { %9124 = vst [vmem:[#allocation226_spill] sm:$0xff] %v5722_v10  ;;  %v5742_v24 = vsel %vm231_vm2, %v2059_v40, %v2060_v37 }
 0x303   :  { %9128 = vst [vmem:[#allocation230_spill] sm:$0xff] %v5733_v14 }
 0x304   :  { %2129 = vrot.lane.b32.xlu0 %v5706_v42, %s3874_s18  ;;  %v5737_v42 = vld [vmem:[#allocation2 + $0x70] sm:$0x3]  ;;  %9130 = vst [vmem:[#allocation232_spill] sm:$0xff] %v5742_v24 }
 0x305   :  { %9129 = vst [vmem:[#allocation231_spill] sm:$0xff] %v5737_v42  ;;  %2131 = vrot.lane.b32.xlu1 %v5733_v14, %s3874_s18  ;;  %v2062_v53 = vrot.slane %v5737_v42, 1  ;;  %v9139_v42 = vld [vmem:[#allocation73_spill] sm:$0xff] }
 0x306   :  { %v5730_v43 = vpop.permute.xlu0 %1044  ;;  %2139 = vrot.lane.b32.xlu2 %v5722_v10, %s3874_s18  ;;  %v5756_v10 = vsel %vm231_vm2, %v2070_v12, %v2072_v26  ;;  %9135 = vst [vmem:[#allocation237_spill] sm:$0xff] %v5759_v35  ;;  %v5772_v26 = vld [vmem:[#allocation2 + $0x90] sm:$0xff] }
 0x307   :  { %9127 = vst [vmem:[#allocation229_spill] sm:$0xff] %v5730_v43  ;;  %v5748_v43 = vld [vmem:[#allocation2 + $0x88] sm:$0x3]  ;;  %v5751_v25 = vpop.permute.xlu1 %1046  ;;  %v5766_v14 = vsel %vm231_vm2, %v2060_v37, %v2062_v53 }
 0x308   :  { %v5744_v22 = vpop.permute.xlu2 %1109  ;;  %9132 = vst [vmem:[#allocation234_spill] sm:$0xff] %v5748_v43  ;;  %v2067_v40 = vrot.slane %v5748_v43, 1  ;;  %v2079_v43 = vrot.slane %v5759_v35, 1  ;;  %v9144_v53 = vld [vmem:[#allocation132_spill] sm:$0xff]  ;;  %v9145_v35 = vld [vmem:[#allocation69_spill] sm:$0xff] }
 0x309   :  { %9131 = vst [vmem:[#allocation233_spill] sm:$0xff] %v5744_v22 }
 0x30a   :  { %9133 = vst [vmem:[#allocation235_spill] sm:$0xff] %v5751_v25  ;;  %v3783_v25 = vld [vmem:[#allocation2 + $0x8] sm:$0xff] }
 0x30b   :  { %9134 = vst [vmem:[#allocation236_spill] sm:$0xff] %v5756_v10 }
 0x30c   :  { %2135 = vrot.lane.b32.xlu0 %v5742_v24, %s3874_s18  ;;  %9136 = vst [vmem:[#allocation238_spill] sm:$0xff] %v5761_v34  ;;  %v1188_v24 = vsel %vm18_vm0, %v3783_v25, %v9139_v42  ;;  %v5787_v42 = vld [vmem:[#allocation2 + $0xb0] sm:$0xff]  ;;  %v5789_v25 = vld [vmem:[#allocation2 + $0xa8] sm:$0xff] }
 0x30d   :  { %9138 = vst [vmem:[#allocation240_spill] sm:$0xff] %v5766_v14  ;;  %v1221_v57 = vsel %vm1219_vm6, %v1188_v24, %v9141_v56  ;;  %2137 = vrot.lane.b32.xlu1 %v5766_v14, %s3874_s18  ;;  %v2069_v56 = vrot.slane %v5772_v26, 1  ;;  %v5809_v14 = vld [vmem:[#allocation2 + $0xe8] sm:$0x3] }
 0x30e   :  { %v5763_v22 = vpop.permute.xlu0 %1050  ;;  %2145 = vrot.lane.b32.xlu2 %v5756_v10, %s3874_s18  ;;  %9140 = vst [vmem:[#allocation73_spill] sm:$0xff] %v5772_v26  ;;  %v1254_v10 = vsel %vm1252_vm7, %v1221_v57, %v9144_v53  ;;  %v5801_v57 = vsel %vm231_vm2, %v2079_v43, %v2080_v9  ;;  %v2075_v53 = vrot.slane %v5787_v42, 1 }
 0x30f   :  { %9137 = vst [vmem:[#allocation239_spill] sm:$0xff] %v5763_v22  ;;  %v5779_v22 = vsel %vm231_vm2, %v2065_v54, %v2067_v40  ;;  %v1287_v34 = vsel %vm1285_vm9, %v1254_v10, %v9145_v35  ;;  %v5796_v54 = vpop.permute.xlu1 %1052  ;;  %v2074_v10 = vrot.slane %v5789_v25, 1  ;;  %v5807_v35 = vld [vmem:[#allocation2 + $0xe0] sm:$0xff] }
 0x310   :  { %9142 = vst [vmem:[#allocation113_spill] sm:$0xff] %v5779_v22  ;;  %v5781_v37 = vpop.permute.xlu2 %1115  ;;  %v1320_v24 = vsel %vm1318_vm8, %v1287_v34, %v5253_v15  ;;  %v2085_v26 = vrot.slane %v5807_v35, 1 }
 0x311   :  { %9143 = vst [vmem:[#allocation241_spill] sm:$0xff] %v5781_v37  ;;  %v1353_v40 = vsel %vm1351_vm10, %v1320_v24, %v5333_v62  ;;  %v9151_v62 = vld [vmem:[#allocation71_spill] sm:$0xff]  ;;  %v5823_v37 = vld [vmem:[#allocation2 + $0xb8] sm:$0x3] }
 0x312   :  { %9146 = vst [vmem:[#allocation132_spill] sm:$0xff] %v5796_v54  ;;  %v1386_v15 = vsel %vm1384_vm12, %v1353_v40, %v5522_v50  ;;  %v9152_v24 = vld [vmem:[#allocation7_spill] sm:$0xff]  ;;  %v2087_v50 = vrot.slane %v5809_v14, 1 }
 0x313   :  { %9147 = vst [vmem:[#allocation69_spill] sm:$0xff] %v5801_v57  ;;  %v1189_v54 = vsel %vm18_vm0, %v9152_v24, %v9151_v62  ;;  %v9153_v40 = vld [vmem:[#allocation115_spill] sm:$0xff] }
 0x314   :  { %2141 = vrot.lane.b32.xlu0 %v5779_v22, %s3874_s18  ;;  %9148 = vst [vmem:[#allocation242_spill] sm:$0xff] %v5807_v35  ;;  %v5814_v22 = vsel %vm231_vm2, %v2069_v56, %v2070_v12  ;;  %v1222_v12 = vsel %vm1219_vm6, %v1189_v54, %v9153_v40  ;;  %v5830_v56 = vsel %vm231_vm2, %v2074_v10, %v2075_v53  ;;  %v9157_v62 = vld [vmem:[#allocation159_spill] sm:$0xff] }
 0x315   :  { %9149 = vst [vmem:[#allocation243_spill] sm:$0xff] %v5809_v14  ;;  %2143 = vrot.lane.b32.xlu1 %v5814_v22, %s3874_s18  ;;  %v2077_v14 = vrot.slane %v5823_v37, 1  ;;  %v5848_v40 = vsel %vm231_vm2, %v2085_v26, %v2087_v50  ;;  %v9162_v50 = vld [vmem:[#allocation76_spill] sm:$0xff] }
 0x316   :  { %v1094_v34 = vpop.permute.xlu0 %1093  ;;  %9150 = vst [vmem:[#allocation244_spill] sm:$0xff] %v5814_v22  ;;  %2151 = vrot.lane.b32.xlu2 %v5801_v57, %s3874_s18  ;;  %v5853_v22 = vld [vmem:[#allocation2 + $0x108] sm:$0xff] }
 0x317   :  { %v1419_v43 = vsel %vm1417_vm11, %v1386_v15, %v1094_v34  ;;  %9154 = vst [vmem:[#allocation71_spill] sm:$0xff] %v5830_v56  ;;  %v9156_v34 = vld [vmem:[#allocation143_spill] sm:$0xff]  ;;  %v1096_v10 = vpop.permute.xlu1 %1095  ;;  %v2094_v35 = vrot.slane %v5853_v22, 1 }
 0x318   :  { %3698 = vmatmul.msk.f32.gmra.mxu0 %vm1455_vm13, %v1419_v43  ;;  %v5832_v15 = vpop.permute.xlu2 %1121  ;;  %v1255_v57 = vsel %vm1252_vm7, %v1222_v12, %v9156_v34  ;;  %v5838_v43 = vld [vmem:[#allocation2 + $0xd0] sm:$0x3]  ;;  %9158 = vst [vmem:[#allocation115_spill] sm:$0xff] %v5848_v40 }
 0x319   :  { %9155 = vst [vmem:[#allocation7_spill] sm:$0xff] %v5832_v15  ;;  %v1288_v24 = vsel %vm1285_vm9, %v1255_v57, %v9157_v62  ;;  %v2082_v34 = vrot.slane %v5838_v43, 1  ;;  %v5855_v57 = vld [vmem:[#allocation2 + $0x110] sm:$0xff]  ;;  %v5869_v15 = vld [vmem:[#allocation2 + $0xd8] sm:$0xff] }
 0x31a   :  { %v1321_v54 = vsel %vm1318_vm8, %v1288_v24, %v5261_v60  ;;  %9159 = vst [vmem:[#allocation143_spill] sm:$0xff] %v5853_v22  ;;  %v5860_v24 = vsel %vm231_vm2, %v2075_v53, %v2077_v14 }
 0x31b   :  { %v1354_v12 = vsel %vm1351_vm10, %v1321_v54, %v5389_v18  ;;  %9160 = vst [vmem:[#allocation159_spill] sm:$0xff] %v5855_v57  ;;  %v9163_v18 = vld [vmem:[#allocation8_spill] sm:$0xff]  ;;  %v5876_v53 = vsel %vm231_vm2, %v2080_v9, %v2082_v34 }
 0x31c   :  { %2147 = vrot.lane.b32.xlu0 %v5830_v56, %s3874_s18  ;;  %v1387_v62 = vsel %vm1384_vm12, %v1354_v12, %v5471_v16  ;;  %9161 = vst [vmem:[#allocation245_spill] sm:$0xff] %v5860_v24  ;;  %v1190_v54 = vsel %vm18_vm0, %v9163_v18, %v9162_v50  ;;  %v2095_v16 = vrot.slane %v5855_v57, 1  ;;  %v9165_v12 = vld [vmem:[#allocation102_spill] sm:$0xff]  ;;  %v9168_v18 = vld [vmem:[#allocation168_spill] sm:$0xff]  ;;  %v5923_v57 = vld [vmem:[#allocation2 + $0x100] sm:$0x3] }
 0x31d   :  { %v1420_v56 = vsel %vm1417_vm11, %v1387_v62, %v1096_v10  ;;  %9164 = vst [vmem:[#allocation76_spill] sm:$0xff] %v5869_v15  ;;  %v1223_v14 = vsel %vm1219_vm6, %v1190_v54, %v9165_v12  ;;  %v9167_v62 = vld [vmem:[#allocation145_spill] sm:$0xff]  ;;  %2149 = vrot.lane.b32.xlu1 %v5860_v24, %s3874_s18  ;;  %v2084_v54 = vrot.slane %v5869_v15, 1 }
 0x31e   :  { %v1100_v60 = vpop.permute.xlu0 %1099  ;;  %2157 = vrot.lane.b32.xlu2 %v5848_v40, %s3874_s18  ;;  %9166 = vst [vmem:[#allocation8_spill] sm:$0xff] %v5876_v53  ;;  %v1256_v40 = vsel %vm1252_vm7, %v1223_v14, %v9167_v62  ;;  %v5886_v50 = vld [vmem:[#allocation2 + $0xf0] sm:$0xff]  ;;  %v5898_v12 = vsel %vm231_vm2, %v2094_v35, %v2095_v16 }
 0x31f   :  { %v1289_v22 = vsel %vm1285_vm9, %v1256_v40, %v9168_v18  ;;  %v5893_v34 = vpop.permute.xlu1 %1101  ;;  %9169 = vst [vmem:[#allocation102_spill] sm:$0xff] %v5898_v12  ;;  %v2089_v40 = vrot.slane %v5886_v50, 1  ;;  %v5904_v18 = vld [vmem:[#allocation2 + $0x128] sm:$0xff]  ;;  %v5906_v24 = vld [vmem:[#allocation2 + $0x130] sm:$0x3] }
 0x320   :  { %3699 = vmatmul.msk.f32.gmra.mxu0 %vm1455_vm13, %v1420_v56  ;;  %v5878_v10 = vpop.permute.xlu2 %1127  ;;  %v5884_v56 = vld [vmem:[#allocation2 + $0xf8] sm:$0xff]  ;;  %v1322_v9 = vsel %vm1318_vm8, %v1289_v22, %v5209_v32  ;;  %9170 = vst [vmem:[#allocation145_spill] sm:$0xff] %v5904_v18 }
 0x321   :  { %v1355_v14 = vsel %vm1351_vm10, %v1322_v9, %v5397_v19  ;;  %v2090_v62 = vrot.slane %v5884_v56, 1  ;;  %9171 = vst [vmem:[#allocation168_spill] sm:$0xff] %v5906_v24  ;;  %v9173_v19 = vld [vmem:[#allocation55_spill] sm:$0xff] }
 0x322   :  { %v1388_v32 = vsel %vm1384_vm12, %v1355_v14, %v5526_v11  ;;  %v1191_v9 = vsel %vm18_vm0, %v3926_v4, %v9173_v19  ;;  %v2100_v11 = vrot.slane %v5904_v18, 1  ;;  %v2102_v14 = vrot.slane %v5906_v24, 1  ;;  %v5938_v4 = vld [vmem:[#allocation2 + $0x118] sm:$0x3] }
 0x323   :  { %v1421_v35 = vsel %vm1417_vm11, %v1388_v32, %v5676_v1  ;;  %v5930_v1 = vsel %vm231_vm2, %v2089_v40, %v2090_v62  ;;  %v2092_v24 = vrot.slane %v5923_v57, 1  ;;  %v9183_v18 = vld [vmem:[#allocation118_spill] sm:$0xff] }
 0x324   :  { %2153 = vrot.lane.b32.xlu0 %v5876_v53, %s3874_s18  ;;  %v5913_v53 = vsel %vm231_vm2, %v2084_v54, %v2085_v26  ;;  %v9174_v26 = vld [vmem:[#allocation116_spill] sm:$0xff]  ;;  %9175 = vst [vmem:[#allocation55_spill] sm:$0xff] %v5930_v1 }
 0x325   :  { %9172 = vst [vmem:[#allocation246_spill] sm:$0xff] %v5913_v53  ;;  %v1224_v54 = vsel %vm1219_vm6, %v1191_v9, %v9174_v26  ;;  %2155 = vrot.lane.b32.xlu1 %v5913_v53, %s3874_s18  ;;  %v5955_v53 = vld [vmem:[#allocation2 + $0x150] sm:$0xff] }
 0x326   :  { %v5910_v22 = vpop.permute.xlu0 %1105  ;;  %2163 = vrot.lane.b32.xlu2 %v5898_v12, %s3874_s18  ;;  %v9176_v12 = vld [vmem:[#allocation135_spill] sm:$0xff] }
 0x327   :  { %v1257_v15 = vsel %vm1252_vm7, %v1224_v54, %v9176_v12  ;;  %v5945_v40 = vpop.permute.xlu1 %1107  ;;  %v5950_v12 = vsel %vm231_vm2, %v2100_v11, %v2102_v14  ;;  %v2097_v54 = vrot.slane %v5938_v4, 1  ;;  %9179 = vst [vmem:[#allocation135_spill] sm:$0xff] %v5955_v53 }
 0x328   :  { %3700 = vmatmul.msk.f32.gmra.mxu0 %vm1455_vm13, %v1421_v35  ;;  %v5932_v32 = vpop.permute.xlu2 %1133  ;;  %v9177_v35 = vld [vmem:[#allocation170_spill] sm:$0xff]  ;;  %9178 = vst [vmem:[#allocation116_spill] sm:$0xff] %v5950_v12 }
 0x329   :  { %v1290_v19 = vsel %vm1285_vm9, %v1257_v15, %v9177_v35  ;;  %v5957_v15 = vld [vmem:[#allocation2 + $0x158] sm:$0xff] }
 0x32a   :  { %v1323_v9 = vsel %vm1318_vm8, %v1290_v19, %v5265_v36  ;;  %v5964_v19 = vsel %vm231_vm2, %v2090_v62, %v2092_v24 }
 0x32b   :  { %v1356_v26 = vsel %vm1351_vm10, %v1323_v9, %v5345_v58  ;;  %9180 = vst [vmem:[#allocation170_spill] sm:$0xff] %v5964_v19  ;;  %v9181_v58 = vld [vmem:[#allocation58_spill] sm:$0xff] }
 0x32c   :  { %2159 = vrot.lane.b32.xlu0 %v5930_v1, %s3874_s18  ;;  %v1389_v36 = vsel %vm1384_vm12, %v1356_v26, %v5534_v0  ;;  %v1192_v9 = vsel %vm18_vm0, %v3930_v5, %v9181_v58  ;;  %v5973_v1 = vld [vmem:[#allocation2 + $0x120] sm:$0xff]  ;;  %v2109_v0 = vrot.slane %v5955_v53, 1  ;;  %v9187_v58 = vld [vmem:[#allocation161_spill] sm:$0xff] }
 0x32d   :  { %v1422_v14 = vsel %vm1417_vm11, %v1389_v36, %v1100_v60  ;;  %9182 = vst [vmem:[#allocation58_spill] sm:$0xff] %v5973_v1  ;;  %v1225_v24 = vsel %vm1219_vm6, %v1192_v9, %v9183_v18  ;;  %v5980_v60 = vsel %vm231_vm2, %v2095_v16, %v2097_v54  ;;  %v9185_v36 = vld [vmem:[#allocation146_spill] sm:$0xff]  ;;  %2161 = vrot.lane.b32.xlu1 %v5964_v19, %s3874_s18  ;;  %v5988_v5 = vld [vmem:[#allocation2 + $0x140] sm:$0xff]  ;;  %v2099_v18 = vrot.slane %v5973_v1, 1 }
 0x32e   :  { %v5961_v35 = vpop.permute.xlu0 %1111  ;;  %2169 = vrot.lane.b32.xlu2 %v5950_v12, %s3874_s18  ;;  %9184 = vst [vmem:[#allocation118_spill] sm:$0xff] %v5980_v60  ;;  %v1258_v12 = vsel %vm1252_vm7, %v1225_v24, %v9185_v36  ;;  %v9188_v9 = vrot.slane %v5957_v15, 1  ;;  %v6010_v19 = vld [vmem:[#allocation2 + $0x170] sm:$0xff] }
 0x32f   :  { %9186 = vst [vmem:[#allocation146_spill] sm:$0xff] %v5988_v5  ;;  %v1291_v26 = vsel %vm1285_vm9, %v1258_v12, %v9187_v58  ;;  %v5997_v54 = vpop.permute.xlu1 %1113  ;;  %v2105_v12 = vrot.slane %v5988_v5, 1  ;;  %v6019_v53 = vsel %vm231_vm2, %v2099_v18, %v2100_v11  ;;  %v2115_v11 = vrot.slane %v6010_v19, 1 }
 0x330   :  { %3701 = vmatmul.msk.f32.gmra.mxu0 %vm1455_vm13, %v1422_v14  ;;  %v5982_v62 = vpop.permute.xlu2 %1139  ;;  %v5990_v14 = vld [vmem:[#allocation2 + $0x138] sm:$0xff]  ;;  %v1324_v16 = vsel %vm1318_vm8, %v1291_v26, %v5273_v20  ;;  %v6004_v24 = vsel %vm231_vm2, %v2109_v0, %v9188_v9  ;;  %v9192_v9 = vld [vmem:[#allocation96_spill] sm:$0xff] }
 0x331   :  { %9189 = vst [vmem:[#allocation161_spill] sm:$0xff] %v6004_v24  ;;  %v1357_v36 = vsel %vm1351_vm10, %v1324_v16, %v5401_v29  ;;  %v2104_v58 = vrot.slane %v5990_v14, 1  ;;  %v6012_v20 = vld [vmem:[#allocation2 + $0x178] sm:$0x3]  ;;  %v1203_v1 = vsel %vm18_vm0, %v4251_v52, %v9192_v9  ;;  %v9195_v52 = vld [vmem:[#allocation37_spill] sm:$0xff]  ;;  %v9196_v9 = vld [vmem:[#allocation144_spill] sm:$0xff] }
 0x332   :  { %9190 = vst [vmem:[#allocation247_spill] sm:$0xff] %v6012_v20  ;;  %v1390_v26 = vsel %vm1384_vm12, %v1357_v36, %v5482_v3  ;;  %v9191_v29 = vld [vmem:[#allocation78_spill] sm:$0xff]  ;;  %v6032_v3 = vld [vmem:[#allocation2 + $0x148] sm:$0x3]  ;;  %v2117_v18 = vrot.slane %v6012_v20, 1 }
 0x333   :  { %v1423_v0 = vsel %vm1417_vm11, %v1390_v26, %v5893_v34  ;;  %v1193_v16 = vsel %vm18_vm0, %v4103_v46, %v9191_v29  ;;  %v9193_v34 = vld [vmem:[#allocation105_spill] sm:$0xff]  ;;  %v9194_v26 = vld [vmem:[#allocation128_spill] sm:$0xff]  ;;  %v6041_v46 = vsel %vm231_vm2, %v2104_v58, %v2105_v12  ;;  %v6051_v20 = vld [vmem:[#allocation2 + $0x160] sm:$0x3]  ;;  %v2107_v58 = vrot.slane %v6032_v3, 1 }
 0x334   :  { %2165 = vrot.lane.b32.xlu0 %v5980_v60, %s3874_s18  ;;  %v1226_v36 = vsel %vm1219_vm6, %v1193_v16, %v9193_v34  ;;  %v9197_v16 = vld [vmem:[#allocation72_spill] sm:$0xff] }
 0x335   :  { %2167 = vrot.lane.b32.xlu1 %v6019_v53, %s3874_s18 }
 0x336   :  { %v6016_v60 = vpop.permute.xlu0 %1117  ;;  %2175 = vrot.lane.b32.xlu2 %v6004_v24, %s3874_s18  ;;  %v1236_v24 = vsel %vm1219_vm6, %v1203_v1, %v9194_v26 }
 0x337   :  { %v1269_v5 = vsel %vm1252_vm7, %v1236_v24, %v9196_v9  ;;  %v6062_v24 = vpop.permute.xlu1 %1119 }
 0x338   :  { %3702 = vmatmul.msk.f32.gmra.mxu0 %vm1455_vm13, %v1423_v0  ;;  %v6043_v29 = vpop.permute.xlu2 %1145  ;;  %v1259_v0 = vsel %vm1252_vm7, %v1226_v36, %v9195_v52  ;;  %v1302_v1 = vsel %vm1285_vm9, %v1269_v5, %v5185_v48  ;;  %v6067_v52 = vsel %vm231_vm2, %v2115_v11, %v2117_v18  ;;  %v2112_v5 = vrot.slane %v6051_v20, 1 }
 0x339   :  { %v1292_v34 = vsel %vm1285_vm9, %v1259_v0, %v9197_v16  ;;  %v1335_v36 = vsel %vm1318_vm8, %v1302_v1, %v5315_v6  ;;  %v6079_v16 = vsel %vm231_vm2, %v2105_v12, %v2107_v58  ;;  %v6094_v12 = vld [vmem:[#allocation2 + $0x168] sm:$0xff]  ;;  %v2221_v1 = vrot.slane %v5646_v59, 2  ;;  %v9200_v58 = vld [vmem:[#allocation119_spill] sm:$0xff]  ;;  %v9236_v59 = vld [vmem:[#allocation66_spill] sm:$0xff] }
 0x33a   :  { %v1325_v26 = vsel %vm1318_vm8, %v1292_v34, %v5221_v61  ;;  %v1368_v48 = vsel %vm1351_vm10, %v1335_v36, %v5393_v2  ;;  %v9198_v2 = vld [vmem:[#allocation75_spill] sm:$0xff]  ;;  %v9201_v36 = vld [vmem:[#allocation130_spill] sm:$0xff] }
 0x33b   :  { %v1358_v0 = vsel %vm1351_vm10, %v1325_v26, %v5409_v27  ;;  %v1401_v6 = vsel %vm1384_vm12, %v1368_v48, %v5615_v28  ;;  %v1204_v34 = vsel %vm18_vm0, %v4246_v47, %v9198_v2  ;;  %v9206_v2 = vld [vmem:[#allocation169_spill] sm:$0xff] }
 0x33c   :  { %2171 = vrot.lane.b32.xlu0 %v6041_v46, %s3874_s18  ;;  %v1391_v61 = vsel %vm1384_vm12, %v1358_v0, %v5540_v21  ;;  %v9199_v21 = vld [vmem:[#allocation82_spill] sm:$0xff]  ;;  %v1237_v47 = vsel %vm1219_vm6, %v1204_v34, %v9201_v36  ;;  %v9202_v0 = vrot.slane %v5957_v15, 1 }
 0x33d   :  { %v1424_v18 = vsel %vm1417_vm11, %v1391_v61, %v5708_v45  ;;  %v1194_v28 = vsel %vm18_vm0, %v4110_v49, %v9199_v21  ;;  %v2220_v45 = vrot.slane %v5648_v41, 2  ;;  %v9203_v61 = vld [vmem:[#allocation137_spill] sm:$0xff]  ;;  %2173 = vrot.lane.b32.xlu1 %v6079_v16, %s3874_s18 }
 0x33e   :  { %v1124_v9 = vpop.permute.xlu0 %1123  ;;  %2181 = vrot.lane.b32.xlu2 %v6067_v52, %s3874_s18  ;;  %v1227_v26 = vsel %vm1219_vm6, %v1194_v28, %v9200_v58  ;;  %v6105_v49 = vsel %vm231_vm2, %v9202_v0, %v2112_v5  ;;  %v2114_v5 = vrot.slane %v6094_v12, 1  ;;  %v2215_v0 = vrot.slane %v5634_v23, 2  ;;  %v9209_v23 = vld [vmem:[#allocation9_spill] sm:$0xff] }
 0x33f   :  { %v1434_v27 = vsel %vm1417_vm11, %v1401_v6, %v1124_v9  ;;  %v1260_v6 = vsel %vm1252_vm7, %v1227_v26, %v9203_v61  ;;  %v9204_v9 = vld [vmem:[#allocation155_spill] sm:$0xff]  ;;  %v1126_v58 = vpop.permute.xlu1 %1125  ;;  %v6129_v26 = vsel %vm408_vm4, %v2220_v45, %v2221_v1 }
 0x340   :  { %3703 = vmatmul.msk.f32.gmra.mxu0 %vm1455_vm13, %v1424_v18  ;;  %3713 = vmatmul.msk.f32.vlgmr.msra.gmra.mxu2 %vm1455_vm13, %v1434_v27  ;;  %v6107_v48 = vpop.permute.xlu2 %1151  ;;  %v1270_v41 = vsel %vm1252_vm7, %v1237_v47, %v9204_v9  ;;  %v9205_v18 = vld [vmem:[#allocation80_spill] sm:$0xff]  ;;  %v6144_v45 = vsel %vm231_vm2, %v2114_v5, %v2115_v11  ;;  %v9210_v9 = vld [vmem:[#allocation97_spill] sm:$0xff]  ;;  %v2226_v11 = vrot.slane %v5625_v55, 2 }
 0x341   :  { %v1293_v27 = vsel %vm1285_vm9, %v1260_v6, %v9205_v18  ;;  %v1303_v34 = vsel %vm1285_vm9, %v1270_v41, %v9206_v2  ;;  %9207 = vst [vmem:[#allocation78_spill] sm:$0xff] %v6144_v45  ;;  %v9211_v41 = vld [vmem:[#allocation121_spill] sm:$0xff] }
 0x342   :  { %v1326_v21 = vsel %vm1318_vm8, %v1293_v27, %v5277_v51  ;;  %v1336_v28 = vsel %vm1318_vm8, %v1303_v34, %v5323_v17  ;;  %v2216_v51 = vrot.slane %v5596_v63, 2  ;;  %v9208_v63 = vld [vmem:[#allocation61_spill] sm:$0xff] }
 0x343   :  { %v1359_v36 = vsel %vm1351_vm10, %v1326_v21, %v5357_v8  ;;  %v1369_v47 = vsel %vm1351_vm10, %v1336_v28, %v5452_v33  ;;  %v9212_v27 = vld [vmem:[#allocation117_spill] sm:$0xff]  ;;  %v9214_v21 = vld [vmem:[#allocation148_spill] sm:$0xff] }
 0x344   :  { %2177 = vrot.lane.b32.xlu0 %v6105_v49, %s3874_s18  ;;  %v1392_v17 = vsel %vm1384_vm12, %v1359_v36, %v5551_v31  ;;  %v1402_v61 = vsel %vm1384_vm12, %v1369_v47, %v5530_v30  ;;  %v1195_v31 = vsel %vm18_vm0, %v9209_v23, %v9208_v63  ;;  %v1205_v30 = vsel %vm18_vm0, %v4329_v44, %v9210_v9  ;;  %v9215_v28 = vld [vmem:[#allocation157_spill] sm:$0xff]  ;;  %v9217_v36 = vld [vmem:[#allocation179_spill] sm:$0xff]  ;;  %v9218_v63 = vld [vmem:[#allocation36_spill] sm:$0xff] }
 0x345   :  { %v1425_v8 = vsel %vm1417_vm11, %v1392_v17, %v5910_v22  ;;  %v1435_v33 = vsel %vm1417_vm11, %v1402_v61, %v1126_v58  ;;  %v2228_v22 = vrot.slane %v5679_v39, 2  ;;  %v1228_v18 = vsel %vm1219_vm6, %v1195_v31, %v9211_v41  ;;  %2179 = vrot.lane.b32.xlu1 %v6144_v45, %s3874_s18  ;;  %v9216_v39 = vld [vmem:[#allocation164_spill] sm:$0xff]  ;;  %v9219_v31 = vld [vmem:[#allocation50_spill] sm:$0xff] }
 0x346   :  { %v6141_v6 = vpop.permute.xlu0 %1129  ;;  %2299 = vrot.lane.b32.xlu2 %v6129_v26, %s3875_s29  ;;  %v1238_v2 = vsel %vm1219_vm6, %v1205_v30, %v9212_v27  ;;  %v2217_v34 = vsel %vm408_vm4, %v2215_v0, %v2216_v51  ;;  %v1261_v44 = vsel %vm1252_vm7, %v1228_v18, %v9214_v21  ;;  %v2218_v17 = vrot.slane %v5598_v13, 2  ;;  %v9220_v13 = vld [vmem:[#allocation213_spill] sm:$0xff]  ;;  %v9221_v41 = vld [vmem:[#allocation206_spill] sm:$0xff]  ;;  %v9222_v18 = vld [vmem:[#allocation99_spill] sm:$0xff] }
 0x347   :  { %v1271_v58 = vsel %vm1252_vm7, %v1238_v2, %v9215_v28  ;;  %v1294_v55 = vsel %vm1285_vm9, %v1261_v44, %v9216_v39  ;;  %v2223_v30 = vrot.slane %v9220_v13, 2  ;;  %v9223_v21 = vld [vmem:[#allocation84_spill] sm:$0xff]  ;;  %v9224_v44 = vld [vmem:[#allocation10_spill] sm:$0xff]  ;;  %v9226_v39 = vld [vmem:[#allocation29_spill] sm:$0xff] }
 0x348   :  { %3704 = vmatmul.msk.f32.gmra.mxu0 %vm1455_vm13, %v1425_v8  ;;  %3714 = vmatmul.msk.f32.gmra.mxu2 %vm1455_vm13, %v1435_v33  ;;  %v6166_v5 = vpop.permute.xlu2 %2121  ;;  %v1304_v47 = vsel %vm1285_vm9, %v1271_v58, %v9217_v36  ;;  %v1327_v0 = vsel %vm1318_vm8, %v1294_v55, %v5285_v7  ;;  %v6183_v8 = vpop.permute.xlu1 %1131  ;;  %v6187_v33 = vsel %vm408_vm4, %v2226_v11, %v2228_v22  ;;  %v9225_v58 = vld [vmem:[#allocation100_spill] sm:$0xff]  ;;  %v9228_v36 = vld [vmem:[#allocation223_spill] sm:$0xff] }
 0x349   :  { %9213 = vst [vmem:[#allocation96_spill] sm:$0xff] %v6166_v5  ;;  %v1337_v61 = vsel %vm1318_vm8, %v1304_v47, %v5269_v38  ;;  %v1360_v23 = vsel %vm1351_vm10, %v1327_v0, %v9218_v63  ;;  %v2219_v2 = vsel %vm408_vm4, %v2216_v51, %v2218_v17  ;;  %v1196_v28 = vsel %vm18_vm0, %v9224_v44, %v9223_v21  ;;  %v9227_v51 = vld [vmem:[#allocation224_spill] sm:$0xff]  ;;  %v9230_v0 = vld [vmem:[#allocation131_spill] sm:$0xff] }
 0x34a   :  { %v1370_v9 = vsel %vm1351_vm10, %v1337_v61, %v9219_v31  ;;  %v1393_v7 = vsel %vm1384_vm12, %v1360_v23, %v9221_v41  ;;  %v1206_v55 = vsel %vm18_vm0, %v9226_v39, %v9225_v58  ;;  %v2236_v47 = vrot.slane %v9228_v36, 2  ;;  %v9232_v31 = vld [vmem:[#allocation150_spill] sm:$0xff]  ;;  %v9233_v13 = vld [vmem:[#allocation147_spill] sm:$0xff]  ;;  %v9238_v21 = vld [vmem:[#allocation200_spill] sm:$0xff] }
 0x34b   :  { %v1403_v38 = vsel %vm1384_vm12, %v1370_v9, %v9222_v18  ;;  %v1426_v22 = vsel %vm1417_vm11, %v1393_v7, %v5945_v40  ;;  %v2235_v40 = vrot.slane %v9227_v51, 2  ;;  %v1239_v61 = vsel %vm1219_vm6, %v1206_v55, %v9230_v0  ;;  %v9234_v7 = vld [vmem:[#allocation77_spill] sm:$0xff]  ;;  %v9239_v58 = vld [vmem:[#allocation27_spill] sm:$0xff]  ;;  %v9240_v55 = vld [vmem:[#allocation22_spill] sm:$0xff] }
 0x34c   :  { %2295 = vrot.lane.b32.xlu0 %v2217_v34, %s3875_s29  ;;  %v1436_v34 = vsel %vm1417_vm11, %v1403_v38, %v5878_v10  ;;  %v9229_v10 = vld [vmem:[#allocation108_spill] sm:$0xff]  ;;  %v6224_v63 = vsel %vm408_vm4, %v2221_v1, %v2223_v30  ;;  %v1272_v41 = vsel %vm1252_vm7, %v1239_v61, %v9233_v13  ;;  %v9237_v1 = vld [vmem:[#allocation186_spill] sm:$0xff]  ;;  %v9242_v0 = vld [vmem:[#allocation221_spill] sm:$0xff] }
 0x34d   :  { %v1229_v17 = vsel %vm1219_vm6, %v1196_v28, %v9229_v10  ;;  %2297 = vrot.lane.b32.xlu1 %v2219_v2, %s3875_s29  ;;  %v9235_v38 = vld [vmem:[#allocation180_spill] sm:$0xff]  ;;  %v6249_v2 = vsel %vm408_vm4, %v2235_v40, %v2236_v47  ;;  %v9241_v10 = vld [vmem:[#allocation210_spill] sm:$0xff]  ;;  %v2230_v61 = vrot.slane %v9242_v0, 2 }
 0x34e   :  { %v6198_v27 = vpop.permute.xlu0 %1135  ;;  %2305 = vrot.lane.b32.xlu2 %v6187_v33, %s3875_s29  ;;  %v1262_v9 = vsel %vm1252_vm7, %v1229_v17, %v9232_v31  ;;  %v2231_v17 = vrot.slane %v9241_v10, 2  ;;  %v9243_v31 = vld [vmem:[#allocation79_spill] sm:$0xff]  ;;  %v9244_v13 = vld [vmem:[#allocation142_spill] sm:$0xff]  ;;  %v9253_v10 = vld [vmem:[#allocation133_spill] sm:$0xff] }
 0x34f   :  { %v1295_v18 = vsel %vm1285_vm9, %v1262_v9, %v9234_v7 }
 0x350   :  { %3705 = vmatmul.msk.f32.gmra.mxu0 %vm1455_vm13, %v1426_v22  ;;  %3715 = vmatmul.msk.f32.gmra.mxu2 %vm1455_vm13, %v1436_v34  ;;  %v6226_v23 = vpop.permute.xlu2 %2127  ;;  %v1305_v22 = vsel %vm1285_vm9, %v1272_v41, %v9235_v38  ;;  %v2225_v34 = vrot.slane %v9236_v59, 2  ;;  %v1328_v30 = vsel %vm1318_vm8, %v1295_v18, %v9237_v1  ;;  %v6242_v28 = vpop.permute.xlu1 %1137  ;;  %v9245_v18 = vld [vmem:[#allocation233_spill] sm:$0xff] }
 0x351   :  { %9231 = vst [vmem:[#allocation105_spill] sm:$0xff] %v6226_v23  ;;  %v1338_v44 = vsel %vm1318_vm8, %v1305_v22, %v9238_v21  ;;  %v1361_v39 = vsel %vm1351_vm10, %v1328_v30, %v9239_v58  ;;  %v9246_v59 = vld [vmem:[#allocation81_spill] sm:$0xff]  ;;  %v9248_v21 = vld [vmem:[#allocation87_spill] sm:$0xff] }
 0x352   :  { %v1371_v51 = vsel %vm1351_vm10, %v1338_v44, %v9240_v55  ;;  %v1394_v9 = vsel %vm1384_vm12, %v1361_v39, %v9243_v31  ;;  %v6264_v40 = vsel %vm408_vm4, %v2225_v34, %v2226_v11  ;;  %v9247_v1 = vld [vmem:[#allocation25_spill] sm:$0xff]  ;;  %v9249_v44 = vld [vmem:[#allocation14_spill] sm:$0xff]  ;;  %v6287_v31 = vsel %vm408_vm4, %v2230_v61, %v2231_v17 }
 0x353   :  { %v1404_v41 = vsel %vm1384_vm12, %v1371_v51, %v9244_v13  ;;  %v1427_v38 = vsel %vm1417_vm11, %v1394_v9, %v9245_v18  ;;  %v1207_v30 = vsel %vm18_vm0, %v9247_v1, %v9246_v59  ;;  %v1197_v58 = vsel %vm18_vm0, %v9249_v44, %v9248_v21  ;;  %v9250_v11 = vld [vmem:[#allocation218_spill] sm:$0xff]  ;;  %v9255_v13 = vld [vmem:[#allocation139_spill] sm:$0xff]  ;;  %v9260_v44 = vld [vmem:[#allocation193_spill] sm:$0xff] }
 0x354   :  { %2301 = vrot.lane.b32.xlu0 %v6224_v63, %s3875_s29  ;;  %v1437_v22 = vsel %vm1417_vm11, %v1404_v41, %v6141_v6  ;;  %v2241_v34 = vrot.slane %v9250_v11, 2  ;;  %v9251_v39 = vld [vmem:[#allocation234_spill] sm:$0xff]  ;;  %v1240_v0 = vsel %vm1219_vm6, %v1207_v30, %v9253_v10  ;;  %v9258_v1 = vld [vmem:[#allocation171_spill] sm:$0xff]  ;;  %v9261_v11 = vld [vmem:[#allocation201_spill] sm:$0xff] }
 0x355   :  { %v2243_v55 = vrot.slane %v9251_v39, 2  ;;  %v9252_v6 = vld [vmem:[#allocation122_spill] sm:$0xff]  ;;  %2303 = vrot.lane.b32.xlu1 %v6264_v40, %s3875_s29  ;;  %v9259_v21 = vld [vmem:[#allocation211_spill] sm:$0xff] }
 0x356   :  { %v6261_v7 = vpop.permute.xlu0 %1141  ;;  %2311 = vrot.lane.b32.xlu2 %v6249_v2, %s3875_s29  ;;  %v1230_v51 = vsel %vm1219_vm6, %v1197_v58, %v9252_v6  ;;  %v9256_v18 = vld [vmem:[#allocation158_spill] sm:$0xff]  ;;  %v2233_v61 = vrot.slane %v9259_v21, 2  ;;  %v9262_v10 = vld [vmem:[#allocation23_spill] sm:$0xff] }
 0x357   :  { %v1263_v41 = vsel %vm1252_vm7, %v1230_v51, %v9255_v13  ;;  %v6311_v51 = vsel %vm408_vm4, %v2241_v34, %v2243_v55  ;;  %v9263_v13 = vld [vmem:[#allocation56_spill] sm:$0xff] }
 0x358   :  { %3706 = vmatmul.msk.f32.gmra.mxu0 %vm1455_vm13, %v1427_v38  ;;  %3716 = vmatmul.msk.f32.gmra.mxu2 %vm1455_vm13, %v1437_v22  ;;  %v6289_v9 = vpop.permute.xlu2 %2133  ;;  %v1273_v38 = vsel %vm1252_vm7, %v1240_v0, %v9256_v18  ;;  %v9257_v22 = vld [vmem:[#allocation173_spill] sm:$0xff]  ;;  %v6306_v6 = vpop.permute.xlu1 %1143  ;;  %v9264_v18 = vld [vmem:[#allocation231_spill] sm:$0xff] }
 0x359   :  { %9254 = vst [vmem:[#allocation128_spill] sm:$0xff] %v6289_v9  ;;  %v1296_v59 = vsel %vm1285_vm9, %v1263_v41, %v9257_v22  ;;  %v1306_v30 = vsel %vm1285_vm9, %v1273_v38, %v9258_v1  ;;  %v2238_v38 = vrot.slane %v9264_v18, 2  ;;  %v9265_v22 = vld [vmem:[#allocation90_spill] sm:$0xff]  ;;  %v9266_v1 = vld [vmem:[#allocation67_spill] sm:$0xff]  ;;  %v9272_v18 = vld [vmem:[#allocation120_spill] sm:$0xff] }
 0x35a   :  { %v1329_v58 = vsel %vm1318_vm8, %v1296_v59, %v9260_v44  ;;  %v1339_v39 = vsel %vm1318_vm8, %v1306_v30, %v9261_v11  ;;  %v6325_v44 = vsel %vm408_vm4, %v2231_v17, %v2233_v61  ;;  %v9267_v11 = vld [vmem:[#allocation65_spill] sm:$0xff]  ;;  %v8732_v17 = vrot.slane %v5787_v42, 2 }
 0x35b   :  { %v1362_v0 = vsel %vm1351_vm10, %v1329_v58, %v9262_v10  ;;  %v1372_v41 = vsel %vm1351_vm10, %v1339_v39, %v9263_v13  ;;  %v9268_v39 = vld [vmem:[#allocation13_spill] sm:$0xff]  ;;  %v9270_v13 = vld [vmem:[#allocation26_spill] sm:$0xff] }
 0x35c   :  { %2307 = vrot.lane.b32.xlu0 %v6287_v31, %s3875_s29  ;;  %v1395_v59 = vsel %vm1384_vm12, %v1362_v0, %v9265_v22  ;;  %v1405_v30 = vsel %vm1384_vm12, %v1372_v41, %v9266_v1  ;;  %v1198_v10 = vsel %vm18_vm0, %v9268_v39, %v9267_v11  ;;  %v9269_v0 = vld [vmem:[#allocation101_spill] sm:$0xff]  ;;  %v9276_v11 = vld [vmem:[#allocation166_spill] sm:$0xff] }
 0x35d   :  { %v1428_v55 = vsel %vm1417_vm11, %v1395_v59, %v5961_v35  ;;  %v1438_v58 = vsel %vm1417_vm11, %v1405_v30, %v6183_v8  ;;  %v1208_v41 = vsel %vm18_vm0, %v9270_v13, %v9269_v0  ;;  %v2250_v35 = vrot.slane %v5789_v25, 2  ;;  %v9271_v8 = vld [vmem:[#allocation124_spill] sm:$0xff]  ;;  %v9274_v30 = vld [vmem:[#allocation151_spill] sm:$0xff]  ;;  %2309 = vrot.lane.b32.xlu1 %v6325_v44, %s3875_s29  ;;  %v9278_v0 = vld [vmem:[#allocation217_spill] sm:$0xff] }
 0x35e   :  { %v6322_v21 = vpop.permute.xlu0 %1147  ;;  %2317 = vrot.lane.b32.xlu2 %v6311_v51, %s3875_s29  ;;  %v1231_v61 = vsel %vm1219_vm6, %v1198_v10, %v9271_v8  ;;  %v1241_v22 = vsel %vm1219_vm6, %v1208_v41, %v9272_v18  ;;  %v6350_v59 = vsel %vm408_vm4, %v2236_v47, %v2238_v38  ;;  %v9277_v10 = vld [vmem:[#allocation181_spill] sm:$0xff]  ;;  %v2240_v47 = vrot.slane %v9278_v0, 2  ;;  %v9279_v38 = vld [vmem:[#allocation195_spill] sm:$0xff]  ;;  %v9280_v41 = vld [vmem:[#allocation192_spill] sm:$0xff] }
 0x35f   :  { %v6376_v18 = vsel %vm408_vm4, %v2250_v35, %v8732_v17  ;;  %v9301_v17 = vld [vmem:[#allocation202_spill] sm:$0xff] }
 0x360   :  { %3707 = vmatmul.msk.f32.gmra.mxu0 %vm1455_vm13, %v1428_v55  ;;  %3717 = vmatmul.msk.f32.gmra.mxu2 %vm1455_vm13, %v1438_v58  ;;  %v6352_v1 = vpop.permute.xlu2 %2139  ;;  %v1264_v55 = vsel %vm1252_vm7, %v1231_v61, %v9274_v30  ;;  %v9275_v58 = vld [vmem:[#allocation160_spill] sm:$0xff]  ;;  %v6369_v61 = vpop.permute.xlu1 %1149  ;;  %v6391_v35 = vsel %vm408_vm4, %v2240_v47, %v2241_v34  ;;  %v9291_v34 = vld [vmem:[#allocation238_spill] sm:$0xff]  ;;  %v2258_v47 = vrot.slane %v5838_v43, 2 }
 0x361   :  { %9273 = vst [vmem:[#allocation37_spill] sm:$0xff] %v6352_v1  ;;  %v1274_v25 = vsel %vm1252_vm7, %v1241_v22, %v9275_v58  ;;  %v1297_v39 = vsel %vm1285_vm9, %v1264_v55, %v9276_v11  ;;  %v9281_v22 = vld [vmem:[#allocation42_spill] sm:$0xff]  ;;  %v9282_v55 = vld [vmem:[#allocation204_spill] sm:$0xff] }
 0x362   :  { %v1307_v36 = vsel %vm1285_vm9, %v1274_v25, %v9277_v10  ;;  %v1330_v13 = vsel %vm1318_vm8, %v1297_v39, %v9279_v38  ;;  %v9283_v25 = vld [vmem:[#allocation227_spill] sm:$0xff]  ;;  %v9284_v39 = vld [vmem:[#allocation73_spill] sm:$0xff]  ;;  %v9286_v38 = vld [vmem:[#allocation212_spill] sm:$0xff] }
 0x363   :  { %v1340_v8 = vsel %vm1318_vm8, %v1307_v36, %v9280_v41  ;;  %v1363_v30 = vsel %vm1351_vm10, %v1330_v13, %v9281_v22  ;;  %v2246_v11 = vrot.slane %v9283_v25, 2  ;;  %v2245_v10 = vrot.slane %v9284_v39, 2  ;;  %v9285_v36 = vld [vmem:[#allocation207_spill] sm:$0xff]  ;;  %v9287_v22 = vld [vmem:[#allocation89_spill] sm:$0xff]  ;;  %v9297_v43 = vld [vmem:[#allocation174_spill] sm:$0xff] }
 0x364   :  { %2313 = vrot.lane.b32.xlu0 %v6350_v59, %s3875_s29  ;;  %v1373_v58 = vsel %vm1351_vm10, %v1340_v8, %v9282_v55  ;;  %v1396_v0 = vsel %vm1384_vm12, %v1363_v30, %v9285_v36  ;;  %v9288_v55 = vld [vmem:[#allocation20_spill] sm:$0xff]  ;;  %v9289_v25 = vld [vmem:[#allocation103_spill] sm:$0xff] }
 0x365   :  { %v1406_v41 = vsel %vm1384_vm12, %v1373_v58, %v9286_v38  ;;  %v1429_v13 = vsel %vm1417_vm11, %v1396_v0, %v5997_v54  ;;  %v1199_v30 = vsel %vm18_vm0, %v9288_v55, %v9287_v22  ;;  %v9290_v58 = vld [vmem:[#allocation32_spill] sm:$0xff]  ;;  %v2256_v54 = vrot.slane %v9291_v34, 2  ;;  %v9293_v0 = vld [vmem:[#allocation134_spill] sm:$0xff]  ;;  %v9295_v55 = vld [vmem:[#allocation49_spill] sm:$0xff]  ;;  %2315 = vrot.lane.b32.xlu1 %v6391_v35, %s3875_s29 }
 0x366   :  { %v6388_v1 = vpop.permute.xlu0 %1153  ;;  %v1439_v8 = vsel %vm1417_vm11, %v1406_v41, %v5932_v32  ;;  %2323 = vrot.lane.b32.xlu2 %v6376_v18, %s3875_s29  ;;  %v1209_v39 = vsel %vm18_vm0, %v9290_v58, %v9289_v25  ;;  %v9292_v32 = vld [vmem:[#allocation111_spill] sm:$0xff]  ;;  %v6414_v41 = vsel %vm408_vm4, %v2245_v10, %v2246_v11  ;;  %v9296_v25 = vld [vmem:[#allocation149_spill] sm:$0xff]  ;;  %v9298_v58 = vld [vmem:[#allocation182_spill] sm:$0xff] }
 0x367   :  { %v1232_v36 = vsel %vm1219_vm6, %v1199_v30, %v9292_v32  ;;  %v1242_v38 = vsel %vm1219_vm6, %v1209_v39, %v9293_v0  ;;  %v9299_v34 = vld [vmem:[#allocation228_spill] sm:$0xff]  ;;  %v9300_v32 = vld [vmem:[#allocation189_spill] sm:$0xff] }
 0x368   :  { %3708 = vmatmul.msk.f32.gmra.mxu0 %vm1455_vm13, %v1429_v13  ;;  %3718 = vmatmul.msk.f32.gmra.mxu2 %vm1455_vm13, %v1439_v8  ;;  %v6416_v22 = vpop.permute.xlu2 %2145  ;;  %v1265_v13 = vsel %vm1252_vm7, %v1232_v36, %v9295_v55  ;;  %v1275_v8 = vsel %vm1252_vm7, %v1242_v38, %v9296_v25  ;;  %v2248_v10 = vrot.slane %v9299_v34, 2  ;;  %v6433_v55 = vpop.permute.xlu1 %2119  ;;  %v6438_v38 = vsel %vm408_vm4, %v2256_v54, %v2258_v47  ;;  %v9309_v47 = vld [vmem:[#allocation241_spill] sm:$0xff] }
 0x369   :  { %9294 = vst [vmem:[#allocation144_spill] sm:$0xff] %v6416_v22  ;;  %v1298_v30 = vsel %vm1285_vm9, %v1265_v13, %v9297_v43  ;;  %v1308_v39 = vsel %vm1285_vm9, %v1275_v8, %v9298_v58  ;;  %v9304_v13 = vld [vmem:[#allocation48_spill] sm:$0xff]  ;;  %v9305_v8 = vld [vmem:[#allocation45_spill] sm:$0xff]  ;;  %v2253_v58 = vrot.slane %v5823_v37, 2  ;;  %v9310_v37 = vld [vmem:[#allocation86_spill] sm:$0xff] }
 0x36a   :  { %v1331_v0 = vsel %vm1318_vm8, %v1298_v30, %v9300_v32  ;;  %v1341_v36 = vsel %vm1318_vm8, %v1308_v39, %v9301_v17  ;;  %9302 = vst [vmem:[#allocation72_spill] sm:$0xff] %v6433_v55  ;;  %v9306_v30 = vld [vmem:[#allocation83_spill] sm:$0xff]  ;;  %v6452_v9 = vsel %vm408_vm4, %v2246_v11, %v2248_v10  ;;  %v2265_v10 = vrot.slane %v5886_v50, 2 }
 0x36b   :  { %9303 = vst [vmem:[#allocation75_spill] sm:$0xff] %v6438_v38  ;;  %v1364_v25 = vsel %vm1351_vm10, %v1331_v0, %v9304_v13  ;;  %v1374_v43 = vsel %vm1351_vm10, %v1341_v36, %v9305_v8  ;;  %v9307_v17 = vld [vmem:[#allocation215_spill] sm:$0xff]  ;;  %v9313_v8 = vld [vmem:[#allocation21_spill] sm:$0xff] }
 0x36c   :  { %2319 = vrot.lane.b32.xlu0 %v6414_v41, %s3875_s29  ;;  %v1397_v34 = vsel %vm1384_vm12, %v1364_v25, %v9306_v30  ;;  %v1407_v39 = vsel %vm1384_vm12, %v1374_v43, %v9307_v17  ;;  %v9311_v36 = vld [vmem:[#allocation31_spill] sm:$0xff]  ;;  %v9312_v25 = vld [vmem:[#allocation92_spill] sm:$0xff]  ;;  %v9314_v30 = vld [vmem:[#allocation125_spill] sm:$0xff] }
 0x36d   :  { %v1430_v23 = vsel %vm1417_vm11, %v1397_v34, %v9309_v47  ;;  %v1440_v0 = vsel %vm1417_vm11, %v1407_v39, %v6198_v27  ;;  %v1210_v13 = vsel %vm18_vm0, %v9311_v36, %v9310_v37  ;;  %v1200_v43 = vsel %vm18_vm0, %v9313_v8, %v9312_v25  ;;  %v9315_v17 = vld [vmem:[#allocation136_spill] sm:$0xff]  ;;  %v9319_v36 = vld [vmem:[#allocation54_spill] sm:$0xff]  ;;  %2321 = vrot.lane.b32.xlu1 %v6452_v9, %s3875_s29  ;;  %v9324_v27 = vld [vmem:[#allocation203_spill] sm:$0xff] }
 0x36e   :  { %v6449_v32 = vpop.permute.xlu0 %2123  ;;  %2329 = vrot.lane.b32.xlu2 %v6438_v38, %s3875_s29  ;;  %v1233_v34 = vsel %vm1219_vm6, %v1200_v43, %v9314_v30  ;;  %v1243_v39 = vsel %vm1219_vm6, %v1210_v13, %v9315_v17  ;;  %v9316_v47 = vrot.slane %v5787_v42, 2  ;;  %v9320_v42 = vld [vmem:[#allocation176_spill] sm:$0xff]  ;;  %v9322_v43 = vld [vmem:[#allocation237_spill] sm:$0xff] }
 0x36f   :  { %9308 = vst [vmem:[#allocation82_spill] sm:$0xff] %v6449_v32  ;;  %v6468_v11 = vpop.f32.mrf.mxu0  ;;  %v1276_v25 = vsel %vm1252_vm7, %v1243_v39, %v9319_v36  ;;  %v9321_v13 = vld [vmem:[#allocation172_spill] sm:$0xff]  ;;  %v2255_v30 = vrot.slane %v9322_v43, 2  ;;  %v9326_v39 = vrot.slane %v5884_v56, 2 }
 0x370   :  { %3709 = vmatmul.msk.f32.gmra.mxu0 %vm1455_vm13, %v1430_v23  ;;  %3719 = vmatmul.msk.f32.gmra.mxu2 %vm1455_vm13, %v1440_v0  ;;  %v6479_v37 = vsel %vm408_vm4, %v9316_v47, %v2253_v58  ;;  %1841 = vst.msk [vmem:[%s8549_s2] sm:$0xff] %vm1219_vm6, %v6468_v11  ;;  %v6486_v50 = vpop.permute.xlu2 %2151  ;;  %v9318_v23 = vld [vmem:[#allocation141_spill] sm:$0xff]  ;;  %v1309_v8 = vsel %vm1285_vm9, %v1276_v25, %v9321_v13  ;;  %v9323_v17 = vld [vmem:[#allocation196_spill] sm:$0xff] }
 0x371   :  { %9317 = vst [vmem:[#allocation119_spill] sm:$0xff] %v6486_v50  ;;  %v1266_v0 = vsel %vm1252_vm7, %v1233_v34, %v9318_v23  ;;  %v1342_v34 = vsel %vm1318_vm8, %v1309_v8, %v9324_v27  ;;  %v6503_v23 = vpop.permute.xlu1 %2125  ;;  %v9327_v36 = vld [vmem:[#allocation28_spill] sm:$0xff]  ;;  %v9332_v50 = vld [vmem:[#allocation85_spill] sm:$0xff] }
 0x372   :  { %v1299_v58 = vsel %vm1285_vm9, %v1266_v0, %v9320_v42  ;;  %9325 = vst [vmem:[#allocation130_spill] sm:$0xff] %v6503_v23  ;;  %v6510_v0 = vsel %vm408_vm4, %v2265_v10, %v9326_v39  ;;  %v9328_v42 = vld [vmem:[#allocation205_spill] sm:$0xff]  ;;  %v9331_v8 = vld [vmem:[#allocation88_spill] sm:$0xff]  ;;  %v6525_v10 = vsel %vm408_vm4, %v2255_v30, %v2256_v54  ;;  %v9335_v39 = vld [vmem:[#allocation70_spill] sm:$0xff] }
 0x373   :  { %v1332_v47 = vsel %vm1318_vm8, %v1299_v58, %v9323_v17  ;;  %v1375_v13 = vsel %vm1351_vm10, %v1342_v34, %v9328_v42  ;;  %v9329_v58 = vld [vmem:[#allocation242_spill] sm:$0xff]  ;;  %v9330_v17 = vld [vmem:[#allocation76_spill] sm:$0xff]  ;;  %9334 = vst [vmem:[#allocation155_spill] sm:$0xff] %v6525_v10  ;;  %v9339_v54 = vld [vmem:[#allocation159_spill] sm:$0xff] }
 0x374   :  { %2325 = vrot.lane.b32.xlu0 %v6479_v37, %s3875_s29  ;;  %v1365_v25 = vsel %vm1351_vm10, %v1332_v47, %v9327_v36  ;;  %v2261_v43 = vrot.slane %v9329_v58, 2  ;;  %v2260_v27 = vrot.slane %v9330_v17, 2  ;;  %v1408_v23 = vsel %vm1384_vm12, %v1375_v13, %v9332_v50  ;;  %v9336_v36 = vld [vmem:[#allocation16_spill] sm:$0xff]  ;;  %v9338_v50 = vld [vmem:[#allocation39_spill] sm:$0xff] }
 0x375   :  { %v1398_v38 = vsel %vm1384_vm12, %v1365_v25, %v9331_v8  ;;  %v1441_v34 = vsel %vm1417_vm11, %v1408_v23, %v6242_v28  ;;  %v1201_v25 = vsel %vm18_vm0, %v9336_v36, %v9335_v39  ;;  %v9337_v42 = vld [vmem:[#allocation104_spill] sm:$0xff]  ;;  %v9340_v28 = vld [vmem:[#allocation127_spill] sm:$0xff]  ;;  %v9343_v39 = vld [vmem:[#allocation153_spill] sm:$0xff]  ;;  %2327 = vrot.lane.b32.xlu1 %v6525_v10, %s3875_s29 }
 0x376   :  { %v6522_v32 = vpop.permute.xlu0 %2129  ;;  %v1431_v47 = vsel %vm1417_vm11, %v1398_v38, %v6016_v60  ;;  %2335 = vrot.lane.b32.xlu2 %v6510_v0, %s3875_s29  ;;  %v1211_v13 = vsel %vm18_vm0, %v9338_v50, %v9337_v42  ;;  %v2271_v60 = vrot.slane %v9339_v54, 2  ;;  %v2273_v38 = vrot.slane %v5938_v4, 2  ;;  %v9341_v23 = vld [vmem:[#allocation123_spill] sm:$0xff]  ;;  %v9344_v36 = vld [vmem:[#allocation162_spill] sm:$0xff] }
 0x377   :  { %9333 = vst [vmem:[#allocation137_spill] sm:$0xff] %v6522_v32  ;;  %v1234_v30 = vsel %vm1219_vm6, %v1201_v25, %v9340_v28  ;;  %v1244_v58 = vsel %vm1219_vm6, %v1211_v13, %v9341_v23  ;;  %v6548_v17 = vsel %vm408_vm4, %v2260_v27, %v2261_v43  ;;  %v9345_v4 = vld [vmem:[#allocation167_spill] sm:$0xff]  ;;  %v9348_v54 = vld [vmem:[#allocation198_spill] sm:$0xff] }
 0x378   :  { %3710 = vmatmul.msk.f32.gmra.mxu0 %vm1455_vm13, %v1431_v47  ;;  %3720 = vmatmul.msk.f32.gmra.mxu2 %vm1455_vm13, %v1441_v34  ;;  %v6550_v8 = vpop.permute.xlu2 %2157  ;;  %v1267_v47 = vsel %vm1252_vm7, %v1234_v30, %v9343_v39  ;;  %v1277_v34 = vsel %vm1252_vm7, %v1244_v58, %v9344_v36  ;;  %v9346_v42 = vld [vmem:[#allocation183_spill] sm:$0xff]  ;;  %v9349_v23 = vld [vmem:[#allocation194_spill] sm:$0xff]  ;;  %v6572_v58 = vsel %vm408_vm4, %v2271_v60, %v2273_v38 }
 0x379   :  { %9342 = vst [vmem:[#allocation80_spill] sm:$0xff] %v6550_v8  ;;  %v1300_v25 = vsel %vm1285_vm9, %v1267_v47, %v9345_v4  ;;  %v1310_v50 = vsel %vm1285_vm9, %v1277_v34, %v9346_v42  ;;  %v9347_v13 = vld [vmem:[#allocation243_spill] sm:$0xff]  ;;  %v6567_v39 = vpop.permute.xlu1 %2131  ;;  %v9352_v47 = vld [vmem:[#allocation40_spill] sm:$0xff]  ;;  %v9353_v34 = vld [vmem:[#allocation57_spill] sm:$0xff]  ;;  %v2268_v42 = vrot.slane %v5923_v57, 2 }
 0x37a   :  { %v2263_v27 = vrot.slane %v9347_v13, 2  ;;  %v1333_v28 = vsel %vm1318_vm8, %v1300_v25, %v9348_v54  ;;  %v1343_v30 = vsel %vm1318_vm8, %v1310_v50, %v9349_v23  ;;  %9350 = vst [vmem:[#allocation169_spill] sm:$0xff] %v6567_v39  ;;  %v9354_v25 = vld [vmem:[#allocation74_spill] sm:$0xff]  ;;  %v9355_v50 = vld [vmem:[#allocation219_spill] sm:$0xff]  ;;  %v9357_v57 = vld [vmem:[#allocation93_spill] sm:$0xff] }
 0x37b   :  { %9351 = vst [vmem:[#allocation61_spill] sm:$0xff] %v6572_v58  ;;  %v1366_v36 = vsel %vm1351_vm10, %v1333_v28, %v9352_v47  ;;  %v1376_v4 = vsel %vm1351_vm10, %v1343_v30, %v9353_v34  ;;  %v9358_v30 = vld [vmem:[#allocation18_spill] sm:$0xff]  ;;  %v9383_v10 = vld [vmem:[#allocation7_spill] sm:$0xff] }
 0x37c   :  { %2331 = vrot.lane.b32.xlu0 %v6548_v17, %s3875_s29  ;;  %v1399_v13 = vsel %vm1384_vm12, %v1366_v36, %v9354_v25  ;;  %v1409_v54 = vsel %vm1384_vm12, %v1376_v4, %v9355_v50  ;;  %v6586_v8 = vsel %vm408_vm4, %v2261_v43, %v2263_v27  ;;  %v1202_v47 = vsel %vm18_vm0, %v9358_v30, %v9357_v57  ;;  %v9359_v36 = vld [vmem:[#allocation106_spill] sm:$0xff] }
 0x37d   :  { %v1432_v38 = vsel %vm1417_vm11, %v1399_v13, %v6062_v24  ;;  %v1442_v28 = vsel %vm1417_vm11, %v1409_v54, %v5982_v62  ;;  %v9360_v34 = vld [vmem:[#allocation38_spill] sm:$0xff]  ;;  %v2280_v24 = vrot.slane %v5990_v14, 2  ;;  %v9364_v54 = vrot.slane %v5884_v56, 2  ;;  %2333 = vrot.lane.b32.xlu1 %v6586_v8, %s3875_s29 }
 0x37e   :  { %v6583_v23 = vpop.permute.xlu0 %2135  ;;  %2341 = vrot.lane.b32.xlu2 %v6572_v58, %s3875_s29  ;;  %v1212_v4 = vsel %vm18_vm0, %v9360_v34, %v9359_v36  ;;  %v9361_v43 = vld [vmem:[#allocation146_spill] sm:$0xff]  ;;  %v9367_v36 = vld [vmem:[#allocation152_spill] sm:$0xff] }
 0x37f   :  { %9356 = vst [vmem:[#allocation9_spill] sm:$0xff] %v6583_v23  ;;  %v2281_v27 = vrot.slane %v9361_v43, 2  ;;  %v9362_v62 = vld [vmem:[#allocation114_spill] sm:$0xff]  ;;  %v6611_v57 = vsel %vm408_vm4, %v9364_v54, %v2268_v42  ;;  %v9370_v43 = vld [vmem:[#allocation143_spill] sm:$0xff]  ;;  %v9372_v54 = vld [vmem:[#allocation17_spill] sm:$0xff] }
 0x380   :  { %3711 = vmatmul.msk.f32.gmra.mxu0 %vm1455_vm13, %v1432_v38  ;;  %3721 = vmatmul.msk.f32.gmra.mxu2 %vm1455_vm13, %v1442_v28  ;;  %v1235_v25 = vsel %vm1219_vm6, %v1202_v47, %v9362_v62  ;;  %v9363_v13 = vld [vmem:[#allocation6_spill] sm:$0xff]  ;;  %v6613_v30 = vpop.permute.xlu2 %2163  ;;  %v9366_v38 = vld [vmem:[#allocation52_spill] sm:$0xff]  ;;  %v9368_v47 = vld [vmem:[#allocation177_spill] sm:$0xff]  ;;  %v2270_v42 = vrot.slane %v9370_v43, 2 }
 0x381   :  { %v1245_v50 = vsel %vm1219_vm6, %v1212_v4, %v9363_v13  ;;  %9365 = vst [vmem:[#allocation97_spill] sm:$0xff] %v6613_v30  ;;  %v1268_v28 = vsel %vm1252_vm7, %v1235_v25, %v9366_v38  ;;  %v9369_v4 = vld [vmem:[#allocation184_spill] sm:$0xff]  ;;  %v9371_v62 = vld [vmem:[#allocation191_spill] sm:$0xff]  ;;  %v6630_v38 = vpop.permute.xlu1 %2137  ;;  %v9379_v30 = vld [vmem:[#allocation98_spill] sm:$0xff] }
 0x382   :  { %v1278_v14 = vsel %vm1252_vm7, %v1245_v50, %v9367_v36  ;;  %v1301_v34 = vsel %vm1285_vm9, %v1268_v28, %v9368_v47  ;;  %9373 = vst [vmem:[#allocation121_spill] sm:$0xff] %v6630_v38  ;;  %v6635_v50 = vsel %vm408_vm4, %v2280_v24, %v2281_v27  ;;  %v9375_v28 = vld [vmem:[#allocation47_spill] sm:$0xff]  ;;  %v6650_v24 = vsel %vm408_vm4, %v2270_v42, %v2271_v60  ;;  %v6965_v39 = vld [vmem:[#allocation2 + $0xf0] sm:$0xff] }
 0x383   :  { %v1311_v56 = vsel %vm1285_vm9, %v1278_v14, %v9369_v4  ;;  %v1334_v13 = vsel %vm1318_vm8, %v1301_v34, %v9371_v62  ;;  %9374 = vst [vmem:[#allocation117_spill] sm:$0xff] %v6635_v50  ;;  %v9376_v14 = vld [vmem:[#allocation33_spill] sm:$0xff]  ;;  %v9378_v34 = vld [vmem:[#allocation58_spill] sm:$0xff]  ;;  %v2286_v60 = vrot.slane %v5957_v15, 2  ;;  %v2288_v42 = vrot.slane %v6051_v20, 2  ;;  %v9391_v15 = vld [vmem:[#allocation168_spill] sm:$0xff] }
 0x384   :  { %v1344_v25 = vsel %vm1318_vm8, %v1311_v56, %v9372_v54  ;;  %2337 = vrot.lane.b32.xlu0 %v6611_v57, %s3875_s29  ;;  %v1367_v36 = vsel %vm1351_vm10, %v1334_v13, %v9375_v28  ;;  %v9377_v4 = vld [vmem:[#allocation145_spill] sm:$0xff]  ;;  %v2275_v62 = vrot.slane %v9378_v34, 2  ;;  %9382 = vst [vmem:[#allocation157_spill] sm:$0xff] %v6650_v24  ;;  %v9384_v28 = vld [vmem:[#allocation91_spill] sm:$0xff]  ;;  %v9392_v20 = vld [vmem:[#allocation24_spill] sm:$0xff] }
 0x385   :  { %v1377_v47 = vsel %vm1351_vm10, %v1344_v25, %v9376_v14  ;;  %v2276_v43 = vrot.slane %v9377_v4, 2  ;;  %v1400_v56 = vsel %vm1384_vm12, %v1367_v36, %v9379_v30  ;;  %v9380_v54 = vld [vmem:[#allocation225_spill] sm:$0xff]  ;;  %v9385_v14 = vld [vmem:[#allocation34_spill] sm:$0xff]  ;;  %v9386_v36 = vld [vmem:[#allocation12_spill] sm:$0xff]  ;;  %2339 = vrot.lane.b32.xlu1 %v6650_v24, %s3875_s29 }
 0x386   :  { %v1410_v38 = vsel %vm1384_vm12, %v1377_v47, %v9380_v54  ;;  %v6647_v23 = vpop.permute.xlu0 %2141  ;;  %v1433_v13 = vsel %vm1417_vm11, %v1400_v56, %v9383_v10  ;;  %2347 = vrot.lane.b32.xlu2 %v6635_v50, %s3875_s29  ;;  %v1213_v30 = vsel %vm18_vm0, %v9385_v14, %v9384_v28  ;;  %v9389_v47 = vld [vmem:[#allocation163_spill] sm:$0xff]  ;;  %v2278_v54 = vrot.slane %v9391_v15, 2 }
 0x387   :  { %9381 = vst [vmem:[#allocation148_spill] sm:$0xff] %v6647_v23  ;;  %v1443_v25 = vsel %vm1417_vm11, %v1410_v38, %v6261_v7  ;;  %v1246_v10 = vsel %vm1219_vm6, %v1213_v30, %v9386_v36  ;;  %v6668_v7 = vsel %vm408_vm4, %v2275_v62, %v2276_v43  ;;  %v9390_v34 = vld [vmem:[#allocation175_spill] sm:$0xff]  ;;  %v6686_v62 = vsel %vm408_vm4, %v2286_v60, %v2288_v42  ;;  %v9396_v36 = vld [vmem:[#allocation94_spill] sm:$0xff] }
 0x388   :  { %3712 = vmatmul.msk.f32.gmra.mxu0 %vm1455_vm13, %v1433_v13  ;;  %3722 = vmatmul.msk.f32.gmra.mxu2 %vm1455_vm13, %v1443_v25  ;;  %9387 = vst [vmem:[#allocation164_spill] sm:$0xff] %v6668_v7  ;;  %v6670_v38 = vpop.permute.xlu2 %2169  ;;  %v1279_v4 = vsel %vm1252_vm7, %v1246_v10, %v9389_v47  ;;  %v9395_v28 = vld [vmem:[#allocation63_spill] sm:$0xff]  ;;  %v2283_v30 = vrot.slane %v6032_v3, 2  ;;  %v9401_v3 = vld [vmem:[#allocation126_spill] sm:$0xff] }
 0x389   :  { %9388 = vst [vmem:[#allocation179_spill] sm:$0xff] %v6670_v38  ;;  %v1312_v56 = vsel %vm1285_vm9, %v1279_v4, %v9390_v34  ;;  %v6681_v25 = vpop.permute.xlu1 %2143  ;;  %v6696_v4 = vsel %vm408_vm4, %v2276_v43, %v2278_v54  ;;  %v9399_v42 = vld [vmem:[#allocation107_spill] sm:$0xff]  ;;  %v9404_v54 = vld [vmem:[#allocation60_spill] sm:$0xff]  ;;  %v6843_v23 = vld [vmem:[#allocation2 + $0x30] sm:$0xff] }
 0x38a   :  { %v1345_v13 = vsel %vm1318_vm8, %v1312_v56, %v9392_v20  ;;  %9393 = vst [vmem:[#allocation36_spill] sm:$0xff] %v6681_v25  ;;  %v9400_v56 = vld [vmem:[#allocation35_spill] sm:$0xff] }
 0x38b   :  { %9394 = vst [vmem:[#allocation50_spill] sm:$0xff] %v6686_v62  ;;  %v1378_v14 = vsel %vm1351_vm10, %v1345_v13, %v9395_v28  ;;  %v1214_v15 = vsel %vm18_vm0, %v9400_v56, %v9399_v42  ;;  %v6709_v13 = vsel %vm408_vm4, %v2281_v27, %v2283_v30  ;;  %v9405_v28 = vld [vmem:[#allocation185_spill] sm:$0xff]  ;;  %v1739_v27 = vmul.f32 %v6468_v11, %v6468_v11  ;;  %v9409_v56 = vld [vmem:[#allocation59_spill] sm:$0xff] }
 0x38c   :  { %2343 = vrot.lane.b32.xlu0 %v6668_v7, %s3875_s29  ;;  %v1411_v10 = vsel %vm1384_vm12, %v1378_v14, %v9396_v36  ;;  %9398 = vst [vmem:[#allocation206_spill] sm:$0xff] %v6696_v4  ;;  %v1247_v20 = vsel %vm1219_vm6, %v1214_v15, %v9401_v3  ;;  %v9406_v36 = vld [vmem:[#allocation135_spill] sm:$0xff] }
 0x38d   :  { %v1444_v34 = vsel %vm1417_vm11, %v1411_v10, %v6306_v6  ;;  %9402 = vst [vmem:[#allocation99_spill] sm:$0xff] %v6709_v13  ;;  %v1280_v6 = vsel %vm1252_vm7, %v1247_v20, %v9404_v54  ;;  %2345 = vrot.lane.b32.xlu1 %v6696_v4, %s3875_s29  ;;  %v2285_v10 = vrot.slane %v9406_v36, 2  ;;  %v2291_v20 = vrot.slane %v6010_v19, 2 }
 0x38e   :  { %v6693_v47 = vpop.permute.xlu0 %2147  ;;  %2353 = vrot.lane.b32.xlu2 %v6686_v62, %s3875_s29  ;;  %v1313_v14 = vsel %vm1285_vm9, %v1280_v6, %v9405_v28  ;;  %v2290_v54 = vrot.slane %v6094_v12, 2  ;;  %v9410_v6 = vld [vmem:[#allocation229_spill] sm:$0xff] }
 0x38f   :  { %9397 = vst [vmem:[#allocation213_spill] sm:$0xff] %v6693_v47  ;;  %v6744_v19 = vsel %vm408_vm4, %v2285_v10, %v2286_v60  ;;  %v9415_v47 = vld [vmem:[#allocation138_spill] sm:$0xff] }
 0x390   :  { %3723 = vmatmul.msk.f32.gmra.mxu2 %vm1455_vm13, %v1444_v34  ;;  %v6711_v43 = vpop.permute.xlu2 %2175  ;;  %v9407_v34 = vld [vmem:[#allocation197_spill] sm:$0xff]  ;;  %9412 = vst [vmem:[#allocation29_spill] sm:$0xff] %v6744_v19 }
 0x391   :  { %9403 = vst [vmem:[#allocation84_spill] sm:$0xff] %v6711_v43  ;;  %v1346_v42 = vsel %vm1318_vm8, %v1313_v14, %v9407_v34  ;;  %v6724_v30 = vpop.permute.xlu1 %2149  ;;  %v1669_v14 = vsel %vm1219_vm6, %v6468_v11, 0.0  ;;  %v9413_v11 = vld [vmem:[#allocation109_spill] sm:$0xff] }
 0x392   :  { %9408 = vst [vmem:[#allocation10_spill] sm:$0xff] %v6724_v30  ;;  %v1379_v15 = vsel %vm1351_vm10, %v1346_v42, %v9409_v56  ;;  %v1771_v30 = vsel %vm1219_vm6, %v1739_v27, 0.0  ;;  %v9419_v27 = vld [vmem:[#allocation187_spill] sm:$0xff] }
 0x393   :  { %v1412_v28 = vsel %vm1384_vm12, %v1379_v15, %v9410_v6  ;;  %v3784_v15 = vld [vmem:[#allocation2 + $0x18] sm:$0xff] }
 0x394   :  { %2349 = vrot.lane.b32.xlu0 %v6709_v13, %s3875_s29  ;;  %v1445_v56 = vsel %vm1417_vm11, %v1412_v28, %v6043_v29  ;;  %v9414_v6 = vld [vmem:[#allocation43_spill] sm:$0xff]  ;;  %v9418_v28 = vld [vmem:[#allocation154_spill] sm:$0xff] }
 0x395   :  { %v1576_v3 = vpop.f32.mrf.mxu0  ;;  %v1215_v43 = vsel %vm18_vm0, %v9414_v6, %v9413_v11  ;;  %2351 = vrot.lane.b32.xlu1 %v6744_v19, %s3875_s29  ;;  %v9421_v11 = vld [vmem:[#allocation11_spill] sm:$0xff]  ;;  %v6993_v13 = vld [vmem:[#allocation2 + $0x110] sm:$0xff] }
 0x396   :  { %v1670_v36 = vsel %vm1219_vm6, %v1576_v3, 0.0  ;;  %v1740_v34 = vmul.f32 %v1576_v3, %v1576_v3  ;;  %1842 = vst.msk [vmem:[%s8549_s2 + $0x8] sm:$0xff] %vm1219_vm6, %v1576_v3  ;;  %v6741_v42 = vpop.permute.xlu0 %2153  ;;  %2393 = vrot.lane.b32.xlu2 %v3784_v15, %s3876_s30  ;;  %v1248_v60 = vsel %vm1219_vm6, %v1215_v43, %v9415_v47  ;;  %v9420_v15 = vld [vmem:[#allocation247_spill] sm:$0xff] }
 0x397   :  { %9411 = vst [vmem:[#allocation100_spill] sm:$0xff] %v6741_v42  ;;  %v1671_v12 = vadd.f32 %v1670_v36, %v1669_v14  ;;  %v6758_v14 = vsel %vm408_vm4, %v2290_v54, %v2291_v20  ;;  %v1281_v36 = vsel %vm1252_vm7, %v1248_v60, %v9418_v28  ;;  %v3803_v42 = vld [vmem:[#allocation2 + $0xe0] sm:$0xff] }
 0x398   :  { %v1772_v3 = vsel %vm1219_vm6, %v1740_v34, 0.0  ;;  %3724 = vmatmul.msk.f32.gmra.mxu2 %vm1455_vm13, %v1445_v56  ;;  %9416 = vst [vmem:[#allocation224_spill] sm:$0xff] %v6758_v14  ;;  %v6760_v29 = vpop.permute.xlu2 %2181  ;;  %v1314_v34 = vsel %vm1285_vm9, %v1281_v36, %v9419_v27  ;;  %v2293_v56 = vrot.slane %v9420_v15, 2 }
 0x399   :  { %v1773_v10 = vadd.f32 %v1772_v3, %v1771_v30  ;;  %9417 = vst [vmem:[#allocation223_spill] sm:$0xff] %v6760_v29  ;;  %v1347_v47 = vsel %vm1318_vm8, %v1314_v34, %v9421_v11  ;;  %v6771_v43 = vpop.permute.xlu1 %2155  ;;  %v9423_v30 = vld [vmem:[#allocation51_spill] sm:$0xff] }
 0x39a   :  { %9422 = vst [vmem:[#allocation108_spill] sm:$0xff] %v6771_v43  ;;  %v1380_v54 = vsel %vm1351_vm10, %v1347_v47, %v9423_v30  ;;  %v9424_v3 = vld [vmem:[#allocation235_spill] sm:$0xff]  ;;  %v6787_v34 = vsel %vm408_vm4, %v2291_v20, %v2293_v56 }
 0x39b   :  { %v1413_v60 = vsel %vm1384_vm12, %v1380_v54, %v9424_v3  ;;  %9426 = vst [vmem:[#allocation150_spill] sm:$0xff] %v6787_v34  ;;  %v6791_v47 = vld [vmem:[#allocation2 + $0x38] sm:$0xff]  ;;  %v9428_v54 = vld [vmem:[#allocation41_spill] sm:$0xff]  ;;  %v6972_v43 = vld [vmem:[#allocation2 + $0xc0] sm:$0xff] }
 0x39c   :  { %2355 = vrot.lane.b32.xlu0 %v6758_v14, %s3875_s29  ;;  %v1446_v11 = vsel %vm1417_vm11, %v1413_v60, %v6322_v21  ;;  %v9427_v30 = vld [vmem:[#allocation95_spill] sm:$0xff]  ;;  %v9431_v21 = vld [vmem:[#allocation165_spill] sm:$0xff]  ;;  %v9455_v14 = vld [vmem:[#allocation190_spill] sm:$0xff]  ;;  %9473 = vst [vmem:[#allocation158_spill] sm:$0xff] %v6972_v43 }
 0x39d   :  { %v1579_v6 = vpop.f32.mrf.mxu0  ;;  %v1216_v3 = vsel %vm18_vm0, %v9428_v54, %v9427_v30  ;;  %v9429_v29 = vld [vmem:[#allocation19_spill] sm:$0xff]  ;;  %2357 = vrot.lane.b32.xlu1 %v6787_v34, %s3875_s29  ;;  %v9433_v30 = vld [vmem:[#allocation30_spill] sm:$0xff]  ;;  %9476 = vst [vmem:[#allocation211_spill] sm:$0xff] %v6993_v13 }
 0x39e   :  { %v1672_v28 = vsel %vm1219_vm6, %v1579_v6, 0.0  ;;  %v1741_v36 = vmul.f32 %v1579_v6, %v1579_v6  ;;  %1843 = vst.msk [vmem:[%s8549_s2 + $0x10] sm:$0xff] %vm1219_vm6, %v1579_v6  ;;  %v6784_v27 = vpop.permute.xlu0 %2159  ;;  %2399 = vrot.lane.b32.xlu2 %v6791_v47, %s3876_s30  ;;  %v1249_v20 = vsel %vm1219_vm6, %v1216_v3, %v9429_v29  ;;  %v6885_v34 = vld [vmem:[#allocation2 + $0x50] sm:$0xff] }
 0x39f   :  { %9425 = vst [vmem:[#allocation131_spill] sm:$0xff] %v6784_v27  ;;  %v1673_v15 = vadd.f32 %v1672_v28, %v1671_v12  ;;  %v1282_v60 = vsel %vm1252_vm7, %v1249_v20, %v9431_v21  ;;  %v9432_v28 = vld [vmem:[#allocation178_spill] sm:$0xff] }
 0x3a0   :  { %v1774_v6 = vsel %vm1219_vm6, %v1741_v36, 0.0  ;;  %3725 = vmatmul.msk.f32.gmra.mxu2 %vm1455_vm13, %v1446_v11  ;;  %v6802_v56 = vpop.permute.xlu2 %2299  ;;  %v1315_v38 = vsel %vm1285_vm9, %v1282_v60, %v9432_v28  ;;  %v3786_v11 = vld [vmem:[#allocation2 + $0x20] sm:$0xff] }
 0x3a1   :  { %v1775_v12 = vadd.f32 %v1774_v6, %v1773_v10  ;;  %9430 = vst [vmem:[#allocation147_spill] sm:$0xff] %v6802_v56  ;;  %v1348_v36 = vsel %vm1318_vm8, %v1315_v38, %v9433_v30  ;;  %v6812_v54 = vpop.permute.xlu1 %2161  ;;  %v9435_v10 = vld [vmem:[#allocation68_spill] sm:$0xff]  ;;  %v9436_v6 = vld [vmem:[#allocation209_spill] sm:$0xff] }
 0x3a2   :  { %9434 = vst [vmem:[#allocation77_spill] sm:$0xff] %v6812_v54  ;;  %v1381_v29 = vsel %vm1351_vm10, %v1348_v36, %v9435_v10  ;;  %v6828_v30 = vld [vmem:[#allocation2 + $0x60] sm:$0xff]  ;;  %v9438_v36 = vld [vmem:[#allocation110_spill] sm:$0xff] }
 0x3a3   :  { %v1414_v20 = vsel %vm1384_vm12, %v1381_v29, %v9436_v6 }
 0x3a4   :  { %2395 = vrot.lane.b32.xlu0 %v3786_v11, %s3876_s30  ;;  %v1447_v28 = vsel %vm1417_vm11, %v1414_v20, %v6369_v61  ;;  %v9439_v11 = vld [vmem:[#allocation46_spill] sm:$0xff]  ;;  %v9442_v61 = vld [vmem:[#allocation64_spill] sm:$0xff] }
 0x3a5   :  { %v1582_v3 = vpop.f32.mrf.mxu0  ;;  %v1217_v10 = vsel %vm18_vm0, %v9439_v11, %v9438_v36  ;;  %2397 = vrot.lane.b32.xlu1 %v6843_v23, %s3876_s30 }
 0x3a6   :  { %v1674_v21 = vsel %vm1219_vm6, %v1582_v3, 0.0  ;;  %v1742_v25 = vmul.f32 %v1582_v3, %v1582_v3  ;;  %1844 = vst.msk [vmem:[%s8549_s2 + $0x18] sm:$0xff] %vm1219_vm6, %v1582_v3  ;;  %v6824_v38 = vpop.permute.xlu0 %2165  ;;  %2405 = vrot.lane.b32.xlu2 %v6828_v30, %s3876_s30  ;;  %v9440_v3 = vld [vmem:[#allocation129_spill] sm:$0xff] }
 0x3a7   :  { %9437 = vst [vmem:[#allocation180_spill] sm:$0xff] %v6824_v38  ;;  %v1675_v60 = vadd.f32 %v1674_v21, %v1673_v15  ;;  %v1250_v6 = vsel %vm1219_vm6, %v1217_v10, %v9440_v3  ;;  %v9443_v38 = vld [vmem:[#allocation188_spill] sm:$0xff] }
 0x3a8   :  { %v1776_v29 = vsel %vm1219_vm6, %v1742_v25, 0.0  ;;  %3726 = vmatmul.msk.f32.gmra.mxu2 %vm1455_vm13, %v1447_v28  ;;  %v6839_v21 = vpop.permute.xlu2 %2305  ;;  %v1283_v20 = vsel %vm1252_vm7, %v1250_v6, %v9442_v61  ;;  %v9444_v25 = vld [vmem:[#allocation199_spill] sm:$0xff]  ;;  %v6853_v10 = vld [vmem:[#allocation2 + $0x48] sm:$0xff] }
 0x3a9   :  { %v1777_v15 = vadd.f32 %v1776_v29, %v1775_v12  ;;  %9441 = vst [vmem:[#allocation66_spill] sm:$0xff] %v6839_v21  ;;  %v1316_v36 = vsel %vm1285_vm9, %v1283_v20, %v9443_v38  ;;  %v6851_v11 = vpop.permute.xlu1 %2167  ;;  %v9446_v12 = vld [vmem:[#allocation208_spill] sm:$0xff]  ;;  %v9447_v6 = vld [vmem:[#allocation239_spill] sm:$0xff] }
 0x3aa   :  { %v1349_v28 = vsel %vm1318_vm8, %v1316_v36, %v9444_v25  ;;  %9445 = vst [vmem:[#allocation186_spill] sm:$0xff] %v6851_v11  ;;  %v6870_v11 = vld [vmem:[#allocation2 + $0x80] sm:$0xff] }
 0x3ab   :  { %v1382_v29 = vsel %vm1351_vm10, %v1349_v28, %v9446_v12  ;;  %9449 = vst [vmem:[#allocation27_spill] sm:$0xff] %v6870_v11  ;;  %v9450_v28 = vld [vmem:[#allocation112_spill] sm:$0xff] }
 0x3ac   :  { %2401 = vrot.lane.b32.xlu0 %v6853_v10, %s3876_s30  ;;  %v1415_v61 = vsel %vm1384_vm12, %v1382_v29, %v9447_v6  ;;  %v9451_v12 = vld [vmem:[#allocation44_spill] sm:$0xff] }
 0x3ad   :  { %v1585_v3 = vpop.f32.mrf.mxu0  ;;  %v1448_v25 = vsel %vm1417_vm11, %v1415_v61, %v6107_v48  ;;  %v1218_v29 = vsel %vm18_vm0, %v9451_v12, %v9450_v28  ;;  %v9454_v48 = vld [vmem:[#allocation156_spill] sm:$0xff]  ;;  %2403 = vrot.lane.b32.xlu1 %v6885_v34, %s3876_s30 }
 0x3ae   :  { %v1676_v54 = vsel %vm1219_vm6, %v1585_v3, 0.0  ;;  %v1743_v38 = vmul.f32 %v1585_v3, %v1585_v3  ;;  %1845 = vst.msk [vmem:[%s8549_s2 + $0x20] sm:$0xff] %vm1219_vm6, %v1585_v3  ;;  %v6866_v20 = vpop.permute.xlu0 %2171  ;;  %2411 = vrot.lane.b32.xlu2 %v6870_v11, %s3876_s30  ;;  %v9452_v3 = vld [vmem:[#allocation140_spill] sm:$0xff] }
 0x3af   :  { %9448 = vst [vmem:[#allocation200_spill] sm:$0xff] %v6866_v20  ;;  %v1677_v36 = vadd.f32 %v1676_v54, %v1675_v60  ;;  %v1251_v20 = vsel %vm1219_vm6, %v1218_v29, %v9452_v3  ;;  %v6895_v29 = vld [vmem:[#allocation2 + $0x68] sm:$0xff] }
 0x3b0   :  { %v1778_v6 = vsel %vm1219_vm6, %v1743_v38, 0.0  ;;  %3727 = vmatmul.msk.f32.gmra.mxu2 %vm1455_vm13, %v1448_v25  ;;  %v6881_v60 = vpop.permute.xlu2 %2311  ;;  %v1284_v61 = vsel %vm1252_vm7, %v1251_v20, %v9454_v48  ;;  %v9456_v38 = vld [vmem:[#allocation15_spill] sm:$0xff]  ;;  %v9459_v3 = vld [vmem:[#allocation132_spill] sm:$0xff] }
 0x3b1   :  { %v1779_v54 = vadd.f32 %v1778_v6, %v1777_v15  ;;  %9453 = vst [vmem:[#allocation22_spill] sm:$0xff] %v6881_v60  ;;  %v1317_v28 = vsel %vm1285_vm9, %v1284_v61, %v9455_v14  ;;  %v6893_v12 = vpop.permute.xlu1 %2173  ;;  %v9458_v15 = vld [vmem:[#allocation53_spill] sm:$0xff] }
 0x3b2   :  { %v1350_v25 = vsel %vm1318_vm8, %v1317_v28, %v9456_v38  ;;  %9457 = vst [vmem:[#allocation210_spill] sm:$0xff] %v6893_v12  ;;  %v6912_v12 = vld [vmem:[#allocation2 + $0xa8] sm:$0xff] }
 0x3b3   :  { %v1383_v20 = vsel %vm1351_vm10, %v1350_v25, %v9458_v15  ;;  %9461 = vst [vmem:[#allocation79_spill] sm:$0xff] %v6912_v12 }
 0x3b4   :  { %2407 = vrot.lane.b32.xlu0 %v6895_v29, %s3876_s30  ;;  %v1416_v48 = vsel %vm1384_vm12, %v1383_v20, %v9459_v3  ;;  %v6920_v3 = vld [vmem:[#allocation2 + $0x78] sm:$0xff] }
 0x3b5   :  { %v1588_v6 = vpop.f32.mrf.mxu0  ;;  %v1449_v38 = vsel %vm1417_vm11, %v1416_v48, %v6388_v1  ;;  %9463 = vst [vmem:[#allocation233_spill] sm:$0xff] %v6920_v3  ;;  %2409 = vrot.lane.b32.xlu1 %v6920_v3, %s3876_s30  ;;  %v6926_v1 = vld [vmem:[#allocation2 + $0x90] sm:$0xff] }
 0x3b6   :  { %v1678_v60 = vsel %vm1219_vm6, %v1588_v6, 0.0  ;;  %v1744_v14 = vmul.f32 %v1588_v6, %v1588_v6  ;;  %1846 = vst.msk [vmem:[%s8549_s2 + $0x28] sm:$0xff] %vm1219_vm6, %v1588_v6  ;;  %v6908_v61 = vpop.permute.xlu0 %2177  ;;  %2417 = vrot.lane.b32.xlu2 %v6912_v12, %s3876_s30 }
 0x3b7   :  { %9460 = vst [vmem:[#allocation221_spill] sm:$0xff] %v6908_v61  ;;  %v1679_v28 = vadd.f32 %v1678_v60, %v1677_v36 }
 0x3b8   :  { %v1780_v25 = vsel %vm1219_vm6, %v1744_v14, 0.0  ;;  %3728 = vmatmul.msk.f32.gmra.mxu2 %vm1455_vm13, %v1449_v38  ;;  %v6918_v20 = vpop.permute.xlu2 %2317  ;;  %9465 = vst [vmem:[#allocation25_spill] sm:$0xff] %v6926_v1  ;;  %v6937_v38 = vld [vmem:[#allocation2 + $0xc8] sm:$0xff] }
 0x3b9   :  { %v1781_v15 = vadd.f32 %v1780_v25, %v1779_v54  ;;  %9462 = vst [vmem:[#allocation142_spill] sm:$0xff] %v6918_v20  ;;  %v6924_v36 = vpop.permute.xlu1 %2179  ;;  %v6944_v20 = vld [vmem:[#allocation2 + $0x98] sm:$0xff] }
 0x3ba   :  { %9464 = vst [vmem:[#allocation81_spill] sm:$0xff] %v6924_v36 }
 0x3bb   :  { %9467 = vst [vmem:[#allocation14_spill] sm:$0xff] %v6937_v38 }
 0x3bc   :  { %2413 = vrot.lane.b32.xlu0 %v6926_v1, %s3876_s30  ;;  %9469 = vst [vmem:[#allocation234_spill] sm:$0xff] %v6944_v20 }
 0x3bd   :  { %v1591_v60 = vpop.f32.mrf.mxu0  ;;  %2415 = vrot.lane.b32.xlu1 %v6944_v20, %s3876_s30  ;;  %v9508_v20 = vld [vmem:[#allocation222_spill] sm:$0xff] }
 0x3be   :  { %v1680_v6 = vsel %vm1219_vm6, %v1591_v60, 0.0  ;;  %v1745_v48 = vmul.f32 %v1591_v60, %v1591_v60  ;;  %1847 = vst.msk [vmem:[%s8549_s2 + $0x30] sm:$0xff] %vm1219_vm6, %v1591_v60  ;;  %v6935_v54 = vpop.permute.xlu0 %2295  ;;  %2423 = vrot.lane.b32.xlu2 %v6937_v38, %s3876_s30 }
 0x3bf   :  { %9466 = vst [vmem:[#allocation87_spill] sm:$0xff] %v6935_v54  ;;  %v1681_v14 = vadd.f32 %v1680_v6, %v1679_v28  ;;  %v3798_v28 = vld [vmem:[#allocation2 + $0xb0] sm:$0xff] }
 0x3c0   :  { %v1782_v25 = vsel %vm1219_vm6, %v1745_v48, 0.0  ;;  %v6942_v61 = vpop.permute.xlu2 %2323  ;;  %v3813_v54 = vld [vmem:[#allocation2 + $0x170] sm:$0xff] }
 0x3c1   :  { %v1783_v36 = vadd.f32 %v1782_v25, %v1781_v15  ;;  %9468 = vst [vmem:[#allocation218_spill] sm:$0xff] %v6942_v61  ;;  %v6950_v60 = vpop.permute.xlu1 %2297 }
 0x3c2   :  { %9470 = vst [vmem:[#allocation122_spill] sm:$0xff] %v6950_v60  ;;  %v7090_v60 = vld [vmem:[#allocation2 + $0x150] sm:$0xff] }
 0x3c3   :  { %v6948_v27 = vpop.f32.mrf.mxu2  ;;  %9493 = vst [vmem:[#allocation181_spill] sm:$0xff] %v7090_v60 }
 0x3c4   :  { %1857 = vst.msk [vmem:[%s8549_s2 + $0x80] sm:$0xff] %vm1219_vm6, %v6948_v27  ;;  %2419 = vrot.lane.b32.xlu0 %v3798_v28, %s3876_s30 }
 0x3c5   :  { %v1594_v15 = vpop.f32.mrf.mxu0  ;;  %2421 = vrot.lane.b32.xlu1 %v6972_v43, %s3876_s30  ;;  %v7028_v43 = vld [vmem:[#allocation2 + $0x108] sm:$0xff] }
 0x3c6   :  { %v1682_v6 = vsel %vm1219_vm6, %v1594_v15, 0.0  ;;  %v1746_v48 = vmul.f32 %v1594_v15, %v1594_v15  ;;  %1848 = vst.msk [vmem:[%s8549_s2 + $0x38] sm:$0xff] %vm1219_vm6, %v1594_v15  ;;  %v6963_v25 = vpop.permute.xlu0 %2301  ;;  %2429 = vrot.lane.b32.xlu2 %v6965_v39, %s3876_s30 }
 0x3c7   :  { %9471 = vst [vmem:[#allocation133_spill] sm:$0xff] %v6963_v25  ;;  %v1683_v61 = vadd.f32 %v1682_v6, %v1681_v14  ;;  %v3801_v14 = vld [vmem:[#allocation2 + $0xd8] sm:$0xff] }
 0x3c8   :  { %v1784_v62 = vsel %vm1219_vm6, %v1746_v48, 0.0  ;;  %v6970_v19 = vpop.permute.xlu2 %2329  ;;  %9482 = vst [vmem:[#allocation90_spill] sm:$0xff] %v7028_v43 }
 0x3c9   :  { %v1785_v28 = vadd.f32 %v1784_v62, %v1783_v36  ;;  %9472 = vst [vmem:[#allocation139_spill] sm:$0xff] %v6970_v19  ;;  %v6978_v15 = vpop.permute.xlu1 %2303 }
 0x3ca   :  { %9474 = vst [vmem:[#allocation173_spill] sm:$0xff] %v6978_v15 }
 0x3cb   :  { %v6976_v21 = vpop.f32.mrf.mxu2 }
 0x3cc   :  { %1858 = vst.msk [vmem:[%s8549_s2 + $0x88] sm:$0xff] %vm1219_vm6, %v6976_v21  ;;  %2425 = vrot.lane.b32.xlu0 %v3801_v14, %s3876_s30  ;;  %v1756_v11 = vmul.f32 %v6976_v21, %v6976_v21 }
 0x3cd   :  { %v1597_v62 = vpop.f32.mrf.mxu0  ;;  %2427 = vrot.lane.b32.xlu1 %v3803_v42, %s3876_s30 }
 0x3ce   :  { %v1684_v36 = vsel %vm1219_vm6, %v1597_v62, 0.0  ;;  %v1747_v6 = vmul.f32 %v1597_v62, %v1597_v62  ;;  %1849 = vst.msk [vmem:[%s8549_s2 + $0x40] sm:$0xff] %vm1219_vm6, %v1597_v62  ;;  %v6991_v48 = vpop.permute.xlu0 %2307  ;;  %2435 = vrot.lane.b32.xlu2 %v6993_v13, %s3876_s30 }
 0x3cf   :  { %9475 = vst [vmem:[#allocation171_spill] sm:$0xff] %v6991_v48  ;;  %v1685_v32 = vadd.f32 %v1684_v36, %v1683_v61  ;;  %v7010_v61 = vld [vmem:[#allocation2 + $0xf8] sm:$0xff] }
 0x3d0   :  { %v1786_v19 = vsel %vm1219_vm6, %v1747_v6, 0.0  ;;  %v6998_v38 = vpop.permute.xlu2 %2335  ;;  %v7021_v6 = vld [vmem:[#allocation2 + $0x138] sm:$0xff] }
 0x3d1   :  { %v1787_v14 = vadd.f32 %v1786_v19, %v1785_v28  ;;  %9477 = vst [vmem:[#allocation193_spill] sm:$0xff] %v6998_v38  ;;  %v7003_v12 = vpop.permute.xlu1 %2309 }
 0x3d2   :  { %9478 = vst [vmem:[#allocation201_spill] sm:$0xff] %v7003_v12 }
 0x3d3   :  { %v7001_v15 = vpop.f32.mrf.mxu2  ;;  %9480 = vst [vmem:[#allocation56_spill] sm:$0xff] %v7021_v6 }
 0x3d4   :  { %1859 = vst.msk [vmem:[%s8549_s2 + $0x90] sm:$0xff] %vm1219_vm6, %v7001_v15  ;;  %2431 = vrot.lane.b32.xlu0 %v7010_v61, %s3876_s30 }
 0x3d5   :  { %v1600_v19 = vpop.f32.mrf.mxu0  ;;  %2433 = vrot.lane.b32.xlu1 %v7028_v43, %s3876_s30 }
 0x3d6   :  { %v1686_v28 = vsel %vm1219_vm6, %v1600_v19, 0.0  ;;  %v1748_v62 = vmul.f32 %v1600_v19, %v1600_v19  ;;  %1850 = vst.msk [vmem:[%s8549_s2 + $0x48] sm:$0xff] %vm1219_vm6, %v1600_v19  ;;  %v7019_v42 = vpop.permute.xlu0 %2313  ;;  %2441 = vrot.lane.b32.xlu2 %v7021_v6, %s3876_s30  ;;  %v7059_v6 = vld [vmem:[#allocation2 + $0x128] sm:$0xff] }
 0x3d7   :  { %9479 = vst [vmem:[#allocation23_spill] sm:$0xff] %v7019_v42  ;;  %v1687_v36 = vadd.f32 %v1686_v28, %v1685_v32  ;;  %v7041_v32 = vld [vmem:[#allocation2 + $0x120] sm:$0xff] }
 0x3d8   :  { %v1788_v38 = vsel %vm1219_vm6, %v1748_v62, 0.0  ;;  %v7026_v48 = vpop.permute.xlu2 %2341  ;;  %9484 = vst [vmem:[#allocation65_spill] sm:$0xff] %v7041_v32 }
 0x3d9   :  { %v1789_v12 = vadd.f32 %v1788_v38, %v1787_v14  ;;  %9481 = vst [vmem:[#allocation231_spill] sm:$0xff] %v7026_v48  ;;  %v7034_v19 = vpop.permute.xlu1 %2315 }
 0x3da   :  { %9483 = vst [vmem:[#allocation67_spill] sm:$0xff] %v7034_v19  ;;  %v7052_v19 = vld [vmem:[#allocation2 + $0x158] sm:$0xff] }
 0x3db   :  { %v7032_v25 = vpop.f32.mrf.mxu2  ;;  %9486 = vst [vmem:[#allocation101_spill] sm:$0xff] %v7052_v19 }
 0x3dc   :  { %1860 = vst.msk [vmem:[%s8549_s2 + $0x98] sm:$0xff] %vm1219_vm6, %v7032_v25  ;;  %2437 = vrot.lane.b32.xlu0 %v7041_v32, %s3876_s30 }
 0x3dd   :  { %v1603_v38 = vpop.f32.mrf.mxu0  ;;  %9488 = vst [vmem:[#allocation124_spill] sm:$0xff] %v7059_v6  ;;  %2439 = vrot.lane.b32.xlu1 %v7059_v6, %s3876_s30 }
 0x3de   :  { %v1688_v14 = vsel %vm1219_vm6, %v1603_v38, 0.0  ;;  %v1749_v28 = vmul.f32 %v1603_v38, %v1603_v38  ;;  %1851 = vst.msk [vmem:[%s8549_s2 + $0x50] sm:$0xff] %vm1219_vm6, %v1603_v38  ;;  %v7050_v62 = vpop.permute.xlu0 %2319  ;;  %2447 = vrot.lane.b32.xlu2 %v7052_v19, %s3876_s30 }
 0x3df   :  { %9485 = vst [vmem:[#allocation13_spill] sm:$0xff] %v7050_v62  ;;  %v1689_v48 = vadd.f32 %v1688_v14, %v1687_v36  ;;  %v7072_v36 = vld [vmem:[#allocation2 + $0x140] sm:$0xff] }
 0x3e0   :  { %v1790_v42 = vsel %vm1219_vm6, %v1749_v28, 0.0  ;;  %v7057_v4 = vpop.permute.xlu2 %2347  ;;  %9490 = vst [vmem:[#allocation151_spill] sm:$0xff] %v7072_v36 }
 0x3e1   :  { %v1791_v50 = vadd.f32 %v1790_v42, %v1789_v12  ;;  %9487 = vst [vmem:[#allocation26_spill] sm:$0xff] %v7057_v4  ;;  %v7065_v38 = vpop.permute.xlu1 %2321  ;;  %v7076_v12 = vld [vmem:[#allocation2 + $0x180] sm:$0xff] }
 0x3e2   :  { %9489 = vst [vmem:[#allocation120_spill] sm:$0xff] %v7065_v38 }
 0x3e3   :  { %v7063_v56 = vpop.f32.mrf.mxu2 }
 0x3e4   :  { %1861 = vst.msk [vmem:[%s8549_s2 + $0xa0] sm:$0xff] %vm1219_vm6, %v7063_v56  ;;  %2443 = vrot.lane.b32.xlu0 %v7072_v36, %s3876_s30 }
 0x3e5   :  { %v1606_v42 = vpop.f32.mrf.mxu0  ;;  %2445 = vrot.lane.b32.xlu1 %v7090_v60, %s3876_s30 }
 0x3e6   :  { %v1690_v14 = vsel %vm1219_vm6, %v1606_v42, 0.0  ;;  %v1750_v28 = vmul.f32 %v1606_v42, %v1606_v42  ;;  %1852 = vst.msk [vmem:[%s8549_s2 + $0x58] sm:$0xff] %vm1219_vm6, %v1606_v42  ;;  %v7083_v4 = vpop.permute.xlu0 %2325  ;;  %2453 = vrot.lane.b32.xlu2 %v7076_v12, %s3876_s30 }
 0x3e7   :  { %9491 = vst [vmem:[#allocation160_spill] sm:$0xff] %v7083_v4  ;;  %v1691_v62 = vadd.f32 %v1690_v14, %v1689_v48  ;;  %v3812_v48 = vld [vmem:[#allocation2 + $0x168] sm:$0xff] }
 0x3e8   :  { %v1792_v19 = vsel %vm1219_vm6, %v1750_v28, 0.0  ;;  %v7088_v6 = vpop.permute.xlu2 %2353 }
 0x3e9   :  { %v1793_v36 = vadd.f32 %v1792_v19, %v1791_v50  ;;  %9492 = vst [vmem:[#allocation166_spill] sm:$0xff] %v7088_v6  ;;  %v7096_v1 = vpop.permute.xlu1 %2327  ;;  %v9496_v6 = vld [vmem:[#allocation220_spill] sm:$0xff] }
 0x3ea   :  { %9494 = vst [vmem:[#allocation217_spill] sm:$0xff] %v7096_v1  ;;  %v7114_v1 = vld [vmem:[#allocation2 + $0x188] sm:$0xff] }
 0x3eb   :  { %v7094_v5 = vpop.f32.mrf.mxu2 }
 0x3ec   :  { %1862 = vst.msk [vmem:[%s8549_s2 + $0xa8] sm:$0xff] %vm1219_vm6, %v7094_v5  ;;  %2449 = vrot.lane.b32.xlu0 %v3812_v48, %s3876_s30 }
 0x3ed   :  { %v1609_v50 = vpop.f32.mrf.mxu0  ;;  %2451 = vrot.lane.b32.xlu1 %v3813_v54, %s3876_s30 }
 0x3ee   :  { %v1692_v19 = vsel %vm1219_vm6, %v1609_v50, 0.0  ;;  %v1751_v42 = vmul.f32 %v1609_v50, %v1609_v50  ;;  %1853 = vst.msk [vmem:[%s8549_s2 + $0x60] sm:$0xff] %vm1219_vm6, %v1609_v50  ;;  %v7109_v14 = vpop.permute.xlu0 %2331  ;;  %2497 = vrot.lane.b32.xlu2 %v9496_v6, %s3877_s10  ;;  %v9500_v50 = vld [vmem:[#allocation230_spill] sm:$0xff] }
 0x3ef   :  { %9495 = vst [vmem:[#allocation195_spill] sm:$0xff] %v7109_v14  ;;  %v1693_v28 = vadd.f32 %v1692_v19, %v1691_v62  ;;  %v9502_v14 = vld [vmem:[#allocation214_spill] sm:$0xff] }
 0x3f0   :  { %v1794_v4 = vsel %vm1219_vm6, %v1751_v42, 0.0  ;;  %v7116_v48 = vpop.permute.xlu2 %2393 }
 0x3f1   :  { %v1795_v60 = vadd.f32 %v1794_v4, %v1793_v36  ;;  %9497 = vst [vmem:[#allocation192_spill] sm:$0xff] %v7116_v48  ;;  %v7121_v55 = vpop.permute.xlu1 %2333 }
 0x3f2   :  { %9498 = vst [vmem:[#allocation42_spill] sm:$0xff] %v7121_v55 }
 0x3f3   :  { %v7119_v7 = vpop.f32.mrf.mxu2 }
 0x3f4   :  { %1863 = vst.msk [vmem:[%s8549_s2 + $0xb0] sm:$0xff] %vm1219_vm6, %v7119_v7  ;;  %2455 = vrot.lane.b32.xlu0 %v7114_v1, %s3876_s30 }
 0x3f5   :  { %v1612_v4 = vpop.f32.mrf.mxu0  ;;  %2495 = vrot.lane.b32.xlu1 %v9502_v14, %s3877_s10 }
 0x3f6   :  { %v1694_v6 = vsel %vm1219_vm6, %v1612_v4, 0.0  ;;  %v1752_v62 = vmul.f32 %v1612_v4, %v1612_v4  ;;  %1854 = vst.msk [vmem:[%s8549_s2 + $0x68] sm:$0xff] %vm1219_vm6, %v1612_v4  ;;  %v7135_v54 = vpop.permute.xlu0 %2337  ;;  %2503 = vrot.lane.b32.xlu2 %v9500_v50, %s3877_s10 }
 0x3f7   :  { %9499 = vst [vmem:[#allocation204_spill] sm:$0xff] %v7135_v54  ;;  %v1695_v36 = vadd.f32 %v1694_v6, %v1693_v28  ;;  %v9504_v28 = vld [vmem:[#allocation62_spill] sm:$0xff] }
 0x3f8   :  { %v1796_v19 = vsel %vm1219_vm6, %v1752_v62, 0.0  ;;  %v7140_v55 = vpop.permute.xlu2 %2399 }
 0x3f9   :  { %v1797_v42 = vadd.f32 %v1796_v19, %v1795_v60  ;;  %9501 = vst [vmem:[#allocation227_spill] sm:$0xff] %v7140_v55  ;;  %v7146_v38 = vpop.permute.xlu1 %2339  ;;  %v9506_v19 = vld [vmem:[#allocation240_spill] sm:$0xff] }
 0x3fa   :  { %9503 = vst [vmem:[#allocation73_spill] sm:$0xff] %v7146_v38 }
 0x3fb   :  { %v7144_v48 = vpop.f32.mrf.mxu2 }
 0x3fc   :  { %1864 = vst.msk [vmem:[%s8549_s2 + $0xb8] sm:$0xff] %vm1219_vm6, %v7144_v48  ;;  %2499 = vrot.lane.b32.xlu0 %v9504_v28, %s3877_s10 }
 0x3fd   :  { %v1615_v4 = vpop.f32.mrf.mxu0  ;;  %2501 = vrot.lane.b32.xlu1 %v9508_v20, %s3877_s10 }
 0x3fe   :  { %v1696_v60 = vsel %vm1219_vm6, %v1615_v4, 0.0  ;;  %v1753_v6 = vmul.f32 %v1615_v4, %v1615_v4  ;;  %1855 = vst.msk [vmem:[%s8549_s2 + $0x70] sm:$0xff] %vm1219_vm6, %v1615_v4  ;;  %v7160_v14 = vpop.permute.xlu0 %2343  ;;  %2509 = vrot.lane.b32.xlu2 %v9506_v19, %s3877_s10 }
 0x3ff   :  { %9505 = vst [vmem:[#allocation207_spill] sm:$0xff] %v7160_v14  ;;  %v1697_v62 = vadd.f32 %v1696_v60, %v1695_v36  ;;  %v9510_v36 = vld [vmem:[#allocation216_spill] sm:$0xff] }
 0x400   :  { %v1798_v38 = vsel %vm1219_vm6, %v1753_v6, 0.0  ;;  %v7165_v55 = vpop.permute.xlu2 %2405  ;;  %v9512_v14 = vld [vmem:[#allocation244_spill] sm:$0xff] }
 0x401   :  { %v1799_v54 = vadd.f32 %v1798_v38, %v1797_v42  ;;  %9507 = vst [vmem:[#allocation212_spill] sm:$0xff] %v7165_v55  ;;  %v7171_v32 = vpop.permute.xlu1 %2345  ;;  %v1755_v38 = vmul.f32 %v6948_v27, %v6948_v27  ;;  %v1700_v55 = vsel %vm1219_vm6, %v6948_v27, 0.0 }
 0x402   :  { %9509 = vst [vmem:[#allocation89_spill] sm:$0xff] %v7171_v32 }
 0x403   :  { %v7169_v22 = vpop.f32.mrf.mxu2 }
 0x404   :  { %1865 = vst.msk [vmem:[%s8549_s2 + $0xc0] sm:$0xff] %vm1219_vm6, %v7169_v22  ;;  %2505 = vrot.lane.b32.xlu0 %v9510_v36, %s3877_s10 }
 0x405   :  { %v1618_v4 = vpop.f32.mrf.mxu0 }
 0x406   :  { %v1698_v42 = vsel %vm1219_vm6, %v1618_v4, 0.0  ;;  %v1754_v60 = vmul.f32 %v1618_v4, %v1618_v4  ;;  %1856 = vst.msk [vmem:[%s8549_s2 + $0x78] sm:$0xff] %vm1219_vm6, %v1618_v4  ;;  %v7187_v6 = vpop.permute.xlu0 %2349  ;;  %2515 = vrot.lane.b32.xlu2 %v9512_v14, %s3877_s10  ;;  %v1802_v4 = vsel %vm1219_vm6, %v1755_v38, 0.0 }
 0x407   :  { %9511 = vst [vmem:[#allocation20_spill] sm:$0xff] %v7187_v6  ;;  %v1699_v32 = vadd.f32 %v1698_v42, %v1697_v62  ;;  %v1702_v62 = vsel %vm1219_vm6, %v6976_v21, 0.0  ;;  %v1757_v42 = vmul.f32 %v7001_v15, %v7001_v15  ;;  %v9514_v6 = vld [vmem:[#allocation232_spill] sm:$0xff]  ;;  %v9516_v21 = vld [vmem:[#allocation226_spill] sm:$0xff] }
 0x408   :  { %v1800_v58 = vsel %vm1219_vm6, %v1754_v60, 0.0  ;;  %v7196_v43 = vpop.permute.xlu2 %2411  ;;  %2507 = vrot.lane.b32.xlu1 %v9514_v6, %s3877_s10  ;;  %v1804_v60 = vsel %vm1219_vm6, %v1756_v11, 0.0 }
 0x409   :  { %v1701_v24 = vadd.f32 %v1700_v55, %v1699_v32  ;;  %v1801_v13 = vadd.f32 %v1800_v58, %v1799_v54  ;;  %9513 = vst [vmem:[#allocation103_spill] sm:$0xff] %v7196_v43  ;;  %v1704_v55 = vsel %vm1219_vm6, %v7001_v15, 0.0  ;;  %v1758_v58 = vmul.f32 %v7032_v25, %v7032_v25  ;;  %v7210_v32 = vpop.permute.xlu1 %2351 }
 0x40a   :  { %9515 = vst [vmem:[#allocation32_spill] sm:$0xff] %v7210_v32  ;;  %v1806_v11 = vsel %vm1219_vm6, %v1757_v42, 0.0  ;;  %v1706_v15 = vsel %vm1219_vm6, %v7032_v25, 0.0  ;;  %v1759_v54 = vmul.f32 %v7063_v56, %v7063_v56  ;;  %v9518_v32 = vld [vmem:[#allocation245_spill] sm:$0xff]  ;;  %v1760_v42 = vmul.f32 %v7094_v5, %v7094_v5 }
 0x40b   :  { %v1703_v27 = vadd.f32 %v1702_v62, %v1701_v24  ;;  %v1803_v14 = vadd.f32 %v1802_v4, %v1801_v13  ;;  %v1648_v3 = vpop.f32.mrf.mxu2  ;;  %v1808_v43 = vsel %vm1219_vm6, %v1758_v58, 0.0  ;;  %v9520_v58 = vld [vmem:[#allocation113_spill] sm:$0xff] }
 0x40c   :  { %1866 = vst.msk [vmem:[%s8549_s2 + $0xc8] sm:$0xff] %vm1219_vm6, %v1648_v3  ;;  %2511 = vrot.lane.b32.xlu0 %v9516_v21, %s3877_s10 }
 0x40d   :  { %v1705_v24 = vadd.f32 %v1704_v55, %v1703_v27  ;;  %v1805_v13 = vadd.f32 %v1804_v60, %v1803_v14  ;;  %v1708_v14 = vsel %vm1219_vm6, %v7063_v56, 0.0  ;;  %v1810_v55 = vsel %vm1219_vm6, %v1759_v54, 0.0 }
 0x40e   :  { %v7223_v38 = vpop.permute.xlu0 %2355  ;;  %2521 = vrot.lane.b32.xlu2 %v9518_v32, %s3877_s10  ;;  %v1762_v54 = vmul.f32 %v7144_v48, %v7144_v48  ;;  %v1718_v32 = vsel %vm1219_vm6, %v1648_v3, 0.0 }
 0x40f   :  { %9517 = vst [vmem:[#allocation238_spill] sm:$0xff] %v7223_v38  ;;  %v1707_v4 = vadd.f32 %v1706_v15, %v1705_v24  ;;  %v1807_v62 = vadd.f32 %v1806_v11, %v1805_v13  ;;  %v1710_v24 = vsel %vm1219_vm6, %v7094_v5, 0.0  ;;  %v1761_v13 = vmul.f32 %v7119_v7, %v7119_v7  ;;  %v9522_v5 = vld [vmem:[#allocation236_spill] sm:$0xff] }
 0x410   :  { %v7232_v60 = vpop.permute.xlu2 %2417  ;;  %2513 = vrot.lane.b32.xlu1 %v9520_v58, %s3877_s10  ;;  %v1812_v38 = vsel %vm1219_vm6, %v1760_v42, 0.0 }
 0x411   :  { %v1709_v27 = vadd.f32 %v1708_v14, %v1707_v4  ;;  %v1809_v25 = vadd.f32 %v1808_v43, %v1807_v62  ;;  %9519 = vst [vmem:[#allocation111_spill] sm:$0xff] %v7232_v60  ;;  %v1712_v43 = vsel %vm1219_vm6, %v7119_v7, 0.0  ;;  %v7246_v4 = vpop.permute.xlu1 %2357  ;;  %v1814_v42 = vsel %vm1219_vm6, %v1761_v13, 0.0 }
 0x412   :  { %9521 = vst [vmem:[#allocation134_spill] sm:$0xff] %v7246_v4  ;;  %v1714_v7 = vsel %vm1219_vm6, %v7144_v48, 0.0  ;;  %v9523_v4 = vld [vmem:[#allocation246_spill] sm:$0xff]  ;;  %v1816_v60 = vsel %vm1219_vm6, %v1762_v54, 0.0 }
 0x413   :  { %v1811_v11 = vadd.f32 %v1810_v55, %v1809_v25  ;;  %v1711_v56 = vadd.f32 %v1710_v24, %v1709_v27  ;;  %v1651_v15 = vpop.f32.mrf.mxu2  ;;  %v1763_v27 = vmul.f32 %v7169_v22, %v7169_v22 }
 0x414   :  { %1867 = vst.msk [vmem:[%s8549_s2 + $0xd0] sm:$0xff] %vm1219_vm6, %v1651_v15  ;;  %2517 = vrot.lane.b32.xlu0 %v9522_v5, %s3877_s10  ;;  %v1765_v5 = vmul.f32 %v1651_v15, %v1651_v15 }
 0x415   :  { %v1713_v62 = vadd.f32 %v1712_v43, %v1711_v56  ;;  %v1813_v14 = vadd.f32 %v1812_v38, %v1811_v11  ;;  %v1716_v38 = vsel %vm1219_vm6, %v7169_v22, 0.0  ;;  %v1764_v11 = vmul.f32 %v1648_v3, %v1648_v3  ;;  %v9526_v3 = vld [vmem:[#allocation69_spill] sm:$0xff] }
 0x416   :  { %v7259_v25 = vpop.permute.xlu0 %2395  ;;  %2527 = vrot.lane.b32.xlu2 %v9523_v4, %s3877_s10  ;;  %v1818_v48 = vsel %vm1219_vm6, %v1763_v27, 0.0  ;;  %v1720_v22 = vsel %vm1219_vm6, %v1651_v15, 0.0 }
 0x417   :  { %v1715_v55 = vadd.f32 %v1714_v7, %v1713_v62  ;;  %v1815_v24 = vadd.f32 %v1814_v42, %v1813_v14  ;;  %v9525_v62 = vld [vmem:[#allocation71_spill] sm:$0xff]  ;;  %v1820_v54 = vsel %vm1219_vm6, %v1764_v11, 0.0 }
 0x418   :  { %v7266_v43 = vpop.permute.xlu2 %2423  ;;  %2519 = vrot.lane.b32.xlu1 %v9525_v62, %s3877_s10 }
 0x419   :  { %v1717_v13 = vadd.f32 %v1716_v38, %v1715_v55  ;;  %v1817_v56 = vadd.f32 %v1816_v60, %v1815_v24  ;;  %9524 = vst [vmem:[#allocation49_spill] sm:$0xff] %v7266_v43  ;;  %v7274_v4 = vpop.permute.xlu1 %2397 }
 0x41b   :  { %v1719_v14 = vadd.f32 %v1718_v32, %v1717_v13  ;;  %v1819_v42 = vadd.f32 %v1818_v48, %v1817_v56  ;;  %v1654_v7 = vpop.f32.mrf.mxu2  ;;  %v1822_v32 = vsel %vm1219_vm6, %v1765_v5, 0.0  ;;  %v9527_v13 = vld [vmem:[#allocation170_spill] sm:$0xff] }
 0x41c   :  { %v1766_v60 = vmul.f32 %v1654_v7, %v1654_v7  ;;  %1868 = vst.msk [vmem:[%s8549_s2 + $0xd8] sm:$0xff] %vm1219_vm6, %v1654_v7  ;;  %2523 = vrot.lane.b32.xlu0 %v9526_v3, %s3877_s10  ;;  %v1722_v24 = vsel %vm1219_vm6, %v1654_v7, 0.0  ;;  %v9529_v3 = vld [vmem:[#allocation8_spill] sm:$0xff] }
 0x41d   :  { %v1821_v27 = vadd.f32 %v1820_v54, %v1819_v42  ;;  %v1721_v55 = vadd.f32 %v1720_v22, %v1719_v14  ;;  %v9531_v54 = vld [vmem:[#allocation115_spill] sm:$0xff] }
 0x41e   :  { %v7284_v38 = vpop.permute.xlu0 %2401  ;;  %2533 = vrot.lane.b32.xlu2 %v9527_v13, %s3877_s10  ;;  %v1824_v56 = vsel %vm1219_vm6, %v1766_v60, 0.0 }
 0x41f   :  { %v1823_v15 = vadd.f32 %v1822_v32, %v1821_v27  ;;  %v1723_v11 = vadd.f32 %v1722_v24, %v1721_v55  ;;  %v9534_v24 = vld [vmem:[#allocation55_spill] sm:$0xff] }
 0x420   :  { %v7289_v43 = vpop.permute.xlu2 %2429  ;;  %2525 = vrot.lane.b32.xlu1 %v9529_v3, %s3877_s10 }
 0x421   :  { %v1825_v48 = vadd.f32 %v1824_v56, %v1823_v15  ;;  %9528 = vst [vmem:[#allocation149_spill] sm:$0xff] %v7289_v43  ;;  %v7293_v42 = vpop.permute.xlu1 %2403 }
 0x422   :  { %9530 = vst [vmem:[#allocation174_spill] sm:$0xff] %v7293_v42 }
 0x423   :  { %v1657_v14 = vpop.f32.mrf.mxu2 }
 0x424   :  { %v1724_v5 = vsel %vm1219_vm6, %v1657_v14, 0.0  ;;  %v1767_v7 = vmul.f32 %v1657_v14, %v1657_v14  ;;  %1869 = vst.msk [vmem:[%s8549_s2 + $0xe0] sm:$0xff] %vm1219_vm6, %v1657_v14  ;;  %2529 = vrot.lane.b32.xlu0 %v9531_v54, %s3877_s10 }
 0x425   :  { %v1725_v22 = vadd.f32 %v1724_v5, %v1723_v11  ;;  %v9536_v11 = vld [vmem:[#allocation102_spill] sm:$0xff] }
 0x426   :  { %v1826_v60 = vsel %vm1219_vm6, %v1767_v7, 0.0  ;;  %v7303_v27 = vpop.permute.xlu0 %2407  ;;  %2539 = vrot.lane.b32.xlu2 %v6019_v53, %s3877_s10 }
 0x427   :  { %9532 = vst [vmem:[#allocation182_spill] sm:$0xff] %v7303_v27  ;;  %v1827_v55 = vadd.f32 %v1826_v60, %v1825_v48 }
 0x428   :  { %v7307_v32 = vpop.permute.xlu2 %2435  ;;  %2531 = vrot.lane.b32.xlu1 %v9534_v24, %s3877_s10 }
 0x429   :  { %9533 = vst [vmem:[#allocation228_spill] sm:$0xff] %v7307_v32  ;;  %v7311_v56 = vpop.permute.xlu1 %2409 }
 0x42a   :  { %9535 = vst [vmem:[#allocation189_spill] sm:$0xff] %v7311_v56  ;;  %v9539_v56 = vld [vmem:[#allocation118_spill] sm:$0xff] }
 0x42b   :  { %v1660_v15 = vpop.f32.mrf.mxu2 }
 0x42c   :  { %v1726_v14 = vsel %vm1219_vm6, %v1660_v15, 0.0  ;;  %v1768_v54 = vmul.f32 %v1660_v15, %v1660_v15  ;;  %1870 = vst.msk [vmem:[%s8549_s2 + $0xe8] sm:$0xff] %vm1219_vm6, %v1660_v15  ;;  %2535 = vrot.lane.b32.xlu0 %v9536_v11, %s3877_s10 }
 0x42d   :  { %v1727_v48 = vadd.f32 %v1726_v14, %v1725_v22 }
 0x42e   :  { %v1828_v5 = vsel %vm1219_vm6, %v1768_v54, 0.0  ;;  %v7321_v7 = vpop.permute.xlu0 %2413  ;;  %2545 = vrot.lane.b32.xlu2 %v6079_v16, %s3877_s10  ;;  %v9541_v54 = vld [vmem:[#allocation116_spill] sm:$0xff] }
 0x42f   :  { %9537 = vst [vmem:[#allocation202_spill] sm:$0xff] %v7321_v7  ;;  %v1829_v60 = vadd.f32 %v1828_v5, %v1827_v55  ;;  %v7338_v55 = vld [vmem:[#allocation2 + $0x190] sm:$0x3] }
 0x430   :  { %v7325_v32 = vpop.permute.xlu2 %2441  ;;  %2537 = vrot.lane.b32.xlu1 %v9539_v56, %s3877_s10  ;;  %9542 = vst [vmem:[#allocation83_spill] sm:$0xff] %v7338_v55  ;;  %v2493_v7 = vrot.slane %v7338_v55, 1 }
 0x431   :  { %9538 = vst [vmem:[#allocation48_spill] sm:$0xff] %v7325_v32  ;;  %v7329_v3 = vpop.permute.xlu1 %2415 }
 0x432   :  { %9540 = vst [vmem:[#allocation45_spill] sm:$0xff] %v7329_v3  ;;  %v2491_v3 = vrot.slane %v7114_v1, 1  ;;  %v9545_v1 = vld [vmem:[#allocation161_spill] sm:$0xff] }
 0x433   :  { %v1663_v27 = vpop.f32.mrf.mxu2 }
 0x434   :  { %v1728_v15 = vsel %vm1219_vm6, %v1663_v27, 0.0  ;;  %v1769_v43 = vmul.f32 %v1663_v27, %v1663_v27  ;;  %1871 = vst.msk [vmem:[%s8549_s2 + $0xf0] sm:$0xff] %vm1219_vm6, %v1663_v27  ;;  %2541 = vrot.lane.b32.xlu0 %v9541_v54, %s3877_s10 }
 0x435   :  { %v1729_v22 = vadd.f32 %v1728_v15, %v1727_v48 }
 0x436   :  { %v1830_v14 = vsel %vm1219_vm6, %v1769_v43, 0.0  ;;  %v7341_v5 = vpop.permute.xlu0 %2419  ;;  %2551 = vrot.lane.b32.xlu2 %v6144_v45, %s3877_s10 }
 0x437   :  { %v1831_v32 = vadd.f32 %v1830_v14, %v1829_v60  ;;  %v7361_v60 = vsel %vm231_vm2, %v2491_v3, %v2493_v7 }
 0x438   :  { %v7347_v42 = vpop.permute.xlu2 %2447  ;;  %2543 = vrot.lane.b32.xlu1 %v6041_v46, %s3877_s10  ;;  %9546 = vst [vmem:[#allocation86_spill] sm:$0xff] %v7361_v60 }
 0x439   :  { %9543 = vst [vmem:[#allocation215_spill] sm:$0xff] %v7347_v42  ;;  %v7351_v48 = vpop.permute.xlu1 %2421 }
 0x43a   :  { %9544 = vst [vmem:[#allocation241_spill] sm:$0xff] %v7351_v48 }
 0x43b   :  { %v1666_v27 = vpop.f32.mrf.mxu2 }
 0x43c   :  { %v1730_v43 = vsel %vm1219_vm6, %v1666_v27, 0.0  ;;  %v1770_v15 = vmul.f32 %v1666_v27, %v1666_v27  ;;  %1872 = vst.msk [vmem:[%s8549_s2 + $0xf8] sm:$0xff] %vm1219_vm6, %v1666_v27  ;;  %2547 = vrot.lane.b32.xlu0 %v9545_v1, %s3877_s10  ;;  %v2490_v27 = vrot.slane %v7076_v12, 1 }
 0x43d   :  { %v7363_v14 = vadd.f32 %v1730_v43, %v1729_v22 }
 0x43e   :  { %v1832_v42 = vsel %vm1219_vm6, %v1770_v15, 0.0  ;;  %v7366_v55 = vpop.permute.xlu0 %2425  ;;  %2557 = vrot.lane.b32.xlu2 %v7361_v60, %s3877_s10 }
 0x43f   :  { %9547 = vst [vmem:[#allocation31_spill] sm:$0xff] %v7363_v14  ;;  %v7368_v48 = vadd.f32 %v1832_v42, %v1831_v32  ;;  %v7384_v42 = vsel %vm231_vm2, %v2490_v27, %v2491_v3 }
 0x440   :  { %v7372_v45 = vpop.permute.xlu2 %2453  ;;  %2549 = vrot.lane.b32.xlu1 %v6105_v49, %s3877_s10  ;;  %9550 = vst [vmem:[#allocation125_spill] sm:$0xff] %v7384_v42 }
 0x441   :  { %9548 = vst [vmem:[#allocation92_spill] sm:$0xff] %v7368_v48  ;;  %v7377_v7 = vpop.permute.xlu1 %2427 }
 0x442   :  { %9549 = vst [vmem:[#allocation21_spill] sm:$0xff] %v7372_v45 }
 0x444   :  { %2553 = vrot.lane.b32.xlu0 %v6067_v52, %s3877_s10 }
 0x446   :  { %v7381_v22 = vpop.permute.xlu0 %2431  ;;  %2600 = vrot.lane.b32.xlu2 %v6264_v40, %s3878_s0 }
 0x448   :  { %v7388_v32 = vpop.permute.xlu2 %2497  ;;  %2555 = vrot.lane.b32.xlu1 %v7384_v42, %s3877_s10 }
 0x449   :  { %v7392_v43 = vpop.permute.xlu1 %2433 }
 0x44c   :  { %2596 = vrot.lane.b32.xlu0 %v6129_v26, %s3878_s0 }
 0x44e   :  { %v7396_v12 = vpop.permute.xlu0 %2437  ;;  %2606 = vrot.lane.b32.xlu2 %v6325_v44, %s3878_s0 }
 0x44f   :  { %9551 = vst [vmem:[#allocation136_spill] sm:$0xff] %v7396_v12 }
 0x450   :  { %v7400_v3 = vpop.permute.xlu2 %2503  ;;  %2598 = vrot.lane.b32.xlu1 %v6224_v63, %s3878_s0 }
 0x451   :  { %v7404_v15 = vpop.permute.xlu1 %2439 }
 0x452   :  { %9552 = vst [vmem:[#allocation141_spill] sm:$0xff] %v7404_v15 }
 0x454   :  { %2602 = vrot.lane.b32.xlu0 %v6187_v33, %s3878_s0 }
 0x456   :  { %v7408_v27 = vpop.permute.xlu0 %2443  ;;  %2612 = vrot.lane.b32.xlu2 %v6391_v35, %s3878_s0 }
 0x457   :  { %9553 = vst [vmem:[#allocation54_spill] sm:$0xff] %v7408_v27 }
 0x458   :  { %v7412_v26 = vpop.permute.xlu2 %2509  ;;  %2604 = vrot.lane.b32.xlu1 %v6287_v31, %s3878_s0 }
 0x459   :  { %v7416_v48 = vpop.permute.xlu1 %2445 }
 0x45a   :  { %9554 = vst [vmem:[#allocation176_spill] sm:$0xff] %v7416_v48 }
 0x45c   :  { %2608 = vrot.lane.b32.xlu0 %v6249_v2, %s3878_s0 }
 0x45e   :  { %v7420_v63 = vpop.permute.xlu0 %2449  ;;  %2618 = vrot.lane.b32.xlu2 %v6452_v9, %s3878_s0 }
 0x45f   :  { %9555 = vst [vmem:[#allocation172_spill] sm:$0xff] %v7420_v63 }
 0x460   :  { %v7424_v14 = vpop.permute.xlu2 %2515  ;;  %2610 = vrot.lane.b32.xlu1 %v6350_v59, %s3878_s0 }
 0x461   :  { %9556 = vst [vmem:[#allocation237_spill] sm:$0xff] %v7424_v14  ;;  %v7428_v45 = vpop.permute.xlu1 %2451 }
 0x462   :  { %9557 = vst [vmem:[#allocation196_spill] sm:$0xff] %v7428_v45 }
 0x464   :  { %2614 = vrot.lane.b32.xlu0 %v6311_v51, %s3878_s0 }
 0x466   :  { %v7432_v27 = vpop.permute.xlu0 %2455  ;;  %2694 = vrot.lane.b32.xlu2 %v6843_v23, %s3879_s13 }
 0x467   :  { %9558 = vst [vmem:[#allocation203_spill] sm:$0xff] %v7432_v27 }
 0x468   :  { %v7436_v48 = vpop.permute.xlu2 %2521  ;;  %2616 = vrot.lane.b32.xlu1 %v6414_v41, %s3878_s0 }
 0x469   :  { %v7440_v63 = vpop.permute.xlu1 %2495 }
 0x46c   :  { %2620 = vrot.lane.b32.xlu0 %v6376_v18, %s3878_s0 }
 0x46e   :  { %v7444_v60 = vpop.permute.xlu0 %2499  ;;  %2696 = vrot.lane.b32.xlu2 %v6791_v47, %s3879_s13 }
 0x470   :  { %v7448_v45 = vpop.permute.xlu2 %2527  ;;  %2622 = vrot.lane.b32.xlu1 %v6479_v37, %s3878_s0 }
 0x471   :  { %v7452_v23 = vpop.permute.xlu1 %2501 }
 0x474   :  { %2796 = vrot.lane.b32.xlu0 %v9504_v28, %s3880_s14 }
 0x476   :  { %v7456_v27 = vpop.permute.xlu0 %2505  ;;  %2698 = vrot.lane.b32.xlu2 %v6853_v10, %s3879_s13 }
 0x478   :  { %v7460_v15 = vpop.permute.xlu2 %2533  ;;  %2897 = vrot.lane.b32.xlu1 %v6264_v40, %s3881_s15 }
 0x47a   :  { %v7464_v47 = vpop.permute.xlu1 %2507 }
 0x47c   :  { %2798 = vrot.lane.b32.xlu0 %v9508_v20, %s3880_s14 }
 0x47e   :  { %v7468_v14 = vpop.permute.xlu0 %2511  ;;  %2700 = vrot.lane.b32.xlu2 %v6885_v34, %s3879_s13 }
 0x480   :  { %v7472_v28 = vpop.permute.xlu2 %2539  ;;  %2899 = vrot.lane.b32.xlu1 %v6187_v33, %s3881_s15 }
 0x481   :  { %9559 = vst [vmem:[#allocation28_spill] sm:$0xff] %v7472_v28  ;;  %v9587_v28 = vld [vmem:[#allocation120_spill] sm:$0xff] }
 0x482   :  { %v7476_v10 = vpop.permute.xlu1 %2513 }
 0x483   :  { %9560 = vst [vmem:[#allocation205_spill] sm:$0xff] %v7476_v10  ;;  %v9590_v10 = vld [vmem:[#allocation87_spill] sm:$0xff] }
 0x484   :  { %2800 = vrot.lane.b32.xlu0 %v9500_v50, %s3880_s14 }
 0x486   :  { %v7480_v40 = vpop.permute.xlu0 %2517  ;;  %2726 = vrot.lane.b32.xlu2 %v6965_v39, %s3879_s13 }
 0x487   :  { %9561 = vst [vmem:[#allocation242_spill] sm:$0xff] %v7480_v40 }
 0x488   :  { %v7484_v20 = vpop.permute.xlu2 %2545  ;;  %2901 = vrot.lane.b32.xlu1 %v6287_v31, %s3881_s15 }
 0x489   :  { %9562 = vst [vmem:[#allocation76_spill] sm:$0xff] %v7484_v20 }
 0x48a   :  { %v7488_v34 = vpop.permute.xlu1 %2519 }
 0x48b   :  { %9563 = vst [vmem:[#allocation88_spill] sm:$0xff] %v7488_v34 }
 0x48c   :  { %2628 = vrot.lane.b32.xlu0 %v6548_v17, %s3878_s0 }
 0x48e   :  { %v7492_v33 = vpop.permute.xlu0 %2523  ;;  %2929 = vrot.lane.b32.xlu2 %v6510_v0, %s3881_s15 }
 0x48f   :  { %9564 = vst [vmem:[#allocation85_spill] sm:$0xff] %v7492_v33 }
 0x490   :  { %v7496_v50 = vpop.permute.xlu2 %2551  ;;  %2802 = vrot.lane.b32.xlu1 %v9510_v36, %s3880_s14 }
 0x491   :  { %9565 = vst [vmem:[#allocation70_spill] sm:$0xff] %v7496_v50  ;;  %v9573_v50 = vld [vmem:[#allocation233_spill] sm:$0xff] }
 0x492   :  { %v7500_v39 = vpop.permute.xlu1 %2525 }
 0x493   :  { %9566 = vst [vmem:[#allocation16_spill] sm:$0xff] %v7500_v39 }
 0x494   :  { %2903 = vrot.lane.b32.xlu0 %v6325_v44, %s3881_s15 }
 0x496   :  { %v7504_v31 = vpop.permute.xlu0 %2529  ;;  %2804 = vrot.lane.b32.xlu2 %v9514_v6, %s3880_s14 }
 0x498   :  { %v7508_v20 = vpop.permute.xlu2 %2557  ;;  %2828 = vrot.lane.b32.xlu1 %v9534_v24, %s3880_s14 }
 0x499   :  { %9567 = vst [vmem:[#allocation104_spill] sm:$0xff] %v7508_v20 }
 0x49a   :  { %v7512_v33 = vpop.permute.xlu1 %2531 }
 0x49c   :  { %2702 = vrot.lane.b32.xlu0 %v6828_v30, %s3879_s13 }
 0x49e   :  { %v7516_v36 = vpop.permute.xlu0 %2535  ;;  %2830 = vrot.lane.b32.xlu2 %v9527_v13, %s3880_s14 }
 0x4a0   :  { %v7520_v44 = vpop.permute.xlu2 %2600  ;;  %2630 = vrot.lane.b32.xlu1 %v6586_v8, %s3878_s0 }
 0x4a2   :  { %v7524_v6 = vpop.permute.xlu1 %2537 }
 0x4a4   :  { %2728 = vrot.lane.b32.xlu0 %v7010_v61, %s3879_s13 }
 0x4a6   :  { %v7528_v24 = vpop.permute.xlu0 %2541  ;;  %2632 = vrot.lane.b32.xlu2 %v6510_v0, %s3878_s0 }
 0x4a7   :  { %9568 = vst [vmem:[#allocation39_spill] sm:$0xff] %v7528_v24  ;;  %v9586_v24 = vld [vmem:[#allocation234_spill] sm:$0xff] }
 0x4a8   :  { %v7532_v30 = vpop.permute.xlu2 %2606  ;;  %2905 = vrot.lane.b32.xlu1 %v6249_v2, %s3881_s15 }
 0x4aa   :  { %v7536_v13 = vpop.permute.xlu1 %2543 }
 0x4ab   :  { %9569 = vst [vmem:[#allocation159_spill] sm:$0xff] %v7536_v13  ;;  %v3250_v13 = vld [vmem:[%s8548_s1 + $0x8] sm:$0xff] }
 0x4ac   :  { %2931 = vrot.lane.b32.xlu0 %v6611_v57, %s3881_s15 }
 0x4ae   :  { %v7540_v20 = vpop.permute.xlu0 %2547  ;;  %2907 = vrot.lane.b32.xlu2 %v6350_v59, %s3881_s15 }
 0x4af   :  { %9570 = vst [vmem:[#allocation127_spill] sm:$0xff] %v7540_v20  ;;  %v9575_v20 = vld [vmem:[#allocation90_spill] sm:$0xff] }
 0x4b0   :  { %v7544_v61 = vpop.permute.xlu2 %2612  ;;  %2704 = vrot.lane.b32.xlu1 %v6895_v29, %s3879_s13 }
 0x4b2   :  { %v7548_v0 = vpop.permute.xlu1 %2549 }
 0x4b3   :  { %9571 = vst [vmem:[#allocation123_spill] sm:$0xff] %v7548_v0  ;;  %v9577_v0 = vld [vmem:[#allocation211_spill] sm:$0xff] }
 0x4b4   :  { %2806 = vrot.lane.b32.xlu0 %v9506_v19, %s3880_s14 }
 0x4b6   :  { %v7552_v2 = vpop.permute.xlu0 %2553  ;;  %2706 = vrot.lane.b32.xlu2 %v9573_v50, %s3879_s13 }
 0x4b7   :  { %9572 = vst [vmem:[#allocation153_spill] sm:$0xff] %v7552_v2  ;;  %v9578_v2 = vld [vmem:[#allocation157_spill] sm:$0xff] }
 0x4b8   :  { %v7556_v39 = vpop.permute.xlu2 %2618  ;;  %2730 = vrot.lane.b32.xlu1 %v9575_v20, %s3879_s13  ;;  %v3253_v20 = vld [vmem:[%s8548_s1 + $0x20] sm:$0xf] }
 0x4b9   :  { %9574 = vst [vmem:[#allocation162_spill] sm:$0xff] %v7556_v39  ;;  %3729 = vmatpush.msk.msra.mxu1 %vm1552_vm5, %v3253_v20  ;;  %3767 = vmatpush.msk.msra.mxu3 %vm1552_vm5, %v3253_v20 }
 0x4ba   :  { %v7560_v59 = vpop.permute.xlu1 %2555 }
 0x4bb   :  { %9576 = vst [vmem:[#allocation167_spill] sm:$0xff] %v7560_v59 }
 0x4bc   :  { %2832 = vrot.lane.b32.xlu0 %v9536_v11, %s3880_s14  ;;  %v3252_v11 = vld [vmem:[%s8548_s1 + $0x18] sm:$0xff] }
 0x4bd   :  { %3365 = vmatpush.msra.mxu1 %v3252_v11  ;;  %3768 = vmatpush.msra.mxu3 %v3252_v11  ;;  %v3249_v11 = vld [vmem:[%s8548_s1] sm:$0xff] }
 0x4be   :  { %v2597_v29 = vpop.permute.xlu0 %2596  ;;  %2732 = vrot.lane.b32.xlu2 %v9577_v0, %s3879_s13  ;;  %v9579_v0 = vld [vmem:[#allocation61_spill] sm:$0xff] }
 0x4c0   :  { %v2695_v19 = vpop.permute.xlu2 %2694  ;;  %2933 = vrot.lane.b32.xlu1 %v9578_v2, %s3881_s15 }
 0x4c2   :  { %v7568_v34 = vpop.permute.xlu1 %2598 }
 0x4c4   :  { %2634 = vrot.lane.b32.xlu0 %v6611_v57, %s3878_s0  ;;  %v3251_v57 = vld [vmem:[%s8548_s1 + $0x10] sm:$0xff] }
 0x4c5   :  { %3366 = vmatpush.msra.mxu1 %v3251_v57  ;;  %3769 = vmatpush.msra.mxu3 %v3251_v57 }
 0x4c6   :  { %v7578_v50 = vpop.permute.xlu0 %2602  ;;  %2935 = vrot.lane.b32.xlu2 %v9579_v0, %s3881_s15 }
 0x4c7   :  { %3367 = vmatpush.msra.mxu1 %v3250_v13  ;;  %3770 = vmatpush.msra.mxu3 %v3250_v13 }
 0x4c8   :  { %v2697_v59 = vpop.permute.xlu2 %2696  ;;  %2808 = vrot.lane.b32.xlu1 %v9516_v21, %s3880_s14 }
 0x4c9   :  { %3368 = vmatpush.msra.mxu1 %v3249_v11  ;;  %3771 = vmatpush.msra.mxu3 %v3249_v11  ;;  %v9583_v11 = vld [vmem:[#allocation65_spill] sm:$0xff] }
 0x4ca   :  { %v7592_v20 = vpop.permute.xlu1 %2604 }
 0x4cc   :  { %2909 = vrot.lane.b32.xlu0 %v6391_v35, %s3881_s15  ;;  %v9580_v35 = vld [vmem:[#allocation27_spill] sm:$0xff] }
 0x4ce   :  { %v7599_v39 = vpop.permute.xlu0 %2608  ;;  %2810 = vrot.lane.b32.xlu2 %v9520_v58, %s3880_s14 }
 0x4d0   :  { %v2699_v21 = vpop.permute.xlu2 %2698  ;;  %2834 = vrot.lane.b32.xlu1 %v9539_v56, %s3880_s14 }
 0x4d2   :  { %v7605_v57 = vpop.permute.xlu1 %2610 }
 0x4d4   :  { %2708 = vrot.lane.b32.xlu0 %v9580_v35, %s3879_s13  ;;  %v9585_v35 = vld [vmem:[#allocation144_spill] sm:$0xff] }
 0x4d5   :  { %v3006_v42 = vsel %vm18_vm0, %v9586_v24, %v9585_v35  ;;  %v9589_v35 = vld [vmem:[#allocation164_spill] sm:$0xff] }
 0x4d6   :  { %v7609_v40 = vpop.permute.xlu0 %2614  ;;  %2836 = vrot.lane.b32.xlu2 %v6019_v53, %s3880_s14  ;;  %v3038_v12 = vsel %vm1219_vm6, %v3006_v42, %v9587_v28 }
 0x4d7   :  { %9581 = vst [vmem:[#allocation183_spill] sm:$0xff] %v7609_v40 }
 0x4d8   :  { %v7613_v13 = vpop.permute.xlu2 %2700  ;;  %2636 = vrot.lane.b32.xlu1 %v9578_v2, %s3878_s0  ;;  %v3070_v2 = vsel %vm1252_vm7, %v3038_v12, %v7341_v5 }
 0x4da   :  { %v7617_v58 = vpop.permute.xlu1 %2616 }
 0x4db   :  { %9582 = vst [vmem:[#allocation243_spill] sm:$0xff] %v7617_v58 }
 0x4dc   :  { %2734 = vrot.lane.b32.xlu0 %v9583_v11, %s3879_s13  ;;  %v3814_v11 = vld [vmem:[#allocation2] sm:$0xff] }
 0x4de   :  { %v7621_v56 = vpop.permute.xlu0 %2620  ;;  %2638 = vrot.lane.b32.xlu2 %v9579_v0, %s3878_s0  ;;  %v3102_v0 = vsel %vm1285_vm9, %v3070_v2, %v7436_v48 }
 0x4df   :  { %9584 = vst [vmem:[#allocation198_spill] sm:$0xff] %v7621_v56  ;;  %v9588_v56 = vld [vmem:[#allocation72_spill] sm:$0xff] }
 0x4e0   :  { %v7628_v53 = vpop.permute.xlu2 %2726  ;;  %2911 = vrot.lane.b32.xlu1 %v6311_v51, %s3881_s15  ;;  %v2993_v58 = vsel %vm18_vm0, %v3814_v11, %v9588_v56  ;;  %v9591_v51 = vld [vmem:[#allocation192_spill] sm:$0xff] }
 0x4e1   :  { %v3025_v42 = vsel %vm1219_vm6, %v2993_v58, %v9590_v10  ;;  %v9592_v10 = vld [vmem:[#allocation25_spill] sm:$0xff] }
 0x4e2   :  { %v2623_v40 = vpop.permute.xlu1 %2622  ;;  %v3057_v5 = vsel %vm1252_vm7, %v3025_v42, %v9591_v51  ;;  %v3815_v58 = vld [vmem:[#allocation2 + $0x8] sm:$0xff] }
 0x4e3   :  { %v7645_v28 = vsel %vm1318_vm8, %v3102_v0, %v2623_v40  ;;  %v3089_v56 = vsel %vm1285_vm9, %v3057_v5, %v7440_v63  ;;  %v9593_v0 = vld [vmem:[#allocation96_spill] sm:$0xff] }
 0x4e4   :  { %2937 = vrot.lane.b32.xlu0 %v9589_v35, %s3881_s15  ;;  %v3121_v48 = vsel %vm1318_vm8, %v3089_v56, %v2597_v29  ;;  %v2994_v42 = vsel %vm18_vm0, %v3815_v58, %v9593_v0  ;;  %v9594_v63 = vld [vmem:[#allocation244_spill] sm:$0xff]  ;;  %v3816_v58 = vld [vmem:[#allocation2 + $0x18] sm:$0xff] }
 0x4e5   :  { %v3153_v2 = vsel %vm1351_vm10, %v3121_v48, %v2695_v19  ;;  %v9597_v0 = vld [vmem:[#allocation82_spill] sm:$0xff] }
 0x4e6   :  { %v2797_v12 = vpop.permute.xlu0 %2796  ;;  %2913 = vrot.lane.b32.xlu2 %v6414_v41, %s3881_s15  ;;  %v9595_v41 = vld [vmem:[#allocation122_spill] sm:$0xff] }
 0x4e7   :  { %v3185_v40 = vsel %vm1384_vm12, %v3153_v2, %v2797_v12  ;;  %v3026_v29 = vsel %vm1219_vm6, %v2994_v42, %v9595_v41  ;;  %v2995_v42 = vsel %vm18_vm0, %v3816_v58, %v9597_v0 }
 0x4e8   :  { %v7655_v11 = vpop.permute.xlu2 %2929  ;;  %2710 = vrot.lane.b32.xlu1 %v9592_v10, %s3879_s13  ;;  %v3058_v5 = vsel %vm1252_vm7, %v3026_v29, %v7259_v25  ;;  %v9599_v29 = vld [vmem:[#allocation56_spill] sm:$0xff] }
 0x4e9   :  { %v3090_v12 = vsel %vm1285_vm9, %v3058_v5, %v7388_v32 }
 0x4ea   :  { %v2898_v51 = vpop.permute.xlu1 %2897  ;;  %v3122_v48 = vsel %vm1318_vm8, %v3090_v12, %v7568_v34 }
 0x4eb   :  { %v3217_v19 = vsel %vm1417_vm11, %v3185_v40, %v2898_v51  ;;  %v3154_v2 = vsel %vm1351_vm10, %v3122_v48, %v2697_v59  ;;  %v9596_v40 = vld [vmem:[#allocation124_spill] sm:$0xff] }
 0x4ec   :  { %2812 = vrot.lane.b32.xlu0 %v9594_v63, %s3880_s14  ;;  %3730 = vmatmul.msk.f32.vlgmr.msra.gmra.mxu1 %vm1455_vm13, %v3217_v19 }
 0x4ee   :  { %v2799_v56 = vpop.permute.xlu0 %2798  ;;  %2712 = vrot.lane.b32.xlu2 %v9586_v24, %s3879_s13  ;;  %v9598_v24 = vld [vmem:[#allocation147_spill] sm:$0xff] }
 0x4ef   :  { %v3186_v25 = vsel %vm1384_vm12, %v3154_v2, %v2799_v56  ;;  %v3027_v34 = vsel %vm1219_vm6, %v2995_v42, %v9598_v24  ;;  %v9600_v56 = vld [vmem:[#allocation206_spill] sm:$0xff]  ;;  %v9604_v42 = vld [vmem:[#allocation227_spill] sm:$0xff] }
 0x4f0   :  { %v7677_v10 = vpop.permute.xlu2 %2804  ;;  %2736 = vrot.lane.b32.xlu1 %v9596_v40, %s3879_s13  ;;  %v3059_v51 = vsel %vm1252_vm7, %v3027_v34, %v7274_v4  ;;  %v9602_v2 = vld [vmem:[#allocation130_spill] sm:$0xff] }
 0x4f1   :  { %v3091_v41 = vsel %vm1285_vm9, %v3059_v51, %v7444_v60  ;;  %v9606_v51 = vld [vmem:[#allocation119_spill] sm:$0xff] }
 0x4f2   :  { %v2900_v32 = vpop.permute.xlu1 %2899 }
 0x4f3   :  { %v3218_v59 = vsel %vm1417_vm11, %v3186_v25, %v2900_v32  ;;  %v9603_v25 = vld [vmem:[#allocation133_spill] sm:$0xff]  ;;  %v9605_v32 = vld [vmem:[#allocation236_spill] sm:$0xff] }
 0x4f4   :  { %2838 = vrot.lane.b32.xlu0 %v9541_v54, %s3880_s14  ;;  %3731 = vmatmul.msk.f32.gmra.mxu1 %vm1455_vm13, %v3218_v59  ;;  %v3123_v54 = vsel %vm1318_vm8, %v3091_v41, %v7520_v44  ;;  %v9601_v44 = vld [vmem:[#allocation117_spill] sm:$0xff] }
 0x4f5   :  { %v3155_v19 = vsel %vm1351_vm10, %v3123_v54, %v2699_v21  ;;  %v3817_v21 = vld [vmem:[#allocation2 + $0x20] sm:$0xff]  ;;  %v9608_v54 = vld [vmem:[#allocation217_spill] sm:$0xff] }
 0x4f6   :  { %v2801_v63 = vpop.permute.xlu0 %2800  ;;  %2738 = vrot.lane.b32.xlu2 %v9599_v29, %s3879_s13  ;;  %v2996_v40 = vsel %vm18_vm0, %v3817_v21, %v9602_v2  ;;  %v9609_v2 = vld [vmem:[#allocation79_spill] sm:$0xff] }
 0x4f7   :  { %v3187_v4 = vsel %vm1384_vm12, %v3155_v19, %v2801_v63  ;;  %v3028_v58 = vsel %vm1219_vm6, %v2996_v40, %v9603_v25  ;;  %v9607_v63 = vld [vmem:[#allocation158_spill] sm:$0xff] }
 0x4f8   :  { %v7699_v5 = vpop.permute.xlu2 %2830  ;;  %2939 = vrot.lane.b32.xlu1 %v9600_v56, %s3881_s15  ;;  %v3009_v41 = vsel %vm18_vm0, %v9607_v63, %v9606_v51 }
 0x4f9   :  { %v3041_v19 = vsel %vm1219_vm6, %v3009_v41, %v9608_v54 }
 0x4fa   :  { %v2902_v12 = vpop.permute.xlu1 %2901 }
 0x4fb   :  { %v3219_v60 = vsel %vm1417_vm11, %v3187_v4, %v2902_v12 }
 0x4fc   :  { %2640 = vrot.lane.b32.xlu0 %v9589_v35, %s3878_s0  ;;  %3732 = vmatmul.msk.f32.gmra.mxu1 %vm1455_vm13, %v3219_v60  ;;  %v3060_v35 = vsel %vm1252_vm7, %v3028_v58, %v9604_v42  ;;  %v9611_v42 = vld [vmem:[#allocation151_spill] sm:$0xff] }
 0x4fd   :  { %v3092_v24 = vsel %vm1285_vm9, %v3060_v35, %v7452_v23 }
 0x4fe   :  { %v2629_v48 = vpop.permute.xlu0 %2628  ;;  %2941 = vrot.lane.b32.xlu2 %v9601_v44, %s3881_s15  ;;  %v3124_v34 = vsel %vm1318_vm8, %v3092_v24, %v7578_v50  ;;  %v3073_v50 = vsel %vm1252_vm7, %v3041_v19, %v7366_v55  ;;  %v9614_v24 = vld [vmem:[#allocation14_spill] sm:$0xff] }
 0x4ff   :  { %v3156_v29 = vsel %vm1351_vm10, %v3124_v34, %v7613_v13 }
 0x500   :  { %v7714_v0 = vpop.permute.xlu2 %2632  ;;  %2814 = vrot.lane.b32.xlu1 %v9605_v32, %s3880_s14  ;;  %v9613_v32 = vld [vmem:[#allocation100_spill] sm:$0xff] }
 0x502   :  { %v2803_v59 = vpop.permute.xlu1 %2802 }
 0x503   :  { %v3188_v4 = vsel %vm1384_vm12, %v3156_v29, %v2803_v59 }
 0x504   :  { %2915 = vrot.lane.b32.xlu0 %v6452_v9, %s3881_s15  ;;  %v3105_v9 = vsel %vm1285_vm9, %v3073_v50, %v7448_v45 }
 0x505   :  { %v3137_v13 = vsel %vm1318_vm8, %v3105_v9, %v2629_v48 }
 0x506   :  { %v2904_v23 = vpop.permute.xlu0 %2903  ;;  %2816 = vrot.lane.b32.xlu2 %v9525_v62, %s3880_s14  ;;  %v3169_v55 = vsel %vm1351_vm10, %v3137_v13, %v7628_v53  ;;  %v9610_v53 = vld [vmem:[#allocation105_spill] sm:$0xff] }
 0x507   :  { %v3220_v12 = vsel %vm1417_vm11, %v3188_v4, %v2904_v23 }
 0x508   :  { %3733 = vmatmul.msk.f32.gmra.mxu1 %vm1455_vm13, %v3220_v12  ;;  %v2908_v60 = vpop.permute.xlu2 %2907  ;;  %2840 = vrot.lane.b32.xlu1 %v6041_v46, %s3880_s14  ;;  %v3818_v46 = vld [vmem:[#allocation2 + $0x30] sm:$0xff] }
 0x509   :  { %v2997_v25 = vsel %vm18_vm0, %v3818_v46, %v9610_v53 }
 0x50a   :  { %v2829_v21 = vpop.permute.xlu1 %2828 }
 0x50b   :  { %v3201_v62 = vsel %vm1384_vm12, %v3169_v55, %v2829_v21  ;;  %v9618_v21 = vld [vmem:[#allocation66_spill] sm:$0xff] }
 0x50c   :  { %2714 = vrot.lane.b32.xlu0 %v9609_v2, %s3879_s13  ;;  %v3233_v45 = vsel %vm1417_vm11, %v3201_v62, %v7655_v11  ;;  %v9612_v11 = vld [vmem:[#allocation173_spill] sm:$0xff] }
 0x50d   :  { %3746 = vmatmul.msk.f32.vlgmr.msra.gmra.mxu3 %vm1455_vm13, %v3233_v45  ;;  %v3029_v35 = vsel %vm1219_vm6, %v2997_v25, %v9612_v11  ;;  %v7807_v2 = vld [vmem:[#allocation2 + $0xb0] sm:$0xff] }
 0x50e   :  { %v2703_v40 = vpop.permute.xlu0 %2702  ;;  %2842 = vrot.lane.b32.xlu2 %v6079_v16, %s3880_s14  ;;  %v3010_v16 = vsel %vm18_vm0, %v9614_v24, %v9613_v32  ;;  %v3061_v34 = vsel %vm1252_vm7, %v3029_v35, %v7284_v38  ;;  %v9621_v35 = vld [vmem:[#allocation181_spill] sm:$0xff]  ;;  %v7828_v32 = vld [vmem:[#allocation2 + $0xd8] sm:$0xff] }
 0x50f   :  { %v3093_v63 = vsel %vm1285_vm9, %v3061_v34, %v7400_v3  ;;  %v9623_v34 = vld [vmem:[#allocation195_spill] sm:$0xff] }
 0x510   :  { %v7755_v48 = vpop.permute.xlu2 %2706  ;;  %2642 = vrot.lane.b32.xlu1 %v9600_v56, %s3878_s0  ;;  %v9615_v56 = vld [vmem:[#allocation139_spill] sm:$0xff]  ;;  %v3125_v29 = vsel %vm1318_vm8, %v3093_v63, %v7592_v20 }
 0x511   :  { %v3042_v51 = vsel %vm1219_vm6, %v3010_v16, %v9615_v56  ;;  %v3157_v38 = vsel %vm1351_vm10, %v3125_v29, %v2703_v40  ;;  %v9616_v20 = vld [vmem:[#allocation99_spill] sm:$0xff]  ;;  %v9620_v40 = vld [vmem:[#allocation245_spill] sm:$0xff] }
 0x512   :  { %v2631_v58 = vpop.permute.xlu1 %2630  ;;  %v3074_v41 = vsel %vm1252_vm7, %v3042_v51, %v7377_v7  ;;  %v3189_v7 = vsel %vm1384_vm12, %v3157_v38, %v7677_v10  ;;  %v9617_v10 = vld [vmem:[#allocation137_spill] sm:$0xff] }
 0x513   :  { %v3106_v54 = vsel %vm1285_vm9, %v3074_v41, %v7504_v31  ;;  %v9625_v41 = vld [vmem:[#allocation101_spill] sm:$0xff] }
 0x514   :  { %2740 = vrot.lane.b32.xlu0 %v9611_v42, %s3879_s13  ;;  %v3138_v4 = vsel %vm1318_vm8, %v3106_v54, %v2631_v58  ;;  %v3821_v42 = vld [vmem:[#allocation2 + $0xc0] sm:$0xff] }
 0x516   :  { %v2729_v59 = vpop.permute.xlu0 %2728  ;;  %2644 = vrot.lane.b32.xlu2 %v9601_v44, %s3878_s0 }
 0x517   :  { %v3170_v3 = vsel %vm1351_vm10, %v3138_v4, %v2729_v59  ;;  %v9624_v59 = vld [vmem:[#allocation149_spill] sm:$0xff] }
 0x518   :  { %v7783_v19 = vpop.permute.xlu2 %2732  ;;  %2917 = vrot.lane.b32.xlu1 %v6376_v18, %s3881_s15  ;;  %v3202_v50 = vsel %vm1384_vm12, %v3170_v3, %v7699_v5  ;;  %v3819_v18 = vld [vmem:[#allocation2 + $0x38] sm:$0xff] }
 0x519   :  { %v2998_v9 = vsel %vm18_vm0, %v3819_v18, %v9617_v10  ;;  %v9619_v5 = vld [vmem:[#allocation174_spill] sm:$0xff]  ;;  %v9630_v10 = vld [vmem:[#allocation212_spill] sm:$0xff] }
 0x51a   :  { %v2906_v44 = vpop.permute.xlu1 %2905  ;;  %v3030_v55 = vsel %vm1219_vm6, %v2998_v9, %v9618_v21  ;;  %v9631_v9 = vld [vmem:[#allocation69_spill] sm:$0xff] }
 0x51b   :  { %v3221_v31 = vsel %vm1417_vm11, %v3189_v7, %v2906_v44  ;;  %v3062_v62 = vsel %vm1252_vm7, %v3030_v55, %v9619_v5  ;;  %v3823_v7 = vld [vmem:[#allocation2 + $0x48] sm:$0xff] }
 0x51c   :  { %2943 = vrot.lane.b32.xlu0 %v9616_v20, %s3881_s15  ;;  %3734 = vmatmul.msk.f32.gmra.mxu1 %vm1455_vm13, %v3221_v31  ;;  %v9628_v31 = vld [vmem:[#allocation169_spill] sm:$0xff] }
 0x51e   :  { %v2932_v23 = vpop.permute.xlu0 %2931  ;;  %2919 = vrot.lane.b32.xlu2 %v6479_v37, %s3881_s15  ;;  %v3094_v37 = vsel %vm1285_vm9, %v3062_v62, %v7456_v27  ;;  %v9632_v62 = vld [vmem:[#allocation155_spill] sm:$0xff] }
 0x51f   :  { %v3234_v12 = vsel %vm1417_vm11, %v3202_v50, %v2932_v23  ;;  %v3126_v46 = vsel %vm1318_vm8, %v3094_v37, %v7532_v30  ;;  %v9622_v30 = vld [vmem:[#allocation108_spill] sm:$0xff]  ;;  %v2999_v23 = vsel %vm18_vm0, %v3823_v7, %v9628_v31  ;;  %v9629_v50 = vld [vmem:[#allocation171_spill] sm:$0xff]  ;;  %v9641_v7 = vld [vmem:[#allocation193_spill] sm:$0xff] }
 0x520   :  { %3747 = vmatmul.msk.f32.gmra.mxu3 %vm1455_vm13, %v3234_v12  ;;  %v7803_v13 = vpop.permute.xlu2 %2935  ;;  %2716 = vrot.lane.b32.xlu1 %v7807_v2, %s3879_s13  ;;  %v3011_v24 = vsel %vm18_vm0, %v7828_v32, %v9622_v30  ;;  %v3031_v12 = vsel %vm1219_vm6, %v2999_v23, %v9629_v50  ;;  %v7873_v37 = vld [vmem:[#allocation2 + $0xe0] sm:$0xff] }
 0x522   :  { %v2705_v45 = vpop.permute.xlu1 %2704 }
 0x523   :  { %v3158_v53 = vsel %vm1351_vm10, %v3126_v46, %v2705_v45  ;;  %v9633_v45 = vld [vmem:[#allocation80_spill] sm:$0xff] }
 0x524   :  { %2818 = vrot.lane.b32.xlu0 %v9620_v40, %s3880_s14  ;;  %v3012_v40 = vsel %vm18_vm0, %v7873_v37, %v9633_v45 }
 0x526   :  { %v2807_v25 = vpop.permute.xlu0 %2806  ;;  %2718 = vrot.lane.b32.xlu2 %v3821_v42, %s3879_s13 }
 0x527   :  { %v3190_v58 = vsel %vm1384_vm12, %v3158_v53, %v2807_v25  ;;  %v9634_v53 = vld [vmem:[#allocation42_spill] sm:$0xff] }
 0x528   :  { %v3222_v11 = vsel %vm1417_vm11, %v3190_v58, %v2908_v60  ;;  %v7824_v27 = vpop.permute.xlu2 %2810  ;;  %2742 = vrot.lane.b32.xlu1 %v9621_v35, %s3879_s13  ;;  %v3043_v60 = vsel %vm1219_vm6, %v3011_v24, %v9623_v34  ;;  %v3044_v25 = vsel %vm1219_vm6, %v3012_v40, %v9634_v53  ;;  %v9644_v53 = vld [vmem:[#allocation9_spill] sm:$0xff] }
 0x529   :  { %3735 = vmatmul.msk.f32.gmra.mxu1 %vm1455_vm13, %v3222_v11  ;;  %v3075_v56 = vsel %vm1252_vm7, %v3043_v60, %v9624_v59  ;;  %v9635_v11 = vld [vmem:[#allocation8_spill] sm:$0xff]  ;;  %v9636_v59 = vld [vmem:[#allocation78_spill] sm:$0xff] }
 0x52a   :  { %v2731_v16 = vpop.permute.xlu1 %2730  ;;  %v3107_v63 = vsel %vm1285_vm9, %v3075_v56, %v7512_v33 }
 0x52b   :  { %v3139_v29 = vsel %vm1318_vm8, %v3107_v63, %v7714_v0  ;;  %v9627_v0 = vld [vmem:[#allocation50_spill] sm:$0xff] }
 0x52c   :  { %2844 = vrot.lane.b32.xlu0 %v9545_v1, %s3880_s14  ;;  %v3171_v54 = vsel %vm1351_vm10, %v3139_v29, %v2731_v16  ;;  %v9626_v1 = vld [vmem:[#allocation29_spill] sm:$0xff] }
 0x52d   :  { %v3825_v16 = vld [vmem:[#allocation2 + $0xc8] sm:$0xff] }
 0x52e   :  { %v2833_v51 = vpop.permute.xlu0 %2832  ;;  %2744 = vrot.lane.b32.xlu2 %v9625_v41, %s3879_s13  ;;  %v7909_v41 = vld [vmem:[#allocation2 + $0x168] sm:$0xff] }
 0x52f   :  { %v3203_v4 = vsel %vm1384_vm12, %v3171_v54, %v2833_v51  ;;  %v3828_v54 = vld [vmem:[#allocation2 + $0xf0] sm:$0xff] }
 0x530   :  { %v7846_v38 = vpop.permute.xlu2 %2836  ;;  %2945 = vrot.lane.b32.xlu1 %v9626_v1, %s3881_s15 }
 0x532   :  { %v2934_v3 = vpop.permute.xlu1 %2933 }
 0x533   :  { %v3235_v33 = vsel %vm1417_vm11, %v3203_v4, %v2934_v3  ;;  %v9639_v4 = vld [vmem:[#allocation131_spill] sm:$0xff] }
 0x534   :  { %2646 = vrot.lane.b32.xlu0 %v9616_v20, %s3878_s0  ;;  %3748 = vmatmul.msk.f32.gmra.mxu3 %vm1455_vm13, %v3235_v33  ;;  %v3063_v20 = vsel %vm1252_vm7, %v3031_v12, %v9630_v10  ;;  %v3013_v3 = vsel %vm18_vm0, %v3828_v54, %v9639_v4  ;;  %v9640_v33 = vld [vmem:[#allocation182_spill] sm:$0xff] }
 0x535   :  { %v3095_v21 = vsel %vm1285_vm9, %v3063_v20, %v7464_v47  ;;  %v3045_v31 = vsel %vm1219_vm6, %v3013_v3, %v9641_v7  ;;  %v9653_v7 = vld [vmem:[#allocation23_spill] sm:$0xff] }
 0x536   :  { %v2635_v44 = vpop.permute.xlu0 %2634  ;;  %2947 = vrot.lane.b32.xlu2 %v9627_v0, %s3881_s15  ;;  %v3127_v55 = vsel %vm1318_vm8, %v3095_v21, %v7599_v39  ;;  %v3076_v39 = vsel %vm1252_vm7, %v3044_v25, %v7381_v22  ;;  %v3077_v50 = vsel %vm1252_vm7, %v3045_v31, %v7392_v43 }
 0x537   :  { %v3159_v46 = vsel %vm1351_vm10, %v3127_v55, %v7755_v48  ;;  %v3108_v35 = vsel %vm1285_vm9, %v3076_v39, %v7460_v15  ;;  %v3109_v10 = vsel %vm1285_vm9, %v3077_v50, %v7516_v36 }
 0x538   :  { %v7861_v18 = vpop.permute.xlu2 %2638  ;;  %2820 = vrot.lane.b32.xlu1 %v9631_v9, %s3880_s14  ;;  %v3140_v48 = vsel %vm1318_vm8, %v3108_v35, %v2635_v44 }
 0x539   :  { %v3172_v22 = vsel %vm1351_vm10, %v3140_v48, %v7783_v19  ;;  %v9637_v19 = vld [vmem:[#allocation128_spill] sm:$0xff] }
 0x53a   :  { %v2809_v5 = vpop.permute.xlu1 %2808 }
 0x53b   :  { %v3191_v47 = vsel %vm1384_vm12, %v3159_v46, %v2809_v5  ;;  %v7947_v46 = vld [vmem:[#allocation2 + $0x170] sm:$0xff] }
 0x53c   :  { %2921 = vrot.lane.b32.xlu0 %v9632_v62, %s3881_s15 }
 0x53e   :  { %v2910_v58 = vpop.permute.xlu0 %2909  ;;  %2822 = vrot.lane.b32.xlu2 %v9635_v11, %s3880_s14 }
 0x53f   :  { %v3223_v42 = vsel %vm1417_vm11, %v3191_v47, %v2910_v58  ;;  %v9645_v47 = vld [vmem:[#allocation22_spill] sm:$0xff] }
 0x540   :  { %3736 = vmatmul.msk.f32.gmra.mxu1 %vm1455_vm13, %v3223_v42  ;;  %v2914_v30 = vpop.permute.xlu2 %2913  ;;  %2846 = vrot.lane.b32.xlu1 %v6105_v49, %s3880_s14  ;;  %v3826_v49 = vld [vmem:[#allocation2 + $0x50] sm:$0xff] }
 0x541   :  { %v3000_v51 = vsel %vm18_vm0, %v3826_v49, %v9637_v19 }
 0x542   :  { %v2835_v24 = vpop.permute.xlu1 %2834 }
 0x543   :  { %v3204_v34 = vsel %vm1384_vm12, %v3172_v22, %v2835_v24 }
 0x544   :  { %2720 = vrot.lane.b32.xlu0 %v3825_v16, %s3879_s13  ;;  %v3236_v15 = vsel %vm1417_vm11, %v3204_v34, %v7803_v13  ;;  %v9638_v13 = vld [vmem:[#allocation201_spill] sm:$0xff]  ;;  %v9647_v16 = vld [vmem:[#allocation150_spill] sm:$0xff] }
 0x545   :  { %3749 = vmatmul.msk.f32.gmra.mxu3 %vm1455_vm13, %v3236_v15  ;;  %v3032_v29 = vsel %vm1219_vm6, %v3000_v51, %v9638_v13  ;;  %v3831_v15 = vld [vmem:[#allocation2 + $0xf8] sm:$0xff]  ;;  %v9651_v51 = vld [vmem:[#allocation228_spill] sm:$0xff] }
 0x546   :  { %v2709_v60 = vpop.permute.xlu0 %2708  ;;  %2848 = vrot.lane.b32.xlu2 %v9636_v59, %s3880_s14  ;;  %v9650_v59 = vld [vmem:[#allocation204_spill] sm:$0xff] }
 0x548   :  { %v7903_v56 = vpop.permute.xlu2 %2712  ;;  %2648 = vrot.lane.b32.xlu1 %v9626_v1, %s3878_s0  ;;  %v3064_v1 = vsel %vm1252_vm7, %v3032_v29, %v9640_v33 }
 0x549   :  { %v3096_v23 = vsel %vm1285_vm9, %v3064_v1, %v7412_v26  ;;  %v9642_v26 = vld [vmem:[#allocation75_spill] sm:$0xff]  ;;  %v9652_v1 = vld [vmem:[#allocation121_spill] sm:$0xff] }
 0x54a   :  { %v2637_v63 = vpop.permute.xlu1 %2636  ;;  %v3128_v12 = vsel %vm1318_vm8, %v3096_v23, %v7605_v57  ;;  %v9643_v57 = vld [vmem:[#allocation224_spill] sm:$0xff]  ;;  %v9654_v23 = vld [vmem:[#allocation103_spill] sm:$0xff] }
 0x54b   :  { %v3160_v20 = vsel %vm1351_vm10, %v3128_v12, %v2709_v60  ;;  %v3141_v21 = vsel %vm1318_vm8, %v3109_v10, %v2637_v63  ;;  %v9655_v10 = vld [vmem:[#allocation205_spill] sm:$0xff] }
 0x54c   :  { %2746 = vrot.lane.b32.xlu0 %v7909_v41, %s3879_s13  ;;  %v3192_v43 = vsel %vm1384_vm12, %v3160_v20, %v7824_v27  ;;  %v3830_v27 = vld [vmem:[#allocation2 + $0x60] sm:$0xff] }
 0x54d   :  { %v3001_v25 = vsel %vm18_vm0, %v3830_v27, %v9644_v53  ;;  %v9659_v53 = vld [vmem:[#allocation73_spill] sm:$0xff] }
 0x54e   :  { %v2735_v44 = vpop.permute.xlu0 %2734  ;;  %2722 = vrot.lane.b32.xlu2 %v7828_v32, %s3879_s13  ;;  %v3033_v58 = vsel %vm1219_vm6, %v3001_v25, %v9645_v47 }
 0x54f   :  { %v3173_v32 = vsel %vm1351_vm10, %v3141_v21, %v2735_v44 }
 0x550   :  { %v7932_v9 = vpop.permute.xlu2 %2738  ;;  %2923 = vrot.lane.b32.xlu1 %v9642_v26, %s3881_s15  ;;  %v3205_v45 = vsel %vm1384_vm12, %v3173_v32, %v7846_v38  ;;  %v9646_v38 = vld [vmem:[#allocation189_spill] sm:$0xff] }
 0x551   :  { %v3065_v39 = vsel %vm1252_vm7, %v3033_v58, %v9646_v38 }
 0x552   :  { %v2912_v55 = vpop.permute.xlu1 %2911  ;;  %v3097_v11 = vsel %vm1285_vm9, %v3065_v39, %v7468_v14  ;;  %v9648_v14 = vld [vmem:[#allocation246_spill] sm:$0xff] }
 0x553   :  { %v3224_v36 = vsel %vm1417_vm11, %v3192_v43, %v2912_v55  ;;  %v3129_v48 = vsel %vm1318_vm8, %v3097_v11, %v7544_v61  ;;  %v9660_v11 = vld [vmem:[#allocation136_spill] sm:$0xff] }
 0x554   :  { %2949 = vrot.lane.b32.xlu0 %v9643_v57, %s3881_s15  ;;  %3737 = vmatmul.msk.f32.gmra.mxu1 %vm1455_vm13, %v3224_v36  ;;  %v3833_v36 = vld [vmem:[#allocation2 + $0x108] sm:$0xff] }
 0x556   :  { %v2938_v5 = vpop.permute.xlu0 %2937  ;;  %2748 = vrot.lane.b32.xlu2 %v7947_v46, %s3879_s13 }
 0x557   :  { %v3237_v40 = vsel %vm1417_vm11, %v3205_v45, %v2938_v5  ;;  %v9658_v5 = vld [vmem:[#allocation97_spill] sm:$0xff] }
 0x558   :  { %3750 = vmatmul.msk.f32.gmra.mxu3 %vm1455_vm13, %v3237_v40  ;;  %2624 = vrot.lane.b32.xlu1 %v9632_v62, %s3878_s0  ;;  %v7960_v42 = vpop.permute.xlu2 %2941  ;;  %v3015_v45 = vsel %vm18_vm0, %v3833_v36, %v9658_v5 }
 0x559   :  { %v3047_v25 = vsel %vm1219_vm6, %v3015_v45, %v9659_v53  ;;  %v9668_v45 = vld [vmem:[#allocation231_spill] sm:$0xff] }
 0x55a   :  { %v2711_v35 = vpop.permute.xlu1 %2710 }
 0x55b   :  { %v3161_v24 = vsel %vm1351_vm10, %v3129_v48, %v2711_v35  ;;  %v3079_v35 = vsel %vm1252_vm7, %v3047_v25, %v9660_v11 }
 0x55c   :  { %2650 = vrot.lane.b32.xlu0 %v9627_v0, %s3878_s0  ;;  %v9649_v0 = vld [vmem:[#allocation77_spill] sm:$0xff] }
 0x55d   :  { %v3014_v60 = vsel %vm18_vm0, %v3831_v15, %v9649_v0  ;;  %v9662_v15 = vld [vmem:[#allocation83_spill] sm:$0xff] }
 0x55e   :  { %v2813_v22 = vpop.permute.xlu0 %2812  ;;  %2951 = vrot.lane.b32.xlu2 %v9647_v16, %s3881_s15  ;;  %v3046_v49 = vsel %vm1219_vm6, %v3014_v60, %v9650_v59  ;;  %v2594_v0 = vrot.slane %v9662_v15, 2 }
 0x55f   :  { %v3193_v62 = vsel %vm1384_vm12, %v3161_v24, %v2813_v22 }
 0x560   :  { %v3225_v34 = vsel %vm1417_vm11, %v3193_v62, %v2914_v30  ;;  %2824 = vrot.lane.b32.xlu1 %v9648_v14, %s3880_s14  ;;  %v7982_v19 = vpop.permute.xlu2 %2816  ;;  %v3078_v30 = vsel %vm1252_vm7, %v3046_v49, %v9651_v51  ;;  %v3834_v14 = vld [vmem:[#allocation2 + $0x180] sm:$0xff] }
 0x561   :  { %3738 = vmatmul.msk.f32.gmra.mxu1 %vm1455_vm13, %v3225_v34  ;;  %v3110_v13 = vsel %vm1285_vm9, %v3078_v30, %v7524_v6  ;;  %v2591_v60 = vrot.slane %v3834_v14, 2 }
 0x562   :  { %v2737_v61 = vpop.permute.xlu1 %2736  ;;  %v3142_v29 = vsel %vm1318_vm8, %v3110_v13, %v7861_v18  ;;  %v9663_v13 = vld [vmem:[#allocation125_spill] sm:$0xff] }
 0x564   :  { %2925 = vrot.lane.b32.xlu0 %v6548_v17, %s3881_s15  ;;  %v3174_v17 = vsel %vm1351_vm10, %v3142_v29, %v2737_v61  ;;  %v3835_v61 = vld [vmem:[#allocation2 + $0x188] sm:$0xff] }
 0x565   :  { %v2592_v59 = vrot.slane %v3835_v61, 2 }
 0x566   :  { %v2839_v63 = vpop.permute.xlu0 %2838  ;;  %2652 = vrot.lane.b32.xlu2 %v9643_v57, %s3878_s0 }
 0x567   :  { %v3206_v54 = vsel %vm1384_vm12, %v3174_v17, %v2839_v63 }
 0x568   :  { %2850 = vrot.lane.b32.xlu1 %v6067_v52, %s3880_s14  ;;  %v8004_v33 = vpop.permute.xlu2 %2842  ;;  %v3832_v52 = vld [vmem:[#allocation2 + $0x68] sm:$0xff] }
 0x569   :  { %v3370_v4 = vpop.f32.mrf.mxu1  ;;  %v3002_v44 = vsel %vm18_vm0, %v3832_v52, %v9652_v1  ;;  %v1988_v52 = vld [vmem:[#allocation2 + $0x198] sm:$0xff] }
 0x56a   :  { %v2940_v3 = vpop.permute.xlu1 %2939  ;;  %3638 = vst.msk [vmem:[%s8549_s2 + $0x100] sm:$0xff] %vm1219_vm6, %v3370_v4  ;;  %v3034_v31 = vsel %vm1219_vm6, %v3002_v44, %v9653_v7  ;;  %v3536_v12 = vmul.f32 %v3370_v4, %v3370_v4  ;;  %v3466_v32 = vsel %vm1219_vm6, %v3370_v4, 0.0  ;;  %v2791_v1 = vrot.slane %v1988_v52, 1  ;;  %v8071_v7 = vld [vmem:[#allocation2 + $0x1a0] sm:$0xff] }
 0x56b   :  { %v3238_v6 = vsel %vm1417_vm11, %v3206_v54, %v2940_v3  ;;  %v3066_v50 = vsel %vm1252_vm7, %v3034_v31, %v9654_v23  ;;  %v8064_v3 = vsel %vm408_vm4, %v2592_v59, %v2594_v0  ;;  %v9664_v31 = vld [vmem:[#allocation37_spill] sm:$0xff] }
 0x56c   :  { %2626 = vrot.lane.b32.xlu0 %v9642_v26, %s3878_s0  ;;  %3751 = vmatmul.msk.f32.gmra.mxu3 %vm1455_vm13, %v3238_v6  ;;  %v3098_v20 = vsel %vm1285_vm9, %v3066_v50, %v9655_v10  ;;  %v9656_v26 = vld [vmem:[#allocation183_spill] sm:$0xff]  ;;  %v3568_v47 = vsel %vm1219_vm6, %v3536_v12, 0.0  ;;  %v2792_v12 = vrot.slane %v8071_v7, 1  ;;  %v3837_v10 = vld [vmem:[#allocation2 + $0x110] sm:$0xff] }
 0x56e   :  { %v2641_v18 = vpop.permute.xlu0 %2640  ;;  %2927 = vrot.lane.b32.xlu2 %v6586_v8, %s3881_s15  ;;  %v3130_v8 = vsel %vm1318_vm8, %v3098_v20, %v9656_v26  ;;  %v9665_v20 = vld [vmem:[#allocation180_spill] sm:$0xff]  ;;  %v9666_v26 = vld [vmem:[#allocation67_spill] sm:$0xff]  ;;  %v2793_v5 = vsel %vm231_vm2, %v2791_v1, %v2792_v12 }
 0x56f   :  { %v3162_v40 = vsel %vm1351_vm10, %v3130_v8, %v7903_v56  ;;  %v9661_v56 = vld [vmem:[#allocation28_spill] sm:$0xff] }
 0x570   :  { %2724 = vrot.lane.b32.xlu1 %v7873_v37, %s3879_s13  ;;  %v9657_v37 = vld [vmem:[#allocation115_spill] sm:$0xff]  ;;  %v3111_v22 = vsel %vm1285_vm9, %v3079_v35, %v9661_v56  ;;  %v8046_v34 = vpop.permute.xlu2 %2644 }
 0x571   :  { %v3373_v21 = vpop.f32.mrf.mxu1  ;;  %v3143_v62 = vsel %vm1318_vm8, %v3111_v22, %v2641_v18  ;;  %v2593_v18 = vsel %vm408_vm4, %v2591_v60, %v2592_v59  ;;  %v9672_v35 = vld [vmem:[#allocation39_spill] sm:$0xff]  ;;  %v2892_v59 = vrot.slane %v1988_v52, 2 }
 0x572   :  { %v2815_v55 = vpop.permute.xlu1 %2814  ;;  %v3467_v43 = vsel %vm1219_vm6, %v3373_v21, 0.0  ;;  %v3537_v57 = vmul.f32 %v3373_v21, %v3373_v21  ;;  %3639 = vst.msk [vmem:[%s8549_s2 + $0x108] sm:$0xff] %vm1219_vm6, %v3373_v21  ;;  %v3016_v21 = vsel %vm18_vm0, %v3837_v10, %v9665_v20 }
 0x573   :  { %v3468_v27 = vadd.f32 %v3467_v43, %v3466_v32  ;;  %v3194_v58 = vsel %vm1384_vm12, %v3162_v40, %v2815_v55  ;;  %v9667_v55 = vld [vmem:[#allocation202_spill] sm:$0xff]  ;;  %v3048_v40 = vsel %vm1219_vm6, %v3016_v21, %v9668_v45  ;;  %v9681_v45 = vld [vmem:[#allocation48_spill] sm:$0xff] }
 0x574   :  { %2826 = vrot.lane.b32.xlu0 %v9657_v37, %s3880_s14  ;;  %v3569_v38 = vsel %vm1219_vm6, %v3537_v57, 0.0 }
 0x575   :  { %v3570_v48 = vadd.f32 %v3569_v38, %v3568_v47  ;;  %v9670_v47 = vld [vmem:[#allocation141_spill] sm:$0xff]  ;;  %v9671_v38 = vld [vmem:[#allocation243_spill] sm:$0xff] }
 0x576   :  { %v2916_v39 = vpop.permute.xlu0 %2915  ;;  %2654 = vrot.lane.b32.xlu2 %v9647_v16, %s3878_s0  ;;  %v3175_v16 = vsel %vm1351_vm10, %v3143_v62, %v7932_v9  ;;  %v9673_v62 = vld [vmem:[#allocation86_spill] sm:$0xff] }
 0x577   :  { %v3226_v24 = vsel %vm1417_vm11, %v3194_v58, %v2916_v39  ;;  %v3080_v58 = vsel %vm1252_vm7, %v3048_v40, %v9670_v47  ;;  %v9682_v47 = vld [vmem:[#allocation159_spill] sm:$0xff] }
 0x578   :  { %3739 = vmatmul.msk.f32.gmra.mxu1 %vm1455_vm13, %v3226_v24  ;;  %2750 = vrot.lane.b32.xlu1 %v3834_v14, %s3879_s13  ;;  %v2920_v44 = vpop.permute.xlu2 %2919 }
 0x579   :  { %v3376_v49 = vpop.f32.mrf.mxu1 }
 0x57a   :  { %v2841_v51 = vpop.permute.xlu1 %2840  ;;  %v3469_v30 = vsel %vm1219_vm6, %v3376_v49, 0.0  ;;  %v3538_v63 = vmul.f32 %v3376_v49, %v3376_v49  ;;  %3640 = vst.msk [vmem:[%s8549_s2 + $0x110] sm:$0xff] %vm1219_vm6, %v3376_v49  ;;  %v2893_v49 = vrot.slane %v8071_v7, 2 }
 0x57b   :  { %v3207_v29 = vsel %vm1384_vm12, %v3175_v16, %v2841_v51  ;;  %v3470_v17 = vadd.f32 %v3469_v30, %v3468_v27  ;;  %v9669_v27 = vld [vmem:[#allocation237_spill] sm:$0xff] }
 0x57c   :  { %2852 = vrot.lane.b32.xlu0 %v9663_v13, %s3880_s14  ;;  %v3571_v54 = vsel %vm1219_vm6, %v3538_v63, 0.0  ;;  %v3239_v4 = vsel %vm1417_vm11, %v3207_v29, %v7960_v42  ;;  %v3836_v42 = vld [vmem:[#allocation2 + $0x78] sm:$0xff]  ;;  %v9674_v63 = vld [vmem:[#allocation148_spill] sm:$0xff]  ;;  %v2894_v29 = vsel %vm408_vm4, %v2892_v59, %v2893_v49 }
 0x57d   :  { %v3572_v6 = vadd.f32 %v3571_v54, %v3570_v48  ;;  %3752 = vmatmul.msk.f32.gmra.mxu3 %vm1455_vm13, %v3239_v4  ;;  %v3003_v23 = vsel %vm18_vm0, %v3836_v42, %v9664_v31  ;;  %v3112_v48 = vsel %vm1285_vm9, %v3080_v58, %v9672_v35  ;;  %v9678_v42 = vld [vmem:[#allocation162_spill] sm:$0xff] }
 0x57e   :  { %v2715_v9 = vpop.permute.xlu0 %2714  ;;  %2955 = vrot.lane.b32.xlu2 %v8064_v3, %s3881_s15  ;;  %v3035_v8 = vsel %vm1219_vm6, %v3003_v23, %v9666_v26 }
 0x57f   :  { %v3067_v43 = vsel %vm1252_vm7, %v3035_v8, %v9667_v55  ;;  %v3839_v55 = vld [vmem:[#allocation2 + $0x120] sm:$0xff] }
 0x580   :  { %2953 = vrot.lane.b32.xlu1 %v2593_v18, %s3881_s15  ;;  %v3099_v53 = vsel %vm1285_vm9, %v3067_v43, %v9669_v27  ;;  %v8109_v60 = vpop.permute.xlu2 %2718  ;;  %v9679_v43 = vld [vmem:[#allocation186_spill] sm:$0xff] }
 0x581   :  { %v3131_v39 = vsel %vm1318_vm8, %v3099_v53, %v9671_v38 }
 0x582   :  { %v2643_v50 = vpop.permute.xlu1 %2642  ;;  %v3163_v24 = vsel %vm1351_vm10, %v3131_v39, %v2715_v9  ;;  %v9676_v9 = vld [vmem:[#allocation45_spill] sm:$0xff] }
 0x583   :  { %v3144_v22 = vsel %vm1318_vm8, %v3112_v48, %v2643_v50  ;;  %v3195_v0 = vsel %vm1384_vm12, %v3163_v24, %v7982_v19  ;;  %v3838_v19 = vld [vmem:[#allocation2 + $0x80] sm:$0xff] }
 0x584   :  { %2752 = vrot.lane.b32.xlu0 %v3835_v61, %s3879_s13  ;;  %v3004_v13 = vsel %vm18_vm0, %v3838_v19, %v9674_v63  ;;  %v9685_v19 = vld [vmem:[#allocation111_spill] sm:$0xff] }
 0x585   :  { %v3379_v32 = vpop.f32.mrf.mxu1 }
 0x586   :  { %v3471_v57 = vsel %vm1219_vm6, %v3379_v32, 0.0  ;;  %v3539_v37 = vmul.f32 %v3379_v32, %v3379_v32  ;;  %3641 = vst.msk [vmem:[%s8549_s2 + $0x118] sm:$0xff] %vm1219_vm6, %v3379_v32  ;;  %v2741_v36 = vpop.permute.xlu0 %2740  ;;  %2856 = vrot.lane.b32.xlu2 %v2793_v5, %s3880_s14 }
 0x587   :  { %v3472_v25 = vadd.f32 %v3471_v57, %v3470_v17  ;;  %v3176_v14 = vsel %vm1351_vm10, %v3144_v22, %v2741_v36  ;;  %v9675_v17 = vld [vmem:[#allocation142_spill] sm:$0xff]  ;;  %v3017_v57 = vsel %vm18_vm0, %v3839_v55, %v9679_v43 }
 0x588   :  { %v3573_v11 = vsel %vm1219_vm6, %v3539_v37, 0.0  ;;  %2854 = vrot.lane.b32.xlu1 %v9673_v62, %s3880_s14  ;;  %v3208_v16 = vsel %vm1384_vm12, %v3176_v14, %v8004_v33  ;;  %v3036_v54 = vsel %vm1219_vm6, %v3004_v13, %v9675_v17  ;;  %v1990_v33 = vld [vmem:[#allocation2 + $0x1a8] sm:$0x3]  ;;  %v2745_v10 = vpop.permute.xlu2 %2744 }
 0x589   :  { %v3574_v56 = vadd.f32 %v3573_v11, %v3572_v6  ;;  %v3068_v6 = vsel %vm1252_vm7, %v3036_v54, %v9676_v9  ;;  %v2794_v31 = vrot.slane %v1990_v33, 1  ;;  %v2895_v32 = vrot.slane %v1990_v33, 2  ;;  %v9687_v33 = vld [vmem:[#allocation198_spill] sm:$0xff] }
 0x58a   :  { %v2918_v15 = vpop.permute.xlu1 %2917 }
 0x58b   :  { %v3227_v61 = vsel %vm1417_vm11, %v3195_v0, %v2918_v15  ;;  %v2795_v26 = vsel %vm231_vm2, %v2792_v12, %v2794_v31  ;;  %v9680_v12 = vld [vmem:[#allocation207_spill] sm:$0xff]  ;;  %v2896_v39 = vsel %vm408_vm4, %v2893_v49, %v2895_v32  ;;  %v3840_v0 = vld [vmem:[#allocation2 + $0x90] sm:$0xff] }
 0x58c   :  { %2656 = vrot.lane.b32.xlu0 %v2593_v18, %s3878_s0  ;;  %3740 = vmatmul.msk.f32.gmra.mxu1 %vm1455_vm13, %v3227_v61  ;;  %v9677_v18 = vld [vmem:[#allocation242_spill] sm:$0xff]  ;;  %v9683_v61 = vld [vmem:[#allocation36_spill] sm:$0xff] }
 0x58d   :  { %v3100_v1 = vsel %vm1285_vm9, %v3068_v6, %v9677_v18  ;;  %v3005_v59 = vsel %vm18_vm0, %v3840_v0, %v9683_v61  ;;  %v3841_v18 = vld [vmem:[#allocation2 + $0x128] sm:$0xff] }
 0x58e   :  { %v2944_v51 = vpop.permute.xlu0 %2943  ;;  %2756 = vrot.lane.b32.xlu2 %v8071_v7, %s3879_s13 }
 0x58f   :  { %v3240_v30 = vsel %vm1417_vm11, %v3208_v16, %v2944_v51  ;;  %v9684_v51 = vld [vmem:[#allocation13_spill] sm:$0xff] }
 0x590   :  { %3753 = vmatmul.msk.f32.gmra.mxu3 %vm1455_vm13, %v3240_v30  ;;  %2754 = vrot.lane.b32.xlu1 %v1988_v52, %s3879_s13  ;;  %v8126_v4 = vpop.f32.mrf.mxu3  ;;  %v3132_v52 = vsel %vm1318_vm8, %v3100_v1, %v9678_v42  ;;  %v2948_v48 = vpop.permute.xlu2 %2947  ;;  %v3037_v16 = vsel %vm1219_vm6, %v3005_v59, %v9684_v51  ;;  %v9688_v1 = vld [vmem:[#allocation179_spill] sm:$0xff] }
 0x591   :  { %3654 = vst.msk [vmem:[%s8549_s2 + $0x180] sm:$0xff] %vm1219_vm6, %v8126_v4  ;;  %v3069_v63 = vsel %vm1252_vm7, %v3037_v16, %v9685_v19 }
 0x592   :  { %v2717_v7 = vpop.permute.xlu1 %2716 }
 0x593   :  { %v3164_v23 = vsel %vm1351_vm10, %v3132_v52, %v2717_v7  ;;  %v3018_v7 = vsel %vm18_vm0, %v3841_v18, %v9688_v1  ;;  %v9689_v52 = vld [vmem:[#allocation89_spill] sm:$0xff] }
 0x594   :  { %2957 = vrot.lane.b32.xlu0 %v2894_v29, %s3881_s15  ;;  %v9686_v29 = vld [vmem:[#allocation88_spill] sm:$0xff]  ;;  %v3050_v31 = vsel %vm1219_vm6, %v3018_v7, %v9689_v52  ;;  %v9699_v18 = vld [vmem:[#allocation85_spill] sm:$0xff] }
 0x595   :  { %v3101_v17 = vsel %vm1285_vm9, %v3069_v63, %v9686_v29  ;;  %v3843_v63 = vld [vmem:[#allocation2 + $0xa8] sm:$0xff] }
 0x596   :  { %v2819_v50 = vpop.permute.xlu0 %2818  ;;  %v3133_v9 = vsel %vm1318_vm8, %v3101_v17, %v9687_v33 }
 0x597   :  { %v3196_v20 = vsel %vm1384_vm12, %v3164_v23, %v2819_v50  ;;  %v3165_v42 = vsel %vm1351_vm10, %v3133_v9, %v8109_v60  ;;  %v9698_v9 = vld [vmem:[#allocation241_spill] sm:$0xff] }
 0x598   :  { %v3228_v21 = vsel %vm1417_vm11, %v3196_v20, %v2920_v44  ;;  %2658 = vrot.lane.b32.xlu1 %v8064_v3, %s3878_s0  ;;  %v3049_v3 = vsel %vm1219_vm6, %v3017_v57, %v9680_v12  ;;  %v2823_v54 = vpop.permute.xlu2 %2822  ;;  %v9690_v20 = vld [vmem:[#allocation54_spill] sm:$0xff] }
 0x599   :  { %3741 = vmatmul.msk.f32.gmra.mxu1 %vm1455_vm13, %v3228_v21  ;;  %v3382_v8 = vpop.f32.mrf.mxu1  ;;  %v3081_v40 = vsel %vm1252_vm7, %v3049_v3, %v9681_v45  ;;  %v3082_v21 = vsel %vm1252_vm7, %v3050_v31, %v9690_v20  ;;  %v3842_v45 = vld [vmem:[#allocation2 + $0x138] sm:$0xff]  ;;  %v3844_v20 = vld [vmem:[#allocation2 + $0x140] sm:$0xff] }
 0x59a   :  { %v3473_v37 = vsel %vm1219_vm6, %v3382_v8, 0.0  ;;  %v3540_v36 = vmul.f32 %v3382_v8, %v3382_v8  ;;  %3642 = vst.msk [vmem:[%s8549_s2 + $0x120] sm:$0xff] %vm1219_vm6, %v3382_v8  ;;  %v2743_v44 = vpop.permute.xlu1 %2742  ;;  %v3113_v58 = vsel %vm1285_vm9, %v3081_v40, %v9682_v47  ;;  %v9691_v8 = vld [vmem:[#allocation76_spill] sm:$0xff] }
 0x59b   :  { %v3474_v5 = vadd.f32 %v3473_v37, %v3472_v25  ;;  %v3145_v11 = vsel %vm1318_vm8, %v3113_v58, %v8046_v34  ;;  %v3114_v32 = vsel %vm1285_vm9, %v3082_v21, %v9691_v8  ;;  %v9693_v58 = vld [vmem:[#allocation26_spill] sm:$0xff] }
 0x59c   :  { %2858 = vrot.lane.b32.xlu0 %v2795_v26, %s3880_s14  ;;  %v3575_v27 = vsel %vm1219_vm6, %v3540_v36, 0.0  ;;  %v3177_v35 = vsel %vm1351_vm10, %v3145_v11, %v2743_v44  ;;  %v9700_v21 = vld [vmem:[#allocation210_spill] sm:$0xff] }
 0x59d   :  { %v3576_v38 = vadd.f32 %v3575_v27, %v3574_v56 }
 0x59e   :  { %v2845_v53 = vpop.permute.xlu0 %2844 }
 0x59f   :  { %v3209_v25 = vsel %vm1384_vm12, %v3177_v35, %v2845_v53  ;;  %v9694_v35 = vld [vmem:[#allocation176_spill] sm:$0xff] }
 0x5a0   :  { %2959 = vrot.lane.b32.xlu1 %v2896_v39, %s3881_s15  ;;  %v2849_v57 = vpop.permute.xlu2 %2848 }
 0x5a2   :  { %v2946_v22 = vpop.permute.xlu1 %2945 }
 0x5a3   :  { %v8168_v24 = vpop.f32.mrf.mxu3  ;;  %v3241_v56 = vsel %vm1417_vm11, %v3209_v25, %v2946_v22  ;;  %v9695_v22 = vld [vmem:[#allocation127_spill] sm:$0xff] }
 0x5a4   :  { %3655 = vst.msk [vmem:[%s8549_s2 + $0x188] sm:$0xff] %vm1219_vm6, %v8168_v24  ;;  %3754 = vmatmul.msk.f32.gmra.mxu3 %vm1455_vm13, %v3241_v56 }
 0x5a6   :  { %v3385_v34 = vpop.f32.mrf.mxu1  ;;  %v2647_v62 = vpop.permute.xlu0 %2646 }
 0x5a7   :  { %v3475_v14 = vsel %vm1219_vm6, %v3385_v34, 0.0  ;;  %v3541_v15 = vmul.f32 %v3385_v34, %v3385_v34  ;;  %3643 = vst.msk [vmem:[%s8549_s2 + $0x128] sm:$0xff] %vm1219_vm6, %v3385_v34  ;;  %v3146_v55 = vsel %vm1318_vm8, %v3114_v32, %v2647_v62 }
 0x5a8   :  { %v3476_v49 = vadd.f32 %v3475_v14, %v3474_v5  ;;  %v3178_v60 = vsel %vm1351_vm10, %v3146_v55, %v2745_v10  ;;  %v9692_v10 = vld [vmem:[#allocation200_spill] sm:$0xff]  ;;  %v2723_v39 = vpop.permute.xlu2 %2722 }
 0x5a9   :  { %v3577_v30 = vsel %vm1219_vm6, %v3541_v15, 0.0  ;;  %v3019_v40 = vsel %vm18_vm0, %v3842_v45, %v9692_v10  ;;  %v9701_v55 = vld [vmem:[#allocation20_spill] sm:$0xff]  ;;  %v9703_v45 = vld [vmem:[#allocation123_spill] sm:$0xff] }
 0x5aa   :  { %v3578_v13 = vadd.f32 %v3577_v30, %v3576_v38  ;;  %v2821_v6 = vpop.permute.xlu1 %2820  ;;  %v3051_v38 = vsel %vm1219_vm6, %v3019_v40, %v9693_v58 }
 0x5ab   :  { %v3197_v23 = vsel %vm1384_vm12, %v3165_v42, %v2821_v6 }
 0x5ae   :  { %v2922_v50 = vpop.permute.xlu0 %2921 }
 0x5af   :  { %v3229_v26 = vsel %vm1417_vm11, %v3197_v23, %v2922_v50 }
 0x5b0   :  { %3742 = vmatmul.msk.f32.gmra.mxu1 %vm1455_vm13, %v3229_v26  ;;  %v3020_v26 = vsel %vm18_vm0, %v3844_v20, %v9700_v21 }
 0x5b2   :  { %v2847_v43 = vpop.permute.xlu1 %2846 }
 0x5b3   :  { %v3210_v37 = vsel %vm1384_vm12, %v3178_v60, %v2847_v43  ;;  %v3052_v43 = vsel %vm1219_vm6, %v3020_v26, %v9701_v55  ;;  %v9712_v55 = vld [vmem:[#allocation221_spill] sm:$0xff] }
 0x5b4   :  { %v3242_v36 = vsel %vm1417_vm11, %v3210_v37, %v2948_v48  ;;  %v3083_v48 = vsel %vm1252_vm7, %v3051_v38, %v9694_v35 }
 0x5b5   :  { %3755 = vmatmul.msk.f32.gmra.mxu3 %vm1455_vm13, %v3242_v36  ;;  %v3115_v56 = vsel %vm1285_vm9, %v3083_v48, %v9695_v22  ;;  %v9702_v36 = vld [vmem:[#allocation215_spill] sm:$0xff]  ;;  %v9704_v48 = vld [vmem:[#allocation10_spill] sm:$0xff] }
 0x5b6   :  { %v2721_v44 = vpop.permute.xlu0 %2720 }
 0x5b7   :  { %v8211_v12 = vpop.f32.mrf.mxu3  ;;  %v3166_v34 = vsel %vm1351_vm10, %v7645_v28, %v2721_v44  ;;  %v2749_v28 = vpop.permute.xlu2 %2748  ;;  %v3084_v44 = vsel %vm1252_vm7, %v3052_v43, %v9702_v36 }
 0x5b8   :  { %3656 = vst.msk [vmem:[%s8549_s2 + $0x190] sm:$0xff] %vm1219_vm6, %v8211_v12  ;;  %v3198_v61 = vsel %vm1384_vm12, %v3166_v34, %v2823_v54  ;;  %v9697_v54 = vld [vmem:[#allocation218_spill] sm:$0xff]  ;;  %v3116_v10 = vsel %vm1285_vm9, %v3084_v44, %v9703_v45  ;;  %v9705_v34 = vld [vmem:[#allocation160_spill] sm:$0xff] }
 0x5b9   :  { %v9714_v45 = vld [vmem:[#allocation196_spill] sm:$0xff] }
 0x5ba   :  { %v2649_v3 = vpop.permute.xlu1 %2648 }
 0x5bb   :  { %v3147_v14 = vsel %vm1318_vm8, %v3115_v56, %v2649_v3 }
 0x5bd   :  { %v3388_v5 = vpop.f32.mrf.mxu1 }
 0x5be   :  { %v3477_v27 = vsel %vm1219_vm6, %v3388_v5, 0.0  ;;  %v3542_v53 = vmul.f32 %v3388_v5, %v3388_v5  ;;  %3644 = vst.msk [vmem:[%s8549_s2 + $0x130] sm:$0xff] %vm1219_vm6, %v3388_v5  ;;  %v2747_v47 = vpop.permute.xlu0 %2746 }
 0x5bf   :  { %v3478_v11 = vadd.f32 %v3477_v27, %v3476_v49  ;;  %v3179_v15 = vsel %vm1351_vm10, %v3147_v14, %v2747_v47  ;;  %v2952_v42 = vpop.permute.xlu2 %2951 }
 0x5c0   :  { %v3579_v25 = vsel %vm1219_vm6, %v3542_v53, 0.0  ;;  %v3211_v51 = vsel %vm1384_vm12, %v3179_v15, %v2849_v57  ;;  %v9706_v15 = vld [vmem:[#allocation49_spill] sm:$0xff] }
 0x5c1   :  { %v3580_v62 = vadd.f32 %v3579_v25, %v3578_v13  ;;  %v9696_v13 = vld [vmem:[#allocation213_spill] sm:$0xff]  ;;  %v3008_v25 = vsel %vm18_vm0, %v7807_v2, %v9704_v48  ;;  %v9707_v2 = vld [vmem:[#allocation16_spill] sm:$0xff] }
 0x5c2   :  { %v2924_v0 = vpop.permute.xlu1 %2923  ;;  %v3007_v29 = vsel %vm18_vm0, %v3843_v63, %v9696_v13 }
 0x5c3   :  { %v3230_v59 = vsel %vm1417_vm11, %v3198_v61, %v2924_v0  ;;  %v3039_v33 = vsel %vm1219_vm6, %v3007_v29, %v9697_v54  ;;  %v9708_v54 = vld [vmem:[#allocation84_spill] sm:$0xff] }
 0x5c4   :  { %3743 = vmatmul.msk.f32.gmra.mxu1 %vm1455_vm13, %v3230_v59  ;;  %v3071_v6 = vsel %vm1252_vm7, %v3039_v33, %v9698_v9 }
 0x5c5   :  { %v3103_v1 = vsel %vm1285_vm9, %v3071_v6, %v9699_v18  ;;  %v9709_v6 = vld [vmem:[#allocation32_spill] sm:$0xff] }
 0x5c6   :  { %v2950_v49 = vpop.permute.xlu0 %2949 }
 0x5c7   :  { %v3243_v16 = vsel %vm1417_vm11, %v3211_v51, %v2950_v49  ;;  %v2653_v58 = vpop.permute.xlu2 %2652 }
 0x5c8   :  { %3756 = vmatmul.msk.f32.gmra.mxu3 %vm1455_vm13, %v3243_v16  ;;  %v8242_v30 = vpop.f32.mrf.mxu3 }
 0x5c9   :  { %3657 = vst.msk [vmem:[%s8549_s2 + $0x198] sm:$0xff] %vm1219_vm6, %v8242_v30 }
 0x5ca   :  { %v2625_v19 = vpop.permute.xlu1 %2624 }
 0x5cb   :  { %v3135_v7 = vsel %vm1318_vm8, %v3103_v1, %v2625_v19  ;;  %v9710_v1 = vld [vmem:[#allocation172_spill] sm:$0xff] }
 0x5cc   :  { %v3167_v32 = vsel %vm1351_vm10, %v3135_v7, %v2723_v39 }
 0x5ce   :  { %v2651_v17 = vpop.permute.xlu0 %2650 }
 0x5cf   :  { %v3148_v40 = vsel %vm1318_vm8, %v3116_v10, %v2651_v17  ;;  %v2928_v63 = vpop.permute.xlu2 %2927  ;;  %v3845_v17 = vld [vmem:[#allocation2 + $0x150] sm:$0xff] }
 0x5d0   :  { %v3180_v47 = vsel %vm1351_vm10, %v3148_v40, %v2749_v28  ;;  %v3021_v33 = vsel %vm18_vm0, %v3845_v17, %v9708_v54  ;;  %v9721_v54 = vld [vmem:[#allocation134_spill] sm:$0xff] }
 0x5d1   :  { %v3391_v52 = vpop.f32.mrf.mxu1  ;;  %v3053_v18 = vsel %vm1219_vm6, %v3021_v33, %v9709_v6  ;;  %v9722_v6 = vld [vmem:[#allocation203_spill] sm:$0xff] }
 0x5d2   :  { %v3479_v31 = vsel %vm1219_vm6, %v3391_v52, 0.0  ;;  %v3543_v23 = vmul.f32 %v3391_v52, %v3391_v52  ;;  %3645 = vst.msk [vmem:[%s8549_s2 + $0x138] sm:$0xff] %vm1219_vm6, %v3391_v52  ;;  %v2825_v50 = vpop.permute.xlu1 %2824  ;;  %v3085_v7 = vsel %vm1252_vm7, %v3053_v18, %v9710_v1  ;;  %v9711_v52 = vld [vmem:[#allocation70_spill] sm:$0xff] }
 0x5d3   :  { %v3480_v8 = vadd.f32 %v3479_v31, %v3478_v11  ;;  %v3199_v57 = vsel %vm1384_vm12, %v3167_v32, %v2825_v50  ;;  %v3117_v31 = vsel %vm1285_vm9, %v3085_v7, %v9711_v52  ;;  %v3846_v32 = vld [vmem:[#allocation2 + $0x158] sm:$0xff]  ;;  %v9723_v52 = vld [vmem:[#allocation104_spill] sm:$0xff] }
 0x5d4   :  { %v3581_v60 = vsel %vm1219_vm6, %v3543_v23, 0.0  ;;  %v3149_v23 = vsel %vm1318_vm8, %v3117_v31, %v2653_v58  ;;  %v3022_v43 = vsel %vm18_vm0, %v3846_v32, %v9712_v55 }
 0x5d5   :  { %v3582_v3 = vadd.f32 %v3581_v60, %v3580_v62  ;;  %v3040_v62 = vsel %vm1219_vm6, %v3008_v25, %v9705_v34 }
 0x5d6   :  { %v2926_v37 = vpop.permute.xlu0 %2925  ;;  %v3072_v0 = vsel %vm1252_vm7, %v3040_v62, %v9706_v15 }
 0x5d7   :  { %v3231_v5 = vsel %vm1417_vm11, %v3199_v57, %v2926_v37  ;;  %v3104_v59 = vsel %vm1285_vm9, %v3072_v0, %v9707_v2  ;;  %v2655_v50 = vpop.permute.xlu2 %2654  ;;  %v9713_v37 = vld [vmem:[#allocation166_spill] sm:$0xff]  ;;  %v9718_v0 = vld [vmem:[#allocation21_spill] sm:$0xff]  ;;  %v9719_v2 = vld [vmem:[#allocation167_spill] sm:$0xff] }
 0x5d8   :  { %3744 = vmatmul.msk.f32.gmra.mxu1 %vm1455_vm13, %v3231_v5  ;;  %v3054_v36 = vsel %vm1219_vm6, %v3022_v43, %v9713_v37 }
 0x5d9   :  { %v3086_v10 = vsel %vm1252_vm7, %v3054_v36, %v9714_v45 }
 0x5da   :  { %v2851_v53 = vpop.permute.xlu1 %2850 }
 0x5db   :  { %v8277_v27 = vpop.f32.mrf.mxu3  ;;  %v3212_v38 = vsel %vm1384_vm12, %v3180_v47, %v2851_v53  ;;  %v9715_v53 = vld [vmem:[#allocation153_spill] sm:$0xff] }
 0x5dc   :  { %3658 = vst.msk [vmem:[%s8549_s2 + $0x1a0] sm:$0xff] %vm1219_vm6, %v8277_v27  ;;  %v3244_v39 = vsel %vm1417_vm11, %v3212_v38, %v2952_v42  ;;  %v3118_v47 = vsel %vm1285_vm9, %v3086_v10, %v9715_v53 }
 0x5dd   :  { %3757 = vmatmul.msk.f32.gmra.mxu3 %vm1455_vm13, %v3244_v39  ;;  %v3150_v38 = vsel %vm1318_vm8, %v3118_v47, %v2655_v50 }
 0x5de   :  { %v3394_v11 = vpop.f32.mrf.mxu1  ;;  %v2627_v35 = vpop.permute.xlu0 %2626 }
 0x5df   :  { %v3481_v22 = vsel %vm1219_vm6, %v3394_v11, 0.0  ;;  %v3544_v56 = vmul.f32 %v3394_v11, %v3394_v11  ;;  %3646 = vst.msk [vmem:[%s8549_s2 + $0x140] sm:$0xff] %vm1219_vm6, %v3394_v11  ;;  %v3136_v51 = vsel %vm1318_vm8, %v3104_v59, %v2627_v35  ;;  %v2956_v11 = vpop.permute.xlu2 %2955 }
 0x5e0   :  { %v3482_v14 = vadd.f32 %v3481_v22, %v3480_v8  ;;  %v9716_v22 = vld [vmem:[#allocation81_spill] sm:$0xff] }
 0x5e1   :  { %v3583_v61 = vsel %vm1219_vm6, %v3544_v56, 0.0  ;;  %v3023_v56 = vsel %vm18_vm0, %v7909_v41, %v9716_v22 }
 0x5e2   :  { %v3584_v49 = vadd.f32 %v3583_v61, %v3582_v3  ;;  %v2725_v16 = vpop.permute.xlu1 %2724 }
 0x5e3   :  { %v3168_v28 = vsel %vm1351_vm10, %v3136_v51, %v2725_v16 }
 0x5e6   :  { %v2827_v19 = vpop.permute.xlu0 %2826 }
 0x5e7   :  { %v3200_v13 = vsel %vm1384_vm12, %v3168_v28, %v2827_v19  ;;  %v2857_v41 = vpop.permute.xlu2 %2856 }
 0x5e8   :  { %v3232_v29 = vsel %vm1417_vm11, %v3200_v13, %v2928_v63 }
 0x5e9   :  { %3745 = vmatmul.msk.f32.gmra.mxu1 %vm1455_vm13, %v3232_v29  ;;  %v9720_v29 = vld [vmem:[#allocation223_spill] sm:$0xff] }
 0x5ea   :  { %v2751_v9 = vpop.permute.xlu1 %2750  ;;  %v3024_v17 = vsel %vm18_vm0, %v7947_v46, %v9720_v29  ;;  %v3553_v29 = vmul.f32 %v8168_v24, %v8168_v24 }
 0x5eb   :  { %v3181_v20 = vsel %vm1351_vm10, %v3149_v23, %v2751_v9  ;;  %v3056_v33 = vsel %vm1219_vm6, %v3024_v17, %v9721_v54 }
 0x5ec   :  { %v3088_v18 = vsel %vm1252_vm7, %v3056_v33, %v9722_v6  ;;  %v3499_v6 = vsel %vm1219_vm6, %v8168_v24, 0.0  ;;  %v3503_v24 = vsel %vm1219_vm6, %v8242_v30, 0.0 }
 0x5ed   :  { %v3120_v31 = vsel %vm1285_vm9, %v3088_v18, %v9723_v52  ;;  %v3554_v18 = vmul.f32 %v8211_v12, %v8211_v12  ;;  %v3555_v52 = vmul.f32 %v8242_v30, %v8242_v30 }
 0x5ee   :  { %v2853_v42 = vpop.permute.xlu0 %2852 }
 0x5ef   :  { %v8318_v21 = vpop.f32.mrf.mxu3  ;;  %v3213_v26 = vsel %vm1384_vm12, %v3181_v20, %v2853_v42  ;;  %v2757_v20 = vpop.permute.xlu2 %2756 }
 0x5f0   :  { %3659 = vst.msk [vmem:[%s8549_s2 + $0x1a8] sm:$0xff] %vm1219_vm6, %v8318_v21  ;;  %v3507_v30 = vsel %vm1219_vm6, %v8318_v21, 0.0 }
 0x5f2   :  { %v2954_v8 = vpop.permute.xlu1 %2953 }
 0x5f3   :  { %v3245_v60 = vsel %vm1417_vm11, %v3213_v26, %v2954_v8 }
 0x5f4   :  { %3758 = vmatmul.msk.f32.gmra.mxu3 %vm1455_vm13, %v3245_v60 }
 0x5f5   :  { %v3397_v57 = vpop.f32.mrf.mxu1 }
 0x5f6   :  { %v3483_v44 = vsel %vm1219_vm6, %v3397_v57, 0.0  ;;  %v3545_v3 = vmul.f32 %v3397_v57, %v3397_v57  ;;  %3647 = vst.msk [vmem:[%s8549_s2 + $0x148] sm:$0xff] %vm1219_vm6, %v3397_v57  ;;  %v2753_v5 = vpop.permute.xlu0 %2752 }
 0x5f7   :  { %v3484_v40 = vadd.f32 %v3483_v44, %v3482_v14  ;;  %v3182_v35 = vsel %vm1351_vm10, %v3150_v38, %v2753_v5  ;;  %v9717_v14 = vld [vmem:[#allocation238_spill] sm:$0xff] }
 0x5f8   :  { %v3585_v58 = vsel %vm1219_vm6, %v3545_v3, 0.0  ;;  %v3055_v15 = vsel %vm1219_vm6, %v3023_v56, %v9717_v14 }
 0x5f9   :  { %v3586_v39 = vadd.f32 %v3585_v58, %v3584_v49  ;;  %v3087_v61 = vsel %vm1252_vm7, %v3055_v15, %v9718_v0 }
 0x5fa   :  { %v2855_v48 = vpop.permute.xlu1 %2854  ;;  %v3119_v59 = vsel %vm1285_vm9, %v3087_v61, %v9719_v2 }
 0x5fb   :  { %v3214_v25 = vsel %vm1384_vm12, %v3182_v35, %v2855_v48 }
 0x5fc   :  { %v3246_v34 = vsel %vm1417_vm11, %v3214_v25, %v2956_v11 }
 0x5fd   :  { %3759 = vmatmul.msk.f32.gmra.mxu3 %vm1455_vm13, %v3246_v34 }
 0x5fe   :  { %v2657_v62 = vpop.permute.xlu0 %2656 }
 0x5ff   :  { %v3151_v51 = vsel %vm1318_vm8, %v3119_v59, %v2657_v62 }
 0x600   :  { %v8356_v49 = vpop.f32.mrf.mxu3 }
 0x601   :  { %3660 = vst.msk [vmem:[%s8549_s2 + $0x1b0] sm:$0xff] %vm1219_vm6, %v8356_v49 }
 0x602   :  { %v2755_v16 = vpop.permute.xlu1 %2754 }
 0x603   :  { %v3183_v28 = vsel %vm1351_vm10, %v3151_v51, %v2755_v16 }
 0x604   :  { %v3215_v19 = vsel %vm1384_vm12, %v3183_v28, %v2857_v41  ;;  %v3552_v41 = vmul.f32 %v8126_v4, %v8126_v4 }
 0x606   :  { %v2958_v63 = vpop.permute.xlu0 %2957 }
 0x607   :  { %v3247_v13 = vsel %vm1417_vm11, %v3215_v19, %v2958_v63 }
 0x608   :  { %3760 = vmatmul.msk.f32.gmra.mxu3 %vm1455_vm13, %v3247_v13  ;;  %v3497_v13 = vsel %vm1219_vm6, %v8126_v4, 0.0  ;;  %v3501_v4 = vsel %vm1219_vm6, %v8211_v12, 0.0  ;;  %v3505_v12 = vsel %vm1219_vm6, %v8277_v27, 0.0 }
 0x609   :  { %v3400_v9 = vpop.f32.mrf.mxu1 }
 0x60a   :  { %v3485_v1 = vsel %vm1219_vm6, %v3400_v9, 0.0  ;;  %v3546_v7 = vmul.f32 %v3400_v9, %v3400_v9  ;;  %3648 = vst.msk [vmem:[%s8549_s2 + $0x150] sm:$0xff] %vm1219_vm6, %v3400_v9  ;;  %v2659_v42 = vpop.permute.xlu1 %2658  ;;  %v3599_v9 = vsel %vm1219_vm6, %v3552_v41, 0.0 }
 0x60b   :  { %v3486_v46 = vadd.f32 %v3485_v1, %v3484_v40  ;;  %v3152_v50 = vsel %vm1318_vm8, %v3120_v31, %v2659_v42  ;;  %v3601_v42 = vsel %vm1219_vm6, %v3553_v29, 0.0 }
 0x60c   :  { %v3587_v23 = vsel %vm1219_vm6, %v3546_v7, 0.0  ;;  %v3184_v32 = vsel %vm1351_vm10, %v3152_v50, %v2757_v20  ;;  %v3556_v50 = vmul.f32 %v8277_v27, %v8277_v27  ;;  %v3509_v27 = vsel %vm1219_vm6, %v8356_v49, 0.0 }
 0x60d   :  { %v3588_v26 = vadd.f32 %v3587_v23, %v3586_v39  ;;  %v3603_v23 = vsel %vm1219_vm6, %v3554_v18, 0.0 }
 0x60e   :  { %v2859_v8 = vpop.permute.xlu0 %2858 }
 0x60f   :  { %v3216_v55 = vsel %vm1384_vm12, %v3184_v32, %v2859_v8  ;;  %v3605_v8 = vsel %vm1219_vm6, %v3555_v52, 0.0  ;;  %v3557_v32 = vmul.f32 %v8318_v21, %v8318_v21 }
 0x612   :  { %v2960_v60 = vpop.permute.xlu1 %2959 }
 0x613   :  { %v8386_v43 = vpop.f32.mrf.mxu3  ;;  %v3248_v57 = vsel %vm1417_vm11, %v3216_v55, %v2960_v60 }
 0x614   :  { %3661 = vst.msk [vmem:[%s8549_s2 + $0x1b8] sm:$0xff] %vm1219_vm6, %v8386_v43  ;;  %3761 = vmatmul.msk.f32.gmra.mxu3 %vm1455_vm13, %v3248_v57  ;;  %v3607_v57 = vsel %vm1219_vm6, %v3556_v50, 0.0  ;;  %v3511_v21 = vsel %vm1219_vm6, %v8386_v43, 0.0 }
 0x616   :  { %v3403_v37 = vpop.f32.mrf.mxu1 }
 0x617   :  { %v3487_v36 = vsel %vm1219_vm6, %v3403_v37, 0.0  ;;  %v3547_v44 = vmul.f32 %v3403_v37, %v3403_v37  ;;  %3649 = vst.msk [vmem:[%s8549_s2 + $0x158] sm:$0xff] %vm1219_vm6, %v3403_v37  ;;  %v3558_v37 = vmul.f32 %v8356_v49, %v8356_v49 }
 0x618   :  { %v3488_v3 = vadd.f32 %v3487_v36, %v3486_v46 }
 0x619   :  { %v3589_v5 = vsel %vm1219_vm6, %v3547_v44, 0.0 }
 0x61a   :  { %v3590_v45 = vadd.f32 %v3589_v5, %v3588_v26  ;;  %v3559_v5 = vmul.f32 %v8386_v43, %v8386_v43 }
 0x627   :  { %v8401_v10 = vpop.f32.mrf.mxu3 }
 0x628   :  { %3662 = vst.msk [vmem:[%s8549_s2 + $0x1c0] sm:$0xff] %vm1219_vm6, %v8401_v10  ;;  %v3513_v49 = vsel %vm1219_vm6, %v8401_v10, 0.0 }
 0x62d   :  { %v3406_v40 = vpop.f32.mrf.mxu1 }
 0x62e   :  { %v3489_v53 = vsel %vm1219_vm6, %v3406_v40, 0.0  ;;  %v3548_v47 = vmul.f32 %v3406_v40, %v3406_v40  ;;  %3650 = vst.msk [vmem:[%s8549_s2 + $0x160] sm:$0xff] %vm1219_vm6, %v3406_v40 }
 0x62f   :  { %v3490_v58 = vadd.f32 %v3489_v53, %v3488_v3  ;;  %v3609_v3 = vsel %vm1219_vm6, %v3557_v32, 0.0  ;;  %v3611_v53 = vsel %vm1219_vm6, %v3558_v37, 0.0 }
 0x630   :  { %v3591_v38 = vsel %vm1219_vm6, %v3548_v47, 0.0  ;;  %v3560_v47 = vmul.f32 %v8401_v10, %v8401_v10 }
 0x631   :  { %v3592_v39 = vadd.f32 %v3591_v38, %v3590_v45 }
 0x632   :  { %v3615_v43 = vsel %vm1219_vm6, %v3560_v47, 0.0 }
 0x638   :  { %v8414_v11 = vpop.f32.mrf.mxu3 }
 0x639   :  { %3663 = vst.msk [vmem:[%s8549_s2 + $0x1c8] sm:$0xff] %vm1219_vm6, %v8414_v11 }
 0x641   :  { %v3409_v35 = vpop.f32.mrf.mxu1 }
 0x642   :  { %3651 = vst.msk [vmem:[%s8549_s2 + $0x168] sm:$0xff] %vm1219_vm6, %v3409_v35  ;;  %v3549_v22 = vmul.f32 %v3409_v35, %v3409_v35  ;;  %v3491_v56 = vsel %vm1219_vm6, %v3409_v35, 0.0  ;;  %v3561_v35 = vmul.f32 %v8414_v11, %v8414_v11 }
 0x643   :  { %v3492_v0 = vadd.f32 %v3491_v56, %v3490_v58 }
 0x644   :  { %v3593_v14 = vsel %vm1219_vm6, %v3549_v22, 0.0 }
 0x645   :  { %v3594_v2 = vadd.f32 %v3593_v14, %v3592_v39  ;;  %v3613_v39 = vsel %vm1219_vm6, %v3559_v5, 0.0 }
 0x64b   :  { %v8425_v48 = vpop.f32.mrf.mxu3 }
 0x64c   :  { %3664 = vst.msk [vmem:[%s8549_s2 + $0x1d0] sm:$0xff] %vm1219_vm6, %v8425_v48  ;;  %v3562_v14 = vmul.f32 %v8425_v48, %v8425_v48 }
 0x655   :  { %v3412_v25 = vpop.f32.mrf.mxu1 }
 0x656   :  { %3652 = vst.msk [vmem:[%s8549_s2 + $0x170] sm:$0xff] %vm1219_vm6, %v3412_v25  ;;  %v3550_v34 = vmul.f32 %v3412_v25, %v3412_v25  ;;  %v3493_v15 = vsel %vm1219_vm6, %v3412_v25, 0.0 }
 0x657   :  { %v3494_v59 = vadd.f32 %v3493_v15, %v3492_v0  ;;  %v3617_v0 = vsel %vm1219_vm6, %v3561_v35, 0.0 }
 0x658   :  { %v3595_v61 = vsel %vm1219_vm6, %v3550_v34, 0.0  ;;  %v3515_v34 = vsel %vm1219_vm6, %v8414_v11, 0.0  ;;  %v9724_v11 = vmov 0.0  }
 0x659   :  { %v3596_v19 = vadd.f32 %v3595_v61, %v3594_v2  ;;  %v3517_v61 = vsel %vm1219_vm6, %v8425_v48, 0.0  ;;  %62 = vst.msk [vmem:[#allocation3] sm:$0x3] %vm61_vm14, %v9724_v11 }
 0x660   :  { %v8437_v62 = vpop.f32.mrf.mxu3 }
 0x661   :  { %3665 = vst.msk [vmem:[%s8549_s2 + $0x1d8] sm:$0xff] %vm1219_vm6, %v8437_v62  ;;  %v3519_v48 = vsel %vm1219_vm6, %v8437_v62, 0.0 }
 0x666   :  { %v3415_v51 = vpop.f32.mrf.mxu1 }
 0x667   :  { %v3495_v16 = vsel %vm1219_vm6, %v3415_v51, 0.0  ;;  %v3551_v28 = vmul.f32 %v3415_v51, %v3415_v51  ;;  %3653 = vst.msk [vmem:[%s8549_s2 + $0x178] sm:$0xff] %vm1219_vm6, %v3415_v51  ;;  %v3619_v51 = vsel %vm1219_vm6, %v3562_v14, 0.0 }
 0x668   :  { %v3496_v63 = vadd.f32 %v3495_v16, %v3494_v59 }
 0x669   :  { %v3597_v17 = vsel %vm1219_vm6, %v3551_v28, 0.0 }
 0x66a   :  { %v3498_v54 = vadd.f32 %v3497_v13, %v3496_v63  ;;  %v3598_v33 = vadd.f32 %v3597_v17, %v3596_v19  ;;  %v3563_v19 = vmul.f32 %v8437_v62, %v8437_v62 }
 0x66c   :  { %v3500_v1 = vadd.f32 %v3499_v6, %v3498_v54  ;;  %v3600_v7 = vadd.f32 %v3599_v9, %v3598_v33  ;;  %v3621_v13 = vsel %vm1219_vm6, %v3563_v19, 0.0  ;;  %v9725_v33 = vld [vmem:[#allocation31_spill] sm:$0xff] }
 0x66d   :  { %v1732_v9 = vrot.slane %v9725_v33, 4 }
 0x66e   :  { %v3502_v31 = vadd.f32 %v3501_v4, %v3500_v1  ;;  %v3602_v46 = vadd.f32 %v3601_v42, %v3600_v7  ;;  %v9726_v42 = vld [vmem:[#allocation92_spill] sm:$0xff] }
 0x66f   :  { %v1834_v4 = vrot.slane %v9726_v42, 4 }
 0x670   :  { %v3504_v20 = vadd.f32 %v3503_v24, %v3502_v31  ;;  %v3604_v26 = vadd.f32 %v3603_v23, %v3602_v46  ;;  %v1733_v46 = vadd.f32 %v1732_v9, %v9725_v33 }
 0x672   :  { %v3506_v55 = vadd.f32 %v3505_v12, %v3504_v20  ;;  %v3606_v60 = vadd.f32 %v3605_v8, %v3604_v26  ;;  %v1835_v20 = vadd.f32 %v1834_v4, %v9726_v42 }
 0x674   :  { %v3508_v36 = vadd.f32 %v3507_v30, %v3506_v55  ;;  %v3608_v44 = vadd.f32 %v3607_v57, %v3606_v60  ;;  %v1734_v60 = vrot.slane %v1733_v46, 2 }
 0x676   :  { %v3610_v45 = vadd.f32 %v3609_v3, %v3608_v44  ;;  %v3510_v40 = vadd.f32 %v3509_v27, %v3508_v36  ;;  %v1836_v36 = vrot.slane %v1835_v20, 2  ;;  %v1735_v27 = vadd.f32 %v1734_v60, %v1733_v46 }
 0x677   :  { %v3454_v25 = vpop.f32.mrf.mxu3 }
 0x678   :  { %v3512_v58 = vadd.f32 %v3511_v21, %v3510_v40  ;;  %v3612_v38 = vadd.f32 %v3611_v53, %v3610_v45  ;;  %3666 = vst.msk [vmem:[%s8549_s2 + $0x1e0] sm:$0xff] %vm1219_vm6, %v3454_v25  ;;  %v3564_v29 = vmul.f32 %v3454_v25, %v3454_v25  ;;  %v3521_v54 = vsel %vm1219_vm6, %v3454_v25, 0.0 }
 0x679   :  { %v1837_v40 = vadd.f32 %v1836_v36, %v1835_v20  ;;  %v1736_v47 = vrot.slane %v1735_v27, 1 }
 0x67a   :  { %v3514_v22 = vadd.f32 %v3513_v49, %v3512_v58  ;;  %v3614_v56 = vadd.f32 %v3613_v39, %v3612_v38  ;;  %v3623_v18 = vsel %vm1219_vm6, %v3564_v29, 0.0 }
 0x67b   :  { %v1838_v39 = vrot.slane %v1837_v40, 1  ;;  %v1737_v25 = vadd.f32 %v1736_v47, %v1735_v27 }
 0x67c   :  { %v3516_v10 = vadd.f32 %v3515_v34, %v3514_v22  ;;  %v3616_v15 = vadd.f32 %v3615_v43, %v3614_v56 }
 0x67d   :  { %v1839_v43 = vadd.f32 %v1838_v39, %v1837_v40 }
 0x67e   :  { %v3518_v2 = vadd.f32 %v3517_v61, %v3516_v10  ;;  %v3618_v59 = vadd.f32 %v3617_v0, %v3616_v15  ;;  %v3670_v15 = vld [vmem:[#allocation3] sm:$0x3] }
 0x680   :  { %v3620_v41 = vadd.f32 %v3619_v51, %v3618_v59  ;;  %v3457_v16 = vpop.f32.mrf.mxu3  ;;  %v3520_v63 = vadd.f32 %v3519_v48, %v3518_v2 }
 0x681   :  { %3667 = vst.msk [vmem:[%s8549_s2 + $0x1e8] sm:$0xff] %vm1219_vm6, %v3457_v16  ;;  %v3565_v1 = vmul.f32 %v3457_v16, %v3457_v16  ;;  %v3523_v31 = vsel %vm1219_vm6, %v3457_v16, 0.0 }
 0x682   :  { %v3622_v17 = vadd.f32 %v3621_v13, %v3620_v41  ;;  %v3522_v6 = vadd.f32 %v3521_v54, %v3520_v63 }
 0x683   :  { %v3625_v24 = vsel %vm1219_vm6, %v3565_v1, 0.0 }
 0x684   :  { %v3624_v52 = vadd.f32 %v3623_v18, %v3622_v17  ;;  %v3524_v23 = vadd.f32 %v3523_v31, %v3522_v6 }
 0x686   :  { %v3626_v26 = vadd.f32 %v3625_v24, %v3624_v52 }
 0x68b   :  { %v3460_v28 = vpop.f32.mrf.mxu3 }
 0x68c   :  { %3668 = vst.msk [vmem:[%s8549_s2 + $0x1f0] sm:$0xff] %vm1219_vm6, %v3460_v28  ;;  %v3566_v7 = vmul.f32 %v3460_v28, %v3460_v28  ;;  %v3525_v62 = vsel %vm1219_vm6, %v3460_v28, 0.0 }
 0x68d   :  { %v3526_v8 = vadd.f32 %v3525_v62, %v3524_v23 }
 0x68e   :  { %v3627_v50 = vsel %vm1219_vm6, %v3566_v7, 0.0 }
 0x68f   :  { %v3628_v57 = vadd.f32 %v3627_v50, %v3626_v26 }
 0x697   :  { %v3463_v12 = vpop.f32.mrf.mxu3 }
 0x698   :  { %v3527_v32 = vsel %vm1219_vm6, %v3463_v12, 0.0  ;;  %v3567_v55 = vmul.f32 %v3463_v12, %v3463_v12  ;;  %3669 = vst.msk [vmem:[%s8549_s2 + $0x1f8] sm:$0xff] %vm1219_vm6, %v3463_v12  ;;  %s3882_s2 = smov [#allocation3]  }
 0x699   :  { %v3528_v30 = vadd.f32 %v3527_v32, %v3526_v8  ;;  %s3683_s11 = sshll.u32 %s3882_s2, 4  ;;  %s3684_s11 = int_to_ptr.vmem [resolvable:$true] %s3683_s11 }
 0x69a   :  { %v3629_v37 = vsel %vm1219_vm6, %v3567_v55, 0.0 }
 0x69b   :  { %v3529_v44 = vrot.slane %v3528_v30, 4  ;;  %v3630_v3 = vadd.f32 %v3629_v37, %v3628_v57 }
 0x69d   :  { %v3530_v5 = vadd.f32 %v3529_v44, %v3528_v30  ;;  %v3631_v45 = vrot.slane %v3630_v3, 4 }
 0x69f   :  { %v3531_v53 = vrot.slane %v3530_v5, 2  ;;  %v3632_v21 = vadd.f32 %v3631_v45, %v3630_v3 }
 0x6a1   :  { %v3532_v58 = vadd.f32 %v3531_v53, %v3530_v5  ;;  %v3633_v38 = vrot.slane %v3632_v21, 2 }
 0x6a3   :  { %v3533_v49 = vrot.slane %v3532_v58, 1  ;;  %v3634_v35 = vadd.f32 %v3633_v38, %v3632_v21 }
 0x6a5   :  { %v3534_v22 = vadd.f32 %v3533_v49, %v3532_v58  ;;  %v3635_v56 = vrot.slane %v3634_v35, 1 }
 0x6a7   :  { %v3535_v34 = vadd.f32 %v3534_v22, %v1737_v25  ;;  %v3636_v14 = vadd.f32 %v3635_v56, %v3634_v35 }
 0x6a9   :  { %v3637_v10 = vadd.f32 %v3636_v14, %v1839_v43 }
 0x6ab   :  { %v3672_v0 = vsel %vm3671_vm15, %v3535_v34, %v3637_v10 }
 0x6ac   :  { %v3673_v61 = vadd.f32 %v3672_v0, %v3670_v15 }
 0x6ae   :  { %3675 = vst.msk [vmem:[#allocation3] sm:$0x3] %vm61_vm14, %v3673_v61 }
 0x6af   :  { %3688 = dma.vmem_to_hbm [thread:$0]  %s3684_s11, 32, %s3686_s17, [#allocation4]  }
 0x6b0   :  { %3871 = dma.done.wait [#allocation4], 32  }
 0x6b1   :  { %3872 = vsyncadd [#allocation4], 4294967264 }
 0x6b2   :  { %3695 = vsyncpa [#allocation4], 1 }

</bundles_post_ra>
